<compile_context>
chip_gen: v7x
topology: tpu7x:2x2x1
jax: 0.10.0
libtpu: 0.0.40
codegen_flags: <defaults>
</compile_context>

<pallas_src>
import functools

import jax
import jax.numpy as jnp
import numpy as np
from jax import lax
from jax.experimental import pallas as pl
from jax.experimental.pallas import tpu as pltpu

_EPS = 1e-5
_VMEM_LIMIT_BYTES = 32 * 1024 * 1024
# Set to jnp.bfloat16 on v6e/v7x for 2x MXU rate (accumulation stays f32);
# kept f32 here so the self-check matches the f32 reference at 1e-4.
_MATMUL_DTYPE = jnp.float32


# ---------------------------------------------------------------------------
# Kernel 1: 3x3 conv (padding handled in-kernel) + per-block BN partial stats.
# Optionally applies a fused per-channel scale/shift + ReLU to its *input*
# (used to fold bn1+relu into the conv-2 pass).
# ---------------------------------------------------------------------------
def _conv3x3_stats_kernel(x_ref, w_ref, sc_ref, sh_ref,
                          y_ref, stats_ref, patch_ref, *,
                          fuse_input_bn_relu):
    # x_ref:     (1, H, W, Cin)
    # w_ref:     (9*Cin, Cout)   pre-flattened HWIO weights
    # sc_ref/sh_ref: (1, Cin)    input prologue scale/shift (ignored if unused)
    # y_ref:     (1, H, W, Cout) raw (pre-BN) conv output
    # stats_ref: (1, 8, Cout)    row 0 = sum, row 1 = sum of squares
    # patch_ref: (H, W, 9*Cin)   VMEM im2col scratch
    _, H, W, Cin = x_ref.shape
    Cout = y_ref.shape[-1]

    x = x_ref[...]
    if fuse_input_bn_relu:
        x = jnp.maximum(
            x * sc_ref[...].reshape(1, 1, 1, Cin)
            + sh_ref[...].reshape(1, 1, 1, Cin), 0.0)
    x = x[0]  # (H, W, Cin)

    # im2col with the padding-1 halo handled by the zero init: for each of the
    # 9 taps, copy only the valid interior window into its channel slot.
    patch_ref[...] = jnp.zeros_like(patch_ref)
    for kh in range(3):
        for kw in range(3):
            tap = kh * 3 + kw
            h0, h1 = max(0, 1 - kh), min(H, H + 1 - kh)
            w0, w1 = max(0, 1 - kw), min(W, W + 1 - kw)
            patch_ref[h0:h1, w0:w1, tap * Cin:(tap + 1) * Cin] = x[
                h0 + kh - 1:h1 + kh - 1, w0 + kw - 1:w1 + kw - 1, :]

    # Single MXU matmul with K = 9*Cin (instead of nine K=Cin matmuls).
    patch = patch_ref[...].reshape(H * W, 9 * Cin)
    acc = jnp.dot(patch.astype(_MATMUL_DTYPE),
                  w_ref[...].astype(_MATMUL_DTYPE),
                  preferred_element_type=jnp.float32)  # (H*W, Cout)

    # Per-block BN partial statistics (reduced across blocks in plain JAX).
    stats_ref[...] = jnp.zeros_like(stats_ref)
    stats_ref[:, 0:1, :] = jnp.sum(acc, axis=0, keepdims=True).reshape(1, 1, Cout)
    stats_ref[:, 1:2, :] = jnp.sum(acc * acc, axis=0, keepdims=True).reshape(1, 1, Cout)

    y_ref[...] = acc.reshape(1, H, W, Cout)


def _conv3x3_bn_stats(x_nhwc, w_hwio, in_scale=None, in_shift=None, *,
                      fuse_input_bn_relu=False):
    N, H, W, Cin = x_nhwc.shape
    Cout = w_hwio.shape[-1]
    w_flat = w_hwio.reshape(9 * Cin, Cout).astype(jnp.float32)
    if in_scale is None:
        in_scale = jnp.ones((Cin,), jnp.float32)
        in_shift = jnp.zeros((Cin,), jnp.float32)

    kernel = functools.partial(_conv3x3_stats_kernel,
                               fuse_input_bn_relu=fuse_input_bn_relu)
    y, stats = pl.pallas_call(
        kernel,
        out_shape=(jax.ShapeDtypeStruct((N, H, W, Cout), jnp.float32),
                   jax.ShapeDtypeStruct((N, 8, Cout), jnp.float32)),
        grid=(N,),
        in_specs=[
            pl.BlockSpec((1, H, W, Cin), lambda n: (n, 0, 0, 0)),
            pl.BlockSpec((9 * Cin, Cout), lambda n: (0, 0)),
            pl.BlockSpec((1, Cin), lambda n: (0, 0)),
            pl.BlockSpec((1, Cin), lambda n: (0, 0)),
        ],
        out_specs=(
            pl.BlockSpec((1, H, W, Cout), lambda n: (n, 0, 0, 0)),
            pl.BlockSpec((1, 8, Cout), lambda n: (n, 0, 0)),
        ),
        scratch_shapes=[pltpu.VMEM((H, W, 9 * Cin), jnp.float32)],
        compiler_params=pltpu.CompilerParams(
            dimension_semantics=("parallel",),
            vmem_limit_bytes=_VMEM_LIMIT_BYTES),
    )(x_nhwc.astype(jnp.float32), w_flat,
      in_scale.reshape(1, Cin).astype(jnp.float32),
      in_shift.reshape(1, Cin).astype(jnp.float32))
    return y, stats


def _stats_to_scale_shift(stats, count, gamma, beta):
    """Fold global BN stats + affine into one per-channel scale/shift."""
    total = jnp.sum(stats[:, 0, :], axis=0)
    total_sq = jnp.sum(stats[:, 1, :], axis=0)
    mean = total / count
    var = jnp.maximum(total_sq / count - mean * mean, 0.0)
    scale = gamma.astype(jnp.float32) * lax.rsqrt(var + _EPS)
    shift = beta.astype(jnp.float32) - mean * scale
    return scale, shift


# ---------------------------------------------------------------------------
# Kernel 2: lane-dense per-channel scale/shift + ReLU (the final bn2+relu).
# ---------------------------------------------------------------------------
def _scale_shift_relu_kernel(x_ref, sc_ref, sh_ref, o_ref):
    o_ref[...] = jnp.maximum(x_ref[...] * sc_ref[...] + sh_ref[...], 0.0)


def _pick_row_block(rows, max_rows=512):
    if rows <= max_rows:
        return rows
    for cand in range(max_rows, 7, -8):
        if rows % cand == 0:
            return cand
    return rows  # fall back to a single full-extent block


def _scale_shift_relu_lanedense(y_raw, scale, shift):
    N, H, W, C = y_raw.shape
    rows, wc = N * H, W * C
    x2 = y_raw.reshape(rows, wc)                       # free row-major reshape
    sc = jnp.tile(scale.astype(jnp.float32), W).reshape(1, wc)
    sh = jnp.tile(shift.astype(jnp.float32), W).reshape(1, wc)
    tr = _pick_row_block(rows)
    out = pl.pallas_call(
        _scale_shift_relu_kernel,
        out_shape=jax.ShapeDtypeStruct((rows, wc), jnp.float32),
        grid=(pl.cdiv(rows, tr),),
        in_specs=[
            pl.BlockSpec((tr, wc), lambda r: (r, 0)),
            pl.BlockSpec((1, wc), lambda r: (0, 0)),
            pl.BlockSpec((1, wc), lambda r: (0, 0)),
        ],
        out_specs=pl.BlockSpec((tr, wc), lambda r: (r, 0)),
        compiler_params=pltpu.CompilerParams(
            dimension_semantics=("parallel",),
            vmem_limit_bytes=_VMEM_LIMIT_BYTES),
    )(x2, sc, sh)
    return out.reshape(N, H, W, C)


# ---------------------------------------------------------------------------
# Forward pass (NCHW in / NCHW out, matching the PyTorch module).
# ---------------------------------------------------------------------------
def double_conv2d_bn_forward(x_nchw, params):
    x = jnp.transpose(x_nchw, (0, 2, 3, 1)).astype(jnp.float32)  # NCHW -> NHWC
    N, H, W, _ = x.shape
    count = float(N * H * W)

    # Layer 1: conv1 (+ partial BN stats). Conv bias dropped (cancelled by BN).
    y1, stats1 = _conv3x3_bn_stats(x, params["w1"])
    scale1, shift1 = _stats_to_scale_shift(stats1, count,
                                           params["g1"], params["beta1"])

    # Layer 2: bn1+relu fused into the conv-2 input prologue, conv2 + stats.
    y2, stats2 = _conv3x3_bn_stats(y1, params["w2"], scale1, shift1,
                                   fuse_input_bn_relu=True)
    scale2, shift2 = _stats_to_scale_shift(stats2, count,
                                           params["g2"], params["beta2"])

    # Final bn2 + relu, lane-dense elementwise kernel.
    out = _scale_shift_relu_lanedense(y2, scale2, shift2)
    return jnp.transpose(out, (0, 3, 1, 2))  # NHWC -> NCHW


def init_params(key, in_channels, out_channels, kernel_size=3):
    """Deterministic init mirroring PyTorch Conv2d/BatchNorm2d shapes."""
    k1, k2, k3, k4 = jax.random.split(key, 4)
    fan_in1 = in_channels * kernel_size * kernel_size
    fan_in2 = out_channels * kernel_size * kernel_size
    bound1 = 1.0 / np.sqrt(fan_in1)
    bound2 = 1.0 / np.sqrt(fan_in2)
    # weights stored as HWIO = (kh, kw, Cin, Cout)
    w1 = jax.random.uniform(
        k1, (kernel_size, kernel_size, in_channels, out_channels),
        minval=-bound1, maxval=bound1, dtype=jnp.float32)
    b1 = jax.random.uniform(k2, (out_channels,), minval=-bound1, maxval=bound1,
                            dtype=jnp.float32)
    w2 = jax.random.uniform(
        k3, (kernel_size, kernel_size, out_channels, out_channels),
        minval=-bound2, maxval=bound2, dtype=jnp.float32)
    b2 = jax.random.uniform(k4, (out_channels,), minval=-bound2, maxval=bound2,
                            dtype=jnp.float32)
    # b1/b2 kept for PyTorch parity; they have no effect under training-mode BN
    # and are not used by the Pallas path.
    return {
        "w1": w1, "b1": b1,
        "g1": jnp.ones((out_channels,), jnp.float32),
        "beta1": jnp.zeros((out_channels,), jnp.float32),
        "w2": w2, "b2": b2,
        "g2": jnp.ones((out_channels,), jnp.float32),
        "beta2": jnp.zeros((out_channels,), jnp.float32),
    }


def _reference_forward(x_nchw, params):
    """Pure-JAX reference (lax.conv + batchnorm + relu), bias included."""
    def conv_bn_relu(x, w, b, g, beta):
        w_oihw = jnp.transpose(w, (3, 2, 0, 1))
        y = lax.conv_general_dilated(
            x, w_oihw, window_strides=(1, 1), padding=((1, 1), (1, 1)),
            dimension_numbers=("NCHW", "OIHW", "NCHW"))
        y = y + b[None, :, None, None]
        mean = jnp.mean(y, axis=(0, 2, 3), keepdims=True)
        var = jnp.mean((y - mean) ** 2, axis=(0, 2, 3), keepdims=True)
        yhat = (y - mean) * lax.rsqrt(var + _EPS)
        yhat = yhat * g[None, :, None, None] + beta[None, :, None, None]
        return jnp.maximum(yhat, 0.0)

    h = conv_bn_relu(x_nchw, params["w1"], params["b1"], params["g1"], params["beta1"])
    return conv_bn_relu(h, params["w2"], params["b2"], params["g2"], params["beta2"])


if __name__ == "__main__":
    key = jax.random.PRNGKey(0)
    kx, kp = jax.random.split(key)

    N, Cin, Cout, H, W = 2, 4, 8, 16, 16
    x = jax.random.normal(kx, (N, Cin, H, W), dtype=jnp.float32)
    params = init_params(kp, Cin, Cout)

    fwd = jax.jit(double_conv2d_bn_forward)
    out = jax.block_until_ready(fwd(x, params))
    assert out.shape == (N, Cout, H, W), out.shape

    ref = jax.block_until_ready(_reference_forward(x, params))
    np.testing.assert_allclose(np.asarray(out), np.asarray(ref),
                               rtol=1e-4, atol=1e-4)

    print("KERNEL_OK")
</pallas_src>

<mosaic_0001>
module attributes {stable_mosaic.version = 11 : i64} {
  func.func @_conv3x3_stats_kernel(%arg0: i32, %arg1: memref<1x16x16x4xf32, #tpu.memory_space<vmem>>, %arg2: memref<36x8xf32, #tpu.memory_space<vmem>>, %arg3: memref<1x4xf32, #tpu.memory_space<vmem>>, %arg4: memref<1x4xf32, #tpu.memory_space<vmem>>, %arg5: memref<1x16x16x8xf32, #tpu.memory_space<vmem>>, %arg6: memref<1x8x8xf32, #tpu.memory_space<vmem>>, %arg7: memref<16x16x36xf32, #tpu.memory_space<vmem>>) attributes {dimension_semantics = [#tpu.dimension_semantics<parallel>], iteration_bounds = array<i64: 2>, scalar_prefetch = 0 : i64, scratch_operands = 1 : i64, tpu.core_type = #tpu.core_type<tc>, window_params = [{transform_indices = @transform_0, window_bounds = array<i64: 1, 16, 16, 4>}, {pipeline_mode = #tpu.pipeline_mode<synchronous>, transform_indices = @transform_1, window_bounds = array<i64: 36, 8>}, {pipeline_mode = #tpu.pipeline_mode<synchronous>, transform_indices = @transform_2, window_bounds = array<i64: 1, 4>}, {pipeline_mode = #tpu.pipeline_mode<synchronous>, transform_indices = @transform_3, window_bounds = array<i64: 1, 4>}, {transform_indices = @transform_4, window_bounds = array<i64: 1, 16, 16, 8>}, {transform_indices = @transform_5, window_bounds = array<i64: 1, 8, 8>}]} {
    %c0 = arith.constant 0 : index
    %c0_0 = arith.constant 0 : index
    %c0_1 = arith.constant 0 : index
    %c0_2 = arith.constant 0 : index
    %0 = vector.load %arg1[%c0, %c0_0, %c0_1, %c0_2] : memref<1x16x16x4xf32, #tpu.memory_space<vmem>>, vector<1x16x16x4xf32>
    %1 = vector.shape_cast %0 : vector<1x16x16x4xf32> to vector<16x16x4xf32>
    %cst = arith.constant 0.000000e+00 : f32
    %2 = vector.broadcast %cst : f32 to vector<16x16x36xf32>
    %c0_3 = arith.constant 0 : index
    %c0_4 = arith.constant 0 : index
    %c0_5 = arith.constant 0 : index
    %3 = vector.load %arg7[%c0_3, %c0_4, %c0_5] : memref<16x16x36xf32, #tpu.memory_space<vmem>>, vector<16x16x36xf32>
    tpu.vector_store %arg7[%c0_3, %c0_4, %c0_5], %2 {strides = array<i32>} : memref<16x16x36xf32, #tpu.memory_space<vmem>>, vector<16x16x36xf32>,
    %4 = vector.extract_strided_slice %1 {offsets = [0, 0, 0], sizes = [15, 15, 4], strides = [1, 1, 1]} : vector<16x16x4xf32> to vector<15x15x4xf32>
    %c1 = arith.constant 1 : index
    %c1_6 = arith.constant 1 : index
    %c0_7 = arith.constant 0 : index
    %5 = vector.load %arg7[%c1, %c1_6, %c0_7] : memref<16x16x36xf32, #tpu.memory_space<vmem>>, vector<15x15x4xf32>
    tpu.vector_store %arg7[%c1, %c1_6, %c0_7], %4 {strides = array<i32>} : memref<16x16x36xf32, #tpu.memory_space<vmem>>, vector<15x15x4xf32>,
    %6 = vector.extract_strided_slice %1 {offsets = [0, 0, 0], sizes = [15, 16, 4], strides = [1, 1, 1]} : vector<16x16x4xf32> to vector<15x16x4xf32>
    %c1_8 = arith.constant 1 : index
    %c0_9 = arith.constant 0 : index
    %c4 = arith.constant 4 : index
    %7 = vector.load %arg7[%c1_8, %c0_9, %c4] : memref<16x16x36xf32, #tpu.memory_space<vmem>>, vector<15x16x4xf32>
    tpu.vector_store %arg7[%c1_8, %c0_9, %c4], %6 {strides = array<i32>} : memref<16x16x36xf32, #tpu.memory_space<vmem>>, vector<15x16x4xf32>,
    %8 = vector.extract_strided_slice %1 {offsets = [0, 1, 0], sizes = [15, 15, 4], strides = [1, 1, 1]} : vector<16x16x4xf32> to vector<15x15x4xf32>
    %c1_10 = arith.constant 1 : index
    %c0_11 = arith.constant 0 : index
    %c8 = arith.constant 8 : index
    %9 = vector.load %arg7[%c1_10, %c0_11, %c8] : memref<16x16x36xf32, #tpu.memory_space<vmem>>, vector<15x15x4xf32>
    tpu.vector_store %arg7[%c1_10, %c0_11, %c8], %8 {strides = array<i32>} : memref<16x16x36xf32, #tpu.memory_space<vmem>>, vector<15x15x4xf32>,
    %10 = vector.extract_strided_slice %1 {offsets = [0, 0, 0], sizes = [16, 15, 4], strides = [1, 1, 1]} : vector<16x16x4xf32> to vector<16x15x4xf32>
    %c0_12 = arith.constant 0 : index
    %c1_13 = arith.constant 1 : index
    %c12 = arith.constant 12 : index
    %11 = vector.load %arg7[%c0_12, %c1_13, %c12] : memref<16x16x36xf32, #tpu.memory_space<vmem>>, vector<16x15x4xf32>
    tpu.vector_store %arg7[%c0_12, %c1_13, %c12], %10 {strides = array<i32>} : memref<16x16x36xf32, #tpu.memory_space<vmem>>, vector<16x15x4xf32>,
    %c0_14 = arith.constant 0 : index
    %c0_15 = arith.constant 0 : index
    %c16 = arith.constant 16 : index
    %12 = vector.load %arg7[%c0_14, %c0_15, %c16] : memref<16x16x36xf32, #tpu.memory_space<vmem>>, vector<16x16x4xf32>
    tpu.vector_store %arg7[%c0_14, %c0_15, %c16], %1 {strides = array<i32>} : memref<16x16x36xf32, #tpu.memory_space<vmem>>, vector<16x16x4xf32>,
    %13 = vector.extract_strided_slice %1 {offsets = [0, 1, 0], sizes = [16, 15, 4], strides = [1, 1, 1]} : vector<16x16x4xf32> to vector<16x15x4xf32>
    %c0_16 = arith.constant 0 : index
    %c0_17 = arith.constant 0 : index
    %c20 = arith.constant 20 : index
    %14 = vector.load %arg7[%c0_16, %c0_17, %c20] : memref<16x16x36xf32, #tpu.memory_space<vmem>>, vector<16x15x4xf32>
    tpu.vector_store %arg7[%c0_16, %c0_17, %c20], %13 {strides = array<i32>} : memref<16x16x36xf32, #tpu.memory_space<vmem>>, vector<16x15x4xf32>,
    %15 = vector.extract_strided_slice %1 {offsets = [1, 0, 0], sizes = [15, 15, 4], strides = [1, 1, 1]} : vector<16x16x4xf32> to vector<15x15x4xf32>
    %c0_18 = arith.constant 0 : index
    %c1_19 = arith.constant 1 : index
    %c24 = arith.constant 24 : index
    %16 = vector.load %arg7[%c0_18, %c1_19, %c24] : memref<16x16x36xf32, #tpu.memory_space<vmem>>, vector<15x15x4xf32>
    tpu.vector_store %arg7[%c0_18, %c1_19, %c24], %15 {strides = array<i32>} : memref<16x16x36xf32, #tpu.memory_space<vmem>>, vector<15x15x4xf32>,
    %17 = vector.extract_strided_slice %1 {offsets = [1, 0, 0], sizes = [15, 16, 4], strides = [1, 1, 1]} : vector<16x16x4xf32> to vector<15x16x4xf32>
    %c0_20 = arith.constant 0 : index
    %c0_21 = arith.constant 0 : index
    %c28 = arith.constant 28 : index
    %18 = vector.load %arg7[%c0_20, %c0_21, %c28] : memref<16x16x36xf32, #tpu.memory_space<vmem>>, vector<15x16x4xf32>
    tpu.vector_store %arg7[%c0_20, %c0_21, %c28], %17 {strides = array<i32>} : memref<16x16x36xf32, #tpu.memory_space<vmem>>, vector<15x16x4xf32>,
    %19 = vector.extract_strided_slice %1 {offsets = [1, 1, 0], sizes = [15, 15, 4], strides = [1, 1, 1]} : vector<16x16x4xf32> to vector<15x15x4xf32>
    %c0_22 = arith.constant 0 : index
    %c0_23 = arith.constant 0 : index
    %c32 = arith.constant 32 : index
    %20 = vector.load %arg7[%c0_22, %c0_23, %c32] : memref<16x16x36xf32, #tpu.memory_space<vmem>>, vector<15x15x4xf32>
    tpu.vector_store %arg7[%c0_22, %c0_23, %c32], %19 {strides = array<i32>} : memref<16x16x36xf32, #tpu.memory_space<vmem>>, vector<15x15x4xf32>,
    %c0_24 = arith.constant 0 : index
    %c0_25 = arith.constant 0 : index
    %c0_26 = arith.constant 0 : index
    %21 = vector.load %arg7[%c0_24, %c0_25, %c0_26] : memref<16x16x36xf32, #tpu.memory_space<vmem>>, vector<16x16x36xf32>
    %22 = vector.shape_cast %21 : vector<16x16x36xf32> to vector<256x36xf32>
    %c0_27 = arith.constant 0 : index
    %c0_28 = arith.constant 0 : index
    %23 = vector.load %arg2[%c0_27, %c0_28] : memref<36x8xf32, #tpu.memory_space<vmem>>, vector<36x8xf32>
    %cst_29 = arith.constant dense<0.000000e+00> : vector<256x8xf32>
    %24 = tpu.matmul %22, %23, %cst_29 {dimension_numbers = #tpu.dot_dimension_numbers<[1], [0], [0], [1], [0, 0, 1, 1], [], []>} : vector<256x36xf32>, vector<36x8xf32>, vector<256x8xf32> -> vector<256x8xf32>
    %cst_30 = arith.constant 0.000000e+00 : f32
    %25 = vector.broadcast %cst_30 : f32 to vector<1x8x8xf32>
    %c0_31 = arith.constant 0 : index
    %c0_32 = arith.constant 0 : index
    %c0_33 = arith.constant 0 : index
    %26 = vector.load %arg6[%c0_31, %c0_32, %c0_33] : memref<1x8x8xf32, #tpu.memory_space<vmem>>, vector<1x8x8xf32>
    tpu.vector_store %arg6[%c0_31, %c0_32, %c0_33], %25 {strides = array<i32>} : memref<1x8x8xf32, #tpu.memory_space<vmem>>, vector<1x8x8xf32>,
    %cst_34 = arith.constant dense<0.000000e+00> : vector<8xf32>
    %27 = vector.multi_reduction <add>, %24, %cst_34 [0] : vector<256x8xf32> to vector<8xf32>
    %28 = vector.shape_cast %27 : vector<8xf32> to vector<1x8xf32>
    %29 = vector.shape_cast %28 : vector<1x8xf32> to vector<1x1x8xf32>
    %c0_35 = arith.constant 0 : index
    %c0_36 = arith.constant 0 : index
    %c0_37 = arith.constant 0 : index
    %30 = vector.load %arg6[%c0_35, %c0_36, %c0_37] : memref<1x8x8xf32, #tpu.memory_space<vmem>>, vector<1x1x8xf32>
    tpu.vector_store %arg6[%c0_35, %c0_36, %c0_37], %29 {strides = array<i32>} : memref<1x8x8xf32, #tpu.memory_space<vmem>>, vector<1x1x8xf32>,
    %31 = arith.mulf %24, %24 : vector<256x8xf32>
    %cst_38 = arith.constant dense<0.000000e+00> : vector<8xf32>
    %32 = vector.multi_reduction <add>, %31, %cst_38 [0] : vector<256x8xf32> to vector<8xf32>
    %33 = vector.shape_cast %32 : vector<8xf32> to vector<1x8xf32>
    %34 = vector.shape_cast %33 : vector<1x8xf32> to vector<1x1x8xf32>
    %c0_39 = arith.constant 0 : index
    %c1_40 = arith.constant 1 : index
    %c0_41 = arith.constant 0 : index
    %35 = vector.load %arg6[%c0_39, %c1_40, %c0_41] : memref<1x8x8xf32, #tpu.memory_space<vmem>>, vector<1x1x8xf32>
    tpu.vector_store %arg6[%c0_39, %c1_40, %c0_41], %34 {strides = array<i32>} : memref<1x8x8xf32, #tpu.memory_space<vmem>>, vector<1x1x8xf32>,
    %36 = vector.shape_cast %24 : vector<256x8xf32> to vector<1x16x16x8xf32>
    %c0_42 = arith.constant 0 : index
    %c0_43 = arith.constant 0 : index
    %c0_44 = arith.constant 0 : index
    %c0_45 = arith.constant 0 : index
    %37 = vector.load %arg5[%c0_42, %c0_43, %c0_44, %c0_45] : memref<1x16x16x8xf32, #tpu.memory_space<vmem>>, vector<1x16x16x8xf32>
    tpu.vector_store %arg5[%c0_42, %c0_43, %c0_44, %c0_45], %36 {strides = array<i32>} : memref<1x16x16x8xf32, #tpu.memory_space<vmem>>, vector<1x16x16x8xf32>,
    return
  }
  func.func @transform_0(%arg0: i32) -> (i32, i32, i32, i32) {
    %c0_i32 = arith.constant 0 : i32
    %c0_i32_0 = arith.constant 0 : i32
    %c0_i32_1 = arith.constant 0 : i32
    %c0_i32_2 = arith.constant 0 : i32
    return %arg0, %c0_i32, %c0_i32_0, %c0_i32_1 : i32, i32, i32, i32
  }
  func.func @transform_1(%arg0: i32) -> (i32, i32) {
    %c0_i32 = arith.constant 0 : i32
    %c0_i32_0 = arith.constant 0 : i32
    %c0_i32_1 = arith.constant 0 : i32
    return %c0_i32, %c0_i32_0 : i32, i32
  }
  func.func @transform_2(%arg0: i32) -> (i32, i32) {
    %c0_i32 = arith.constant 0 : i32
    %c0_i32_0 = arith.constant 0 : i32
    %c0_i32_1 = arith.constant 0 : i32
    return %c0_i32, %c0_i32_0 : i32, i32
  }
  func.func @transform_3(%arg0: i32) -> (i32, i32) {
    %c0_i32 = arith.constant 0 : i32
    %c0_i32_0 = arith.constant 0 : i32
    %c0_i32_1 = arith.constant 0 : i32
    return %c0_i32, %c0_i32_0 : i32, i32
  }
  func.func @transform_4(%arg0: i32) -> (i32, i32, i32, i32) {
    %c0_i32 = arith.constant 0 : i32
    %c0_i32_0 = arith.constant 0 : i32
    %c0_i32_1 = arith.constant 0 : i32
    %c0_i32_2 = arith.constant 0 : i32
    return %arg0, %c0_i32, %c0_i32_0, %c0_i32_1 : i32, i32, i32, i32
  }
  func.func @transform_5(%arg0: i32) -> (i32, i32, i32) {
    %c0_i32 = arith.constant 0 : i32
    %c0_i32_0 = arith.constant 0 : i32
    %c0_i32_1 = arith.constant 0 : i32
    return %arg0, %c0_i32, %c0_i32_0 : i32, i32, i32
  }
}

module attributes {stable_mosaic.version = 11 : i64} {
  func.func @_conv3x3_stats_kernel(%arg0: i32, %arg1: memref<1x16x16x8xf32, #tpu.memory_space<vmem>>, %arg2: memref<72x8xf32, #tpu.memory_space<vmem>>, %arg3: memref<1x8xf32, #tpu.memory_space<vmem>>, %arg4: memref<1x8xf32, #tpu.memory_space<vmem>>, %arg5: memref<1x16x16x8xf32, #tpu.memory_space<vmem>>, %arg6: memref<1x8x8xf32, #tpu.memory_space<vmem>>, %arg7: memref<16x16x72xf32, #tpu.memory_space<vmem>>) attributes {dimension_semantics = [#tpu.dimension_semantics<parallel>], iteration_bounds = array<i64: 2>, scalar_prefetch = 0 : i64, scratch_operands = 1 : i64, tpu.core_type = #tpu.core_type<tc>, window_params = [{transform_indices = @transform_0, window_bounds = array<i64: 1, 16, 16, 8>}, {pipeline_mode = #tpu.pipeline_mode<synchronous>, transform_indices = @transform_1, window_bounds = array<i64: 72, 8>}, {pipeline_mode = #tpu.pipeline_mode<synchronous>, transform_indices = @transform_2, window_bounds = array<i64: 1, 8>}, {pipeline_mode = #tpu.pipeline_mode<synchronous>, transform_indices = @transform_3, window_bounds = array<i64: 1, 8>}, {transform_indices = @transform_4, window_bounds = array<i64: 1, 16, 16, 8>}, {transform_indices = @transform_5, window_bounds = array<i64: 1, 8, 8>}]} {
    %c0 = arith.constant 0 : index
    %c0_0 = arith.constant 0 : index
    %c0_1 = arith.constant 0 : index
    %c0_2 = arith.constant 0 : index
    %0 = vector.load %arg1[%c0, %c0_0, %c0_1, %c0_2] : memref<1x16x16x8xf32, #tpu.memory_space<vmem>>, vector<1x16x16x8xf32>
    %c0_3 = arith.constant 0 : index
    %c0_4 = arith.constant 0 : index
    %1 = vector.load %arg3[%c0_3, %c0_4] : memref<1x8xf32, #tpu.memory_space<vmem>>, vector<1x8xf32>
    %2 = vector.shape_cast %1 : vector<1x8xf32> to vector<1x1x1x8xf32>
    %3 = vector.broadcast %2 : vector<1x1x1x8xf32> to vector<1x16x16x8xf32>
    %4 = arith.mulf %0, %3 : vector<1x16x16x8xf32>
    %c0_5 = arith.constant 0 : index
    %c0_6 = arith.constant 0 : index
    %5 = vector.load %arg4[%c0_5, %c0_6] : memref<1x8xf32, #tpu.memory_space<vmem>>, vector<1x8xf32>
    %6 = vector.shape_cast %5 : vector<1x8xf32> to vector<1x1x1x8xf32>
    %7 = vector.broadcast %6 : vector<1x1x1x8xf32> to vector<1x16x16x8xf32>
    %8 = arith.addf %4, %7 : vector<1x16x16x8xf32>
    %cst = arith.constant 0.000000e+00 : f32
    %9 = vector.broadcast %cst : f32 to vector<1x16x16x8xf32>
    %10 = arith.maximumf %8, %9 : vector<1x16x16x8xf32>
    %11 = vector.shape_cast %10 : vector<1x16x16x8xf32> to vector<16x16x8xf32>
    %cst_7 = arith.constant 0.000000e+00 : f32
    %12 = vector.broadcast %cst_7 : f32 to vector<16x16x72xf32>
    %c0_8 = arith.constant 0 : index
    %c0_9 = arith.constant 0 : index
    %c0_10 = arith.constant 0 : index
    %13 = vector.load %arg7[%c0_8, %c0_9, %c0_10] : memref<16x16x72xf32, #tpu.memory_space<vmem>>, vector<16x16x72xf32>
    tpu.vector_store %arg7[%c0_8, %c0_9, %c0_10], %12 {strides = array<i32>} : memref<16x16x72xf32, #tpu.memory_space<vmem>>, vector<16x16x72xf32>,
    %14 = vector.extract_strided_slice %11 {offsets = [0, 0, 0], sizes = [15, 15, 8], strides = [1, 1, 1]} : vector<16x16x8xf32> to vector<15x15x8xf32>
    %c1 = arith.constant 1 : index
    %c1_11 = arith.constant 1 : index
    %c0_12 = arith.constant 0 : index
    %15 = vector.load %arg7[%c1, %c1_11, %c0_12] : memref<16x16x72xf32, #tpu.memory_space<vmem>>, vector<15x15x8xf32>
    tpu.vector_store %arg7[%c1, %c1_11, %c0_12], %14 {strides = array<i32>} : memref<16x16x72xf32, #tpu.memory_space<vmem>>, vector<15x15x8xf32>,
    %16 = vector.extract_strided_slice %11 {offsets = [0, 0, 0], sizes = [15, 16, 8], strides = [1, 1, 1]} : vector<16x16x8xf32> to vector<15x16x8xf32>
    %c1_13 = arith.constant 1 : index
    %c0_14 = arith.constant 0 : index
    %c8 = arith.constant 8 : index
    %17 = vector.load %arg7[%c1_13, %c0_14, %c8] : memref<16x16x72xf32, #tpu.memory_space<vmem>>, vector<15x16x8xf32>
    tpu.vector_store %arg7[%c1_13, %c0_14, %c8], %16 {strides = array<i32>} : memref<16x16x72xf32, #tpu.memory_space<vmem>>, vector<15x16x8xf32>,
    %18 = vector.extract_strided_slice %11 {offsets = [0, 1, 0], sizes = [15, 15, 8], strides = [1, 1, 1]} : vector<16x16x8xf32> to vector<15x15x8xf32>
    %c1_15 = arith.constant 1 : index
    %c0_16 = arith.constant 0 : index
    %c16 = arith.constant 16 : index
    %19 = vector.load %arg7[%c1_15, %c0_16, %c16] : memref<16x16x72xf32, #tpu.memory_space<vmem>>, vector<15x15x8xf32>
    tpu.vector_store %arg7[%c1_15, %c0_16, %c16], %18 {strides = array<i32>} : memref<16x16x72xf32, #tpu.memory_space<vmem>>, vector<15x15x8xf32>,
    %20 = vector.extract_strided_slice %11 {offsets = [0, 0, 0], sizes = [16, 15, 8], strides = [1, 1, 1]} : vector<16x16x8xf32> to vector<16x15x8xf32>
    %c0_17 = arith.constant 0 : index
    %c1_18 = arith.constant 1 : index
    %c24 = arith.constant 24 : index
    %21 = vector.load %arg7[%c0_17, %c1_18, %c24] : memref<16x16x72xf32, #tpu.memory_space<vmem>>, vector<16x15x8xf32>
    tpu.vector_store %arg7[%c0_17, %c1_18, %c24], %20 {strides = array<i32>} : memref<16x16x72xf32, #tpu.memory_space<vmem>>, vector<16x15x8xf32>,
    %c0_19 = arith.constant 0 : index
    %c0_20 = arith.constant 0 : index
    %c32 = arith.constant 32 : index
    %22 = vector.load %arg7[%c0_19, %c0_20, %c32] : memref<16x16x72xf32, #tpu.memory_space<vmem>>, vector<16x16x8xf32>
    tpu.vector_store %arg7[%c0_19, %c0_20, %c32], %11 {strides = array<i32>} : memref<16x16x72xf32, #tpu.memory_space<vmem>>, vector<16x16x8xf32>,
    %23 = vector.extract_strided_slice %11 {offsets = [0, 1, 0], sizes = [16, 15, 8], strides = [1, 1, 1]} : vector<16x16x8xf32> to vector<16x15x8xf32>
    %c0_21 = arith.constant 0 : index
    %c0_22 = arith.constant 0 : index
    %c40 = arith.constant 40 : index
    %24 = vector.load %arg7[%c0_21, %c0_22, %c40] : memref<16x16x72xf32, #tpu.memory_space<vmem>>, vector<16x15x8xf32>
    tpu.vector_store %arg7[%c0_21, %c0_22, %c40], %23 {strides = array<i32>} : memref<16x16x72xf32, #tpu.memory_space<vmem>>, vector<16x15x8xf32>,
    %25 = vector.extract_strided_slice %11 {offsets = [1, 0, 0], sizes = [15, 15, 8], strides = [1, 1, 1]} : vector<16x16x8xf32> to vector<15x15x8xf32>
    %c0_23 = arith.constant 0 : index
    %c1_24 = arith.constant 1 : index
    %c48 = arith.constant 48 : index
    %26 = vector.load %arg7[%c0_23, %c1_24, %c48] : memref<16x16x72xf32, #tpu.memory_space<vmem>>, vector<15x15x8xf32>
    tpu.vector_store %arg7[%c0_23, %c1_24, %c48], %25 {strides = array<i32>} : memref<16x16x72xf32, #tpu.memory_space<vmem>>, vector<15x15x8xf32>,
    %27 = vector.extract_strided_slice %11 {offsets = [1, 0, 0], sizes = [15, 16, 8], strides = [1, 1, 1]} : vector<16x16x8xf32> to vector<15x16x8xf32>
    %c0_25 = arith.constant 0 : index
    %c0_26 = arith.constant 0 : index
    %c56 = arith.constant 56 : index
    %28 = vector.load %arg7[%c0_25, %c0_26, %c56] : memref<16x16x72xf32, #tpu.memory_space<vmem>>, vector<15x16x8xf32>
    tpu.vector_store %arg7[%c0_25, %c0_26, %c56], %27 {strides = array<i32>} : memref<16x16x72xf32, #tpu.memory_space<vmem>>, vector<15x16x8xf32>,
    %29 = vector.extract_strided_slice %11 {offsets = [1, 1, 0], sizes = [15, 15, 8], strides = [1, 1, 1]} : vector<16x16x8xf32> to vector<15x15x8xf32>
    %c0_27 = arith.constant 0 : index
    %c0_28 = arith.constant 0 : index
    %c64 = arith.constant 64 : index
    %30 = vector.load %arg7[%c0_27, %c0_28, %c64] : memref<16x16x72xf32, #tpu.memory_space<vmem>>, vector<15x15x8xf32>
    tpu.vector_store %arg7[%c0_27, %c0_28, %c64], %29 {strides = array<i32>} : memref<16x16x72xf32, #tpu.memory_space<vmem>>, vector<15x15x8xf32>,
    %c0_29 = arith.constant 0 : index
    %c0_30 = arith.constant 0 : index
    %c0_31 = arith.constant 0 : index
    %31 = vector.load %arg7[%c0_29, %c0_30, %c0_31] : memref<16x16x72xf32, #tpu.memory_space<vmem>>, vector<16x16x72xf32>
    %32 = vector.shape_cast %31 : vector<16x16x72xf32> to vector<256x72xf32>
    %c0_32 = arith.constant 0 : index
    %c0_33 = arith.constant 0 : index
    %33 = vector.load %arg2[%c0_32, %c0_33] : memref<72x8xf32, #tpu.memory_space<vmem>>, vector<72x8xf32>
    %cst_34 = arith.constant dense<0.000000e+00> : vector<256x8xf32>
    %34 = tpu.matmul %32, %33, %cst_34 {dimension_numbers = #tpu.dot_dimension_numbers<[1], [0], [0], [1], [0, 0, 1, 1], [], []>} : vector<256x72xf32>, vector<72x8xf32>, vector<256x8xf32> -> vector<256x8xf32>
    %cst_35 = arith.constant 0.000000e+00 : f32
    %35 = vector.broadcast %cst_35 : f32 to vector<1x8x8xf32>
    %c0_36 = arith.constant 0 : index
    %c0_37 = arith.constant 0 : index
    %c0_38 = arith.constant 0 : index
    %36 = vector.load %arg6[%c0_36, %c0_37, %c0_38] : memref<1x8x8xf32, #tpu.memory_space<vmem>>, vector<1x8x8xf32>
    tpu.vector_store %arg6[%c0_36, %c0_37, %c0_38], %35 {strides = array<i32>} : memref<1x8x8xf32, #tpu.memory_space<vmem>>, vector<1x8x8xf32>,
    %cst_39 = arith.constant dense<0.000000e+00> : vector<8xf32>
    %37 = vector.multi_reduction <add>, %34, %cst_39 [0] : vector<256x8xf32> to vector<8xf32>
    %38 = vector.shape_cast %37 : vector<8xf32> to vector<1x8xf32>
    %39 = vector.shape_cast %38 : vector<1x8xf32> to vector<1x1x8xf32>
    %c0_40 = arith.constant 0 : index
    %c0_41 = arith.constant 0 : index
    %c0_42 = arith.constant 0 : index
    %40 = vector.load %arg6[%c0_40, %c0_41, %c0_42] : memref<1x8x8xf32, #tpu.memory_space<vmem>>, vector<1x1x8xf32>
    tpu.vector_store %arg6[%c0_40, %c0_41, %c0_42], %39 {strides = array<i32>} : memref<1x8x8xf32, #tpu.memory_space<vmem>>, vector<1x1x8xf32>,
    %41 = arith.mulf %34, %34 : vector<256x8xf32>
    %cst_43 = arith.constant dense<0.000000e+00> : vector<8xf32>
    %42 = vector.multi_reduction <add>, %41, %cst_43 [0] : vector<256x8xf32> to vector<8xf32>
    %43 = vector.shape_cast %42 : vector<8xf32> to vector<1x8xf32>
    %44 = vector.shape_cast %43 : vector<1x8xf32> to vector<1x1x8xf32>
    %c0_44 = arith.constant 0 : index
    %c1_45 = arith.constant 1 : index
    %c0_46 = arith.constant 0 : index
    %45 = vector.load %arg6[%c0_44, %c1_45, %c0_46] : memref<1x8x8xf32, #tpu.memory_space<vmem>>, vector<1x1x8xf32>
    tpu.vector_store %arg6[%c0_44, %c1_45, %c0_46], %44 {strides = array<i32>} : memref<1x8x8xf32, #tpu.memory_space<vmem>>, vector<1x1x8xf32>,
    %46 = vector.shape_cast %34 : vector<256x8xf32> to vector<1x16x16x8xf32>
    %c0_47 = arith.constant 0 : index
    %c0_48 = arith.constant 0 : index
    %c0_49 = arith.constant 0 : index
    %c0_50 = arith.constant 0 : index
    %47 = vector.load %arg5[%c0_47, %c0_48, %c0_49, %c0_50] : memref<1x16x16x8xf32, #tpu.memory_space<vmem>>, vector<1x16x16x8xf32>
    tpu.vector_store %arg5[%c0_47, %c0_48, %c0_49, %c0_50], %46 {strides = array<i32>} : memref<1x16x16x8xf32, #tpu.memory_space<vmem>>, vector<1x16x16x8xf32>,
    return
  }
  func.func @transform_0(%arg0: i32) -> (i32, i32, i32, i32) {
    %c0_i32 = arith.constant 0 : i32
    %c0_i32_0 = arith.constant 0 : i32
    %c0_i32_1 = arith.constant 0 : i32
    %c0_i32_2 = arith.constant 0 : i32
    return %arg0, %c0_i32, %c0_i32_0, %c0_i32_1 : i32, i32, i32, i32
  }
  func.func @transform_1(%arg0: i32) -> (i32, i32) {
    %c0_i32 = arith.constant 0 : i32
    %c0_i32_0 = arith.constant 0 : i32
    %c0_i32_1 = arith.constant 0 : i32
    return %c0_i32, %c0_i32_0 : i32, i32
  }
  func.func @transform_2(%arg0: i32) -> (i32, i32) {
    %c0_i32 = arith.constant 0 : i32
    %c0_i32_0 = arith.constant 0 : i32
    %c0_i32_1 = arith.constant 0 : i32
    return %c0_i32, %c0_i32_0 : i32, i32
  }
  func.func @transform_3(%arg0: i32) -> (i32, i32) {
    %c0_i32 = arith.constant 0 : i32
    %c0_i32_0 = arith.constant 0 : i32
    %c0_i32_1 = arith.constant 0 : i32
    return %c0_i32, %c0_i32_0 : i32, i32
  }
  func.func @transform_4(%arg0: i32) -> (i32, i32, i32, i32) {
    %c0_i32 = arith.constant 0 : i32
    %c0_i32_0 = arith.constant 0 : i32
    %c0_i32_1 = arith.constant 0 : i32
    %c0_i32_2 = arith.constant 0 : i32
    return %arg0, %c0_i32, %c0_i32_0, %c0_i32_1 : i32, i32, i32, i32
  }
  func.func @transform_5(%arg0: i32) -> (i32, i32, i32) {
    %c0_i32 = arith.constant 0 : i32
    %c0_i32_0 = arith.constant 0 : i32
    %c0_i32_1 = arith.constant 0 : i32
    return %arg0, %c0_i32, %c0_i32_0 : i32, i32, i32
  }
}

module attributes {stable_mosaic.version = 11 : i64} {
  func.func @_scale_shift_relu_kernel(%arg0: i32, %arg1: memref<32x128xf32, #tpu.memory_space<vmem>>, %arg2: memref<1x128xf32, #tpu.memory_space<vmem>>, %arg3: memref<1x128xf32, #tpu.memory_space<vmem>>, %arg4: memref<32x128xf32, #tpu.memory_space<vmem>>) attributes {dimension_semantics = [#tpu.dimension_semantics<parallel>], iteration_bounds = array<i64: 1>, scalar_prefetch = 0 : i64, scratch_operands = 0 : i64, tpu.core_type = #tpu.core_type<tc>, window_params = [{transform_indices = @transform_0, window_bounds = array<i64: 32, 128>}, {pipeline_mode = #tpu.pipeline_mode<synchronous>, transform_indices = @transform_1, window_bounds = array<i64: 1, 128>}, {pipeline_mode = #tpu.pipeline_mode<synchronous>, transform_indices = @transform_2, window_bounds = array<i64: 1, 128>}, {transform_indices = @transform_3, window_bounds = array<i64: 32, 128>}]} {
    %c0 = arith.constant 0 : index
    %c0_0 = arith.constant 0 : index
    %0 = vector.load %arg1[%c0, %c0_0] : memref<32x128xf32, #tpu.memory_space<vmem>>, vector<32x128xf32>
    %c0_1 = arith.constant 0 : index
    %c0_2 = arith.constant 0 : index
    %1 = vector.load %arg2[%c0_1, %c0_2] : memref<1x128xf32, #tpu.memory_space<vmem>>, vector<1x128xf32>
    %2 = vector.broadcast %1 : vector<1x128xf32> to vector<32x128xf32>
    %3 = arith.mulf %0, %2 : vector<32x128xf32>
    %c0_3 = arith.constant 0 : index
    %c0_4 = arith.constant 0 : index
    %4 = vector.load %arg3[%c0_3, %c0_4] : memref<1x128xf32, #tpu.memory_space<vmem>>, vector<1x128xf32>
    %5 = vector.broadcast %4 : vector<1x128xf32> to vector<32x128xf32>
    %6 = arith.addf %3, %5 : vector<32x128xf32>
    %cst = arith.constant 0.000000e+00 : f32
    %7 = vector.broadcast %cst : f32 to vector<32x128xf32>
    %8 = arith.maximumf %6, %7 : vector<32x128xf32>
    %c0_5 = arith.constant 0 : index
    %c0_6 = arith.constant 0 : index
    %9 = vector.load %arg4[%c0_5, %c0_6] : memref<32x128xf32, #tpu.memory_space<vmem>>, vector<32x128xf32>
    tpu.vector_store %arg4[%c0_5, %c0_6], %8 {strides = array<i32>} : memref<32x128xf32, #tpu.memory_space<vmem>>, vector<32x128xf32>,
    return
  }
  func.func @transform_0(%arg0: i32) -> (i32, i32) {
    %c0_i32 = arith.constant 0 : i32
    %c0_i32_0 = arith.constant 0 : i32
    return %arg0, %c0_i32 : i32, i32
  }
  func.func @transform_1(%arg0: i32) -> (i32, i32) {
    %c0_i32 = arith.constant 0 : i32
    %c0_i32_0 = arith.constant 0 : i32
    %c0_i32_1 = arith.constant 0 : i32
    return %c0_i32, %c0_i32_0 : i32, i32
  }
  func.func @transform_2(%arg0: i32) -> (i32, i32) {
    %c0_i32 = arith.constant 0 : i32
    %c0_i32_0 = arith.constant 0 : i32
    %c0_i32_1 = arith.constant 0 : i32
    return %c0_i32, %c0_i32_0 : i32, i32
  }
  func.func @transform_3(%arg0: i32) -> (i32, i32) {
    %c0_i32 = arith.constant 0 : i32
    %c0_i32_0 = arith.constant 0 : i32
    return %arg0, %c0_i32 : i32, i32
  }
}

</mosaic_0001>

<bundles_post_ra>
// kernel: tile.18
= control target key start
LH: loop header
LB: loop body
LE: loop exit
PB: predicated region body
PF: predicated region fallthrough
CT: control target
= control target key end

     0   :  { %s28_s0 = inlined_call_operand.vmem [shape: f32[8], index: 0, kind: input, shape index: {}]   ;;  %s29_s1 = inlined_call_operand.vmem [shape: f32[16,8], index: 1, kind: output, shape index: {}]  }
   0x1   :  { %v4_v0 = vld [vmem:[%s28_s0] ss:$0 sm:$0xff] }
   0x2   :  { %5 = vst [vmem:[%s29_s1] sm:$0xff] %v4_v0  ;;  %8 = vst [vmem:[%s29_s1 + $0x8] sm:$0xff] %v4_v0 }

// kernel: tile.19
= control target key start
LH: loop header
LB: loop body
LE: loop exit
PB: predicated region body
PF: predicated region fallthrough
CT: control target
= control target key end

     0   :  { %s131_s10 = smov 120   ;;  %s132_s11 = smov 104   ;;  %vm3_vm0 = vcmask 64512   ;;  %vm9_vm1 = vcmask 1048512   ;;  %vm15_vm2 = vcmask 982912   ;;  %vm21_vm3 = vcmask 917312   ;;  %s207_s0 = inlined_call_operand.vmem [shape: f32[16,8], index: 0, kind: input, shape index: {}]   ;;  %s208_s1 = inlined_call_operand.vmem [shape: f32[1,128], index: 1, kind: output, shape index: {}]  }
   0x1   :  { %v101_v0 = vld [vmem:[%s207_s0 + $0xf] sm:$0x1]   ;;  %v103_v1 = vld [vmem:[%s207_s0 + $0xd] sm:$0x1]   ;;  %v102_v2 = vld [vmem:[%s207_s0 + $0xe] sm:$0x1]  }
   0x2   :  { %7 = vrot.lane.b32.xlu0 %v101_v0, %s131_s10  ;;  %19 = vrot.lane.b32.xlu1 %v103_v1, %s132_s11  ;;  %v104_v3 = vld [vmem:[%s207_s0 + $0xc] sm:$0x1]   ;;  %s133_s16 = smov 112   ;;  %s134_s17 = smov 96   ;;  %v105_v4 = vld [vmem:[%s207_s0 + $0xb] sm:$0x1]  }
   0x3   :  { %v106_v5 = vld [vmem:[%s207_s0 + $0xa] sm:$0x1]   ;;  %v2_v6 = vld [vmem:[%s207_s0] sm:$0x1]   ;;  %s135_s24 = smov 88   ;;  %s136_s25 = smov 80  }
   0x4   :  { %4 = vst.msk [vmem:[#allocation0] sm:$0x1] %vm3_vm0, %v2_v6   ;;  %v107_v7 = vld [vmem:[%s207_s0 + $0x9] sm:$0x1]   ;;  %v108_v8 = vld [vmem:[%s207_s0 + $0x8] sm:$0x1]  }
   0x5   :  { %s137_s30 = smov 72   ;;  %s138_s2 = smov 64   ;;  %v109_v9 = vld [vmem:[%s207_s0 + $0x7] sm:$0x1]   ;;  %v110_v10 = vld [vmem:[%s207_s0 + $0x6] sm:$0x1]  }
   0x6   :  { %13 = vrot.lane.b32.xlu0 %v102_v2, %s133_s16  ;;  %25 = vrot.lane.b32.xlu1 %v104_v3, %s134_s17  ;;  %s139_s7 = smov 56   ;;  %s140_s8 = smov 48   ;;  %v111_v11 = vld [vmem:[%s207_s0 + $0x5] sm:$0x1]   ;;  %v112_v12 = vld [vmem:[%s207_s0 + $0x4] sm:$0x1]  }
   0x7   :  { %s141_s13 = smov 40   ;;  %s142_s14 = smov 32   ;;  %v113_v13 = vld [vmem:[%s207_s0 + $0x3] sm:$0x1]   ;;  %v114_v14 = vld [vmem:[%s207_s0 + $0x2] sm:$0x1]  }
   0x8   :  { %s143_s19 = smov 24   ;;  %s144_s20 = smov 16   ;;  %v115_v15 = vld [vmem:[%s207_s0 + $0x1] sm:$0x1]   ;;  %vm27_vm4 = vcmask 851712   ;;  %vm33_vm5 = vcmask 786112  }
   0x9   :  { %s145_s0 = smov 8   ;;  %vm39_vm6 = vcmask 720512   ;;  %vm45_vm7 = vcmask 654912   ;;  %vm51_vm8 = vcmask 589312   ;;  %vm57_vm9 = vcmask 523712  }
   0xa   :  { %31 = vrot.lane.b32.xlu0 %v105_v4, %s135_s24  ;;  %37 = vrot.lane.b32.xlu1 %v106_v5, %s136_s25  ;;  %vm63_vm10 = vcmask 458112   ;;  %vm69_vm11 = vcmask 392512   ;;  %vm75_vm12 = vcmask 326912   ;;  %vm81_vm13 = vcmask 261312  }
   0xb   :  { %vm87_vm14 = vcmask 195712   ;;  %vm93_vm15 = vcmask 130112  }
   0xe   :  { %43 = vrot.lane.b32.xlu0 %v107_v7, %s137_s30  ;;  %49 = vrot.lane.b32.xlu1 %v108_v8, %s138_s2 }
  0x12   :  { %55 = vrot.lane.b32.xlu0 %v109_v9, %s139_s7  ;;  %61 = vrot.lane.b32.xlu1 %v110_v10, %s140_s8 }
  0x16   :  { %67 = vrot.lane.b32.xlu0 %v111_v11, %s141_s13  ;;  %73 = vrot.lane.b32.xlu1 %v112_v12, %s142_s14 }
  0x1a   :  { %79 = vrot.lane.b32.xlu0 %v113_v13, %s143_s19  ;;  %85 = vrot.lane.b32.xlu1 %v114_v14, %s144_s20 }
  0x1e   :  { %91 = vrot.lane.b32.xlu0 %v115_v15, %s145_s0 }
  0x74   :  { %v8_v16 = vpop.permute.xlu0 %7   ;;  %v20_v17 = vpop.permute.xlu1 %19  }
  0x75   :  { %10 = vst.msk [vmem:[#allocation0] sm:$0x1] %vm9_vm1, %v8_v16  }
  0x78   :  { %v14_v18 = vpop.permute.xlu0 %13   ;;  %v26_v19 = vpop.permute.xlu1 %25  }
  0x79   :  { %16 = vst.msk [vmem:[#allocation0] sm:$0x1] %vm15_vm2, %v14_v18  }
  0x7a   :  { %22 = vst.msk [vmem:[#allocation0] sm:$0x1] %vm21_vm3, %v20_v17  }
  0x7b   :  { %28 = vst.msk [vmem:[#allocation0] sm:$0x1] %vm27_vm4, %v26_v19  }
  0x7c   :  { %v32_v20 = vpop.permute.xlu0 %31   ;;  %v38_v21 = vpop.permute.xlu1 %37  }
  0x7d   :  { %34 = vst.msk [vmem:[#allocation0] sm:$0x1] %vm33_vm5, %v32_v20  }
  0x7e   :  { %40 = vst.msk [vmem:[#allocation0] sm:$0x1] %vm39_vm6, %v38_v21  }
  0x80   :  { %v44_v22 = vpop.permute.xlu0 %43   ;;  %v50_v23 = vpop.permute.xlu1 %49  }
  0x81   :  { %46 = vst.msk [vmem:[#allocation0] sm:$0x1] %vm45_vm7, %v44_v22  }
  0x82   :  { %52 = vst.msk [vmem:[#allocation0] sm:$0x1] %vm51_vm8, %v50_v23  }
  0x84   :  { %v56_v24 = vpop.permute.xlu0 %55   ;;  %v62_v25 = vpop.permute.xlu1 %61  }
  0x85   :  { %58 = vst.msk [vmem:[#allocation0] sm:$0x1] %vm57_vm9, %v56_v24  }
  0x86   :  { %64 = vst.msk [vmem:[#allocation0] sm:$0x1] %vm63_vm10, %v62_v25  }
  0x88   :  { %v68_v26 = vpop.permute.xlu0 %67   ;;  %v74_v27 = vpop.permute.xlu1 %73  }
  0x89   :  { %70 = vst.msk [vmem:[#allocation0] sm:$0x1] %vm69_vm11, %v68_v26  }
  0x8a   :  { %76 = vst.msk [vmem:[#allocation0] sm:$0x1] %vm75_vm12, %v74_v27  }
  0x8c   :  { %v80_v28 = vpop.permute.xlu0 %79   ;;  %v86_v29 = vpop.permute.xlu1 %85  }
  0x8d   :  { %82 = vst.msk [vmem:[#allocation0] sm:$0x1] %vm81_vm13, %v80_v28  }
  0x8e   :  { %88 = vst.msk [vmem:[#allocation0] sm:$0x1] %vm87_vm14, %v86_v29  }
  0x90   :  { %v92_v30 = vpop.permute.xlu0 %91  }
  0x91   :  { %94 = vst.msk [vmem:[#allocation0] sm:$0x1] %vm93_vm15, %v92_v30  }
  0x98   :  { %v98_v31 = vld [vmem:[#allocation0] sm:$0x1] }
  0x99   :  { %100 = vst [vmem:[%s208_s1] sm:$0x1] %v98_v31 }

// kernel: double_conv2d_bn_forward.5
= control target key start
LH: loop header
LB: loop body
LE: loop exit
PB: predicated region body
PF: predicated region fallthrough
CT: control target
= control target key end

     0   :  { %s104_s0 = inlined_call_operand.vmem [shape: f32[32,128], index: 0, kind: input, shape index: {}]   ;;  %s105_s1 = inlined_call_operand.vmem [shape: f32[1,128], index: 1, kind: input, shape index: {}]   ;;  %s106_s2 = inlined_call_operand.vmem [shape: f32[1,128], index: 2, kind: input, shape index: {}]   ;;  %s107_s3 = inlined_call_operand.vmem [shape: f32[32,128], index: 3, kind: output, shape index: {}]  }
   0x1   :  { %v14_v0 = vld [vmem:[%s104_s0] sm:$0xff]  ;;  %v15_v4 = vld [vmem:[%s104_s0 + $0x8] sm:$0xff]  ;;  %v16_v5 = vld [vmem:[%s104_s0 + $0x10] sm:$0xff] }
   0x2   :  { %v52_v1 = vld [vmem:[%s105_s1] ss:$0 sm:$0xff]  ;;  %v17_v6 = vld [vmem:[%s104_s0 + $0x18] sm:$0xff] }
   0x3   :  { %v53_v2 = vld [vmem:[%s106_s2] ss:$0 sm:$0xff]  ;;  %v25_v3 = vmul.f32 %v52_v1, %v14_v0  ;;  %v26_v7 = vmul.f32 %v52_v1, %v15_v4  ;;  %v27_v8 = vmul.f32 %v52_v1, %v16_v5  ;;  %v28_v9 = vmul.f32 %v52_v1, %v17_v6 }
   0x5   :  { %v36_v10 = vadd.f32 %v53_v2, %v25_v3  ;;  %v37_v11 = vadd.f32 %v53_v2, %v26_v7  ;;  %v38_v12 = vadd.f32 %v53_v2, %v27_v8  ;;  %v39_v13 = vadd.f32 %v53_v2, %v28_v9 }
   0x7   :  { %v40_v14 = vmax.f32 %v36_v10, 0.0  ;;  %v41_v15 = vmax.f32 %v37_v11, 0.0  ;;  %v42_v16 = vmax.f32 %v38_v12, 0.0  ;;  %v43_v17 = vmax.f32 %v39_v13, 0.0 }
   0x9   :  { %44 = vst [vmem:[%s107_s3] sm:$0xff] %v40_v14  ;;  %45 = vst [vmem:[%s107_s3 + $0x8] sm:$0xff] %v41_v15 }
   0xa   :  { %46 = vst [vmem:[%s107_s3 + $0x10] sm:$0xff] %v42_v16  ;;  %47 = vst [vmem:[%s107_s3 + $0x18] sm:$0xff] %v43_v17 }

// kernel: double_conv2d_bn_forward.3
= control target key start
LH: loop header
LB: loop body
LE: loop exit
PB: predicated region body
PF: predicated region fallthrough
CT: control target
= control target key end

     0   :  { %s2238_s18 = smov 0   ;;  %s3404_s0 = inlined_call_operand.vmem [shape: f32[2,16,16,4], index: 0, kind: input, shape index: {}]   ;;  %s3405_s1 = inlined_call_operand.vmem [shape: f32[36,8], index: 1, kind: input, shape index: {}]   ;;  %s3406_s2 = inlined_call_operand.vmem [shape: f32[1,4], index: 2, kind: input, shape index: {}]   ;;  %s3407_s3 = inlined_call_operand.vmem [shape: f32[1,4], index: 3, kind: input, shape index: {}]   ;;  %s3408_s4 = inlined_call_operand.vmem [shape: f32[2,16,16,8], index: 4, kind: output, shape index: {0}]   ;;  %s3409_s5 = inlined_call_operand.vmem [shape: f32[2,8,8], index: 5, kind: output, shape index: {1}]  }
   0x1 LB: > { %s2018_s2 = sadd.s32 4294967295, %s2197_s18   ;;  %p2022_p0 = scmp.ge.s32.totalorder %s2197_s18, 1  ;;  %s2197_s18 = sphi %s2238_s18, %s16_s18  }
   0x2   : > { %p190_p1 = scmp.lt.s32.totalorder %s2197_s18, 3 }
   0x4   : > { %p191_p2 = pnand %p2022_p0, %p190_p1 }
   0x5   : > { %p2248_p3 = scmp.lt.s32.totalorder (!%p191_p2), %s2018_s2, 1  ;;  %vm268_vm0 = vcmask (!%p191_p2), 293888   ;;  %v2199_v0 = vmov (!%p191_p2), 0.0   ;;  %vm302_vm1 = vcmask (!%p191_p2), 31744   ;;  %vm304_vm2 = vcmask (!%p191_p2), 30720   ;;  %s2200_s23 = smov (!%p191_p2), 4  }
   0x6   : > { %194 = sbr.rel (%p191_p2) target bundleno = 863 (0x35f), region = 36  ;;  %273 = vst.msk [vmem:[#allocation2 + $0x20] sm:$0xff] (!%p191_p2), %vm268_vm0, %v2199_v0  ;;  %274 = vst.msk [vmem:[#allocation2 + $0x28] sm:$0xff] (!%p191_p2), %vm268_vm0, %v2199_v0  ;;  %s2201_s24 = smov (!%p191_p2), 8   ;;  %vm454_vm3 = vcmask (!%p191_p2), 64544   ;;  %v1395_v43 = vld [vmem:[%s3405_s1] sm:$0xff] (!%p191_p2) }
   0x7   : > { %269 = vst.msk [vmem:[#allocation2] sm:$0xff] (!%p191_p2), %vm268_vm0, %v2199_v0  ;;  %270 = vst.msk [vmem:[#allocation2 + $0x8] sm:$0xff] (!%p191_p2), %vm268_vm0, %v2199_v0  ;;  %s2202_s25 = smov (!%p191_p2), 12   ;;  %s2203_s26 = smov (!%p191_p2), 16   ;;  %v1396_v44 = vld [vmem:[%s3405_s1 + $0x8] sm:$0xff] (!%p191_p2)  ;;  %v1397_v48 = vld [vmem:[%s3405_s1 + $0x10] sm:$0xff] (!%p191_p2) }
   0x8   : > { %271 = vst.msk [vmem:[#allocation2 + $0x10] sm:$0xff] (!%p191_p2), %vm268_vm0, %v2199_v0  ;;  %272 = vst.msk [vmem:[#allocation2 + $0x18] sm:$0xff] (!%p191_p2), %vm268_vm0, %v2199_v0  ;;  %s2204_s27 = smov (!%p191_p2), 20   ;;  %s2205_s7 = smov (!%p191_p2), 24   ;;  %v2160_v45 = vpack.c.bf16 (!%p191_p2), %v1396_v44, %v1395_v43  ;;  %v1398_v49 = vld [vmem:[%s3405_s1 + $0x18] sm:$0xff] (!%p191_p2)  ;;  %vm1496_vm4 = vcmask (!%p191_p2), 1043456  }
   0x9   : > { %275 = vst.msk [vmem:[#allocation2 + $0x30] sm:$0xff] (!%p191_p2), %vm268_vm0, %v2199_v0  ;;  %276 = vst.msk [vmem:[#allocation2 + $0x38] sm:$0xff] (!%p191_p2), %vm268_vm0, %v2199_v0  ;;  %s2206_s12 = smov (!%p191_p2), 28   ;;  %v2164_v50 = vpack.c.bf16 (!%p191_p2), %v1398_v49, %v1397_v48  ;;  %v1399_v53 = vld [vmem:[%s3405_s1 + $0x20] sm:$0xf] (!%p191_p2)  ;;  %s2207_s15 = smov (!%p191_p2), 32  }
   0xa   : > { %277 = vst.msk [vmem:[#allocation2 + $0x40] sm:$0xff] (!%p191_p2), %vm268_vm0, %v2199_v0  ;;  %278 = vst.msk [vmem:[#allocation2 + $0x48] sm:$0xff] (!%p191_p2), %vm268_vm0, %v2199_v0  ;;  %2161 = vmatprep.subr.bf16.mxu0 (!%p191_p2), %v2160_v45  ;;  %2168 = vmatprep.subr.bf16.mxu1 (!%p191_p2), %v2160_v45  ;;  %vm577_vm5 = vcmask (!%p191_p2), 97344   ;;  %vm575_vm6 = vcmask (!%p191_p2), 97345   ;;  %vm707_vm7 = vcmask (!%p191_p2), 129120   ;;  %vm705_vm8 = vcmask (!%p191_p2), 130144  }
   0xb   : > { %279 = vst.msk [vmem:[#allocation2 + $0x50] sm:$0xff] (!%p191_p2), %vm268_vm0, %v2199_v0  ;;  %280 = vst.msk [vmem:[#allocation2 + $0x58] sm:$0xff] (!%p191_p2), %vm268_vm0, %v2199_v0  ;;  %2163 = vmatpush3.bf16.msra.mxu0 (!%p191_p2), %v2160_v45  ;;  %2171 = vmatpush3.bf16.msra.mxu1 (!%p191_p2), %v2160_v45  ;;  %vm835_vm9 = vcmask (!%p191_p2), 162944   ;;  %vm964_vm10 = vcmask (!%p191_p2), 195745   ;;  %vm966_vm11 = vcmask (!%p191_p2), 195744   ;;  %vm1088_vm12 = vcmask (!%p191_p2), 228544  }
   0xc   : > { %281 = vst.msk [vmem:[#allocation2 + $0x60] sm:$0xff] (!%p191_p2), %vm268_vm0, %v2199_v0  ;;  %282 = vst.msk [vmem:[#allocation2 + $0x68] sm:$0xff] (!%p191_p2), %vm268_vm0, %v2199_v0  ;;  %2165 = vmatprep.subr.bf16.mxu0 (!%p191_p2), %v2164_v50  ;;  %2169 = vmatprep.subr.bf16.mxu1 (!%p191_p2), %v2164_v50  ;;  %vm1210_vm13 = vcmask (!%p191_p2), 261344   ;;  %vm1090_vm14 = vcmask (!%p191_p2), 227520   ;;  %vm1331_vm15 = vcmask (!%p191_p2), 294145  }
   0xd   : > { %283 = vst.msk [vmem:[#allocation2 + $0x70] sm:$0xff] %vm268_vm0, %v2199_v0  ;;  %284 = vst.msk [vmem:[#allocation2 + $0x78] sm:$0xff] %vm268_vm0, %v2199_v0  ;;  %s3412_s2 = smov (!%p2248_p3, %s2018_s2), 1 }
   0xe   : > { %285 = vst.msk [vmem:[#allocation2 + $0x80] sm:$0xff] %vm268_vm0, %v2199_v0  ;;  %286 = vst.msk [vmem:[#allocation2 + $0x88] sm:$0xff] %vm268_vm0, %v2199_v0  ;;  %s2063_s19 = sshll.u32 %s3412_s2, 8 }
   0xf   : > { %287 = vst.msk [vmem:[#allocation2 + $0x90] sm:$0xff] %vm268_vm0, %v2199_v0  ;;  %288 = vst.msk [vmem:[#allocation2 + $0x98] sm:$0xff] %vm268_vm0, %v2199_v0  ;;  %s2328_s22 = scalar_lea.vmem %s3404_s0, %s2063_s19  ;;  %2167 = vmatpush3.bf16.msra.mxu0 %v2164_v50  ;;  %2172 = vmatpush3.bf16.msra.mxu1 %v2164_v50  ;;  %s3184_s3 = scalar_lea.vmem %s3408_s4, %s2063_s19 }
  0x10   : > { %289 = vst.msk [vmem:[#allocation2 + $0xa0] sm:$0xff] %vm268_vm0, %v2199_v0  ;;  %290 = vst.msk [vmem:[#allocation2 + $0xa8] sm:$0xff] %vm268_vm0, %v2199_v0  ;;  %v2331_v1 = vld [vmem:[%s2328_s22 + $0x10] sm:$0xff]  ;;  %v2334_v2 = vld [vmem:[%s2328_s22] sm:$0xff]  ;;  %2110 = vmatprep.subr.msk.mxu0 %vm1496_vm4, %v1399_v53  ;;  %2170 = vmatprep.subr.msk.mxu1 %vm1496_vm4, %v1399_v53  ;;  %s2027_s19 = sshll.u32 %s3412_s2, 3 }
  0x11   : > { %291 = vst.msk [vmem:[#allocation2 + $0xb0] sm:$0xff] %vm268_vm0, %v2199_v0  ;;  %292 = vst.msk [vmem:[#allocation2 + $0xb8] sm:$0xff] %vm268_vm0, %v2199_v0  ;;  %v2337_v3 = vld [vmem:[%s2328_s22 + $0x18] sm:$0xff]  ;;  %368 = vrot.lane.b32.xlu1 %v2331_v1, %s2200_s23  ;;  %364 = vrot.lane.b32.xlu0 %v2334_v2, %s2200_s23  ;;  %v2344_v4 = vld [vmem:[%s2328_s22 + $0x8] sm:$0xff] }
  0x12   : > { %293 = vst.msk [vmem:[#allocation2 + $0xc0] sm:$0xff] %vm268_vm0, %v2199_v0  ;;  %294 = vst.msk [vmem:[#allocation2 + $0xc8] sm:$0xff] %vm268_vm0, %v2199_v0  ;;  %v2347_v5 = vld [vmem:[%s2328_s22 + $0x28] sm:$0xff]  ;;  %v2356_v6 = vld [vmem:[%s2328_s22 + $0x20] sm:$0xff] }
  0x13   : > { %295 = vst.msk [vmem:[#allocation2 + $0xd0] sm:$0xff] %vm268_vm0, %v2199_v0  ;;  %296 = vst.msk [vmem:[#allocation2 + $0xd8] sm:$0xff] %vm268_vm0, %v2199_v0  ;;  %v2359_v7 = vld [vmem:[%s2328_s22 + $0x38] sm:$0xff]  ;;  %v2362_v8 = vld [vmem:[%s2328_s22 + $0x30] sm:$0xff]  ;;  %2111 = vmatpush3.msk.msra.mxu0 %vm1496_vm4, %v1399_v53  ;;  %2173 = vmatpush3.msk.msra.mxu1 %vm1496_vm4, %v1399_v53 }
  0x14   : > { %297 = vst.msk [vmem:[#allocation2 + $0xe0] sm:$0xff] %vm268_vm0, %v2199_v0  ;;  %298 = vst.msk [vmem:[#allocation2 + $0xe8] sm:$0xff] %vm268_vm0, %v2199_v0  ;;  %v2369_v9 = vld [vmem:[%s2328_s22 + $0x48] sm:$0xff]  ;;  %v2372_v10 = vld [vmem:[%s2328_s22 + $0x40] sm:$0xff] }
  0x15   : > { %299 = vst.msk [vmem:[#allocation2 + $0xf0] sm:$0xff] %vm268_vm0, %v2199_v0  ;;  %300 = vst.msk [vmem:[#allocation2 + $0xf8] sm:$0xff] %vm268_vm0, %v2199_v0  ;;  %v2375_v11 = vld [vmem:[%s2328_s22 + $0x58] sm:$0xff]  ;;  %v2384_v12 = vld [vmem:[%s2328_s22 + $0x50] sm:$0xff]  ;;  %370 = vrot.lane.b32.xlu1 %v2337_v3, %s2200_s23  ;;  %366 = vrot.lane.b32.xlu0 %v2344_v4, %s2200_s23 }
  0x16   : > { %306 = vst.msk [vmem:[#allocation2 + $0x21] sm:$0xff] %vm302_vm1, %v2331_v1  ;;  %303 = vst.msk [vmem:[#allocation2 + $0x11] sm:$0xff] %vm302_vm1, %v2334_v2  ;;  %v2387_v13 = vld [vmem:[%s2328_s22 + $0x68] sm:$0xff]  ;;  %v2390_v14 = vld [vmem:[%s2328_s22 + $0x60] sm:$0xff] }
  0x17   : > { %307 = vst.msk [vmem:[#allocation2 + $0x29] sm:$0x7f] %vm304_vm2, %v2337_v3  ;;  %305 = vst.msk [vmem:[#allocation2 + $0x19] sm:$0x7f] %vm304_vm2, %v2344_v4  ;;  %v2403_v15 = vld [vmem:[%s2328_s22 + $0x78] sm:$0xff]  ;;  %v2406_v16 = vld [vmem:[%s2328_s22 + $0x70] sm:$0xff] }
  0x18   : > { %309 = vst.msk [vmem:[#allocation2 + $0x39] sm:$0x7f] %vm304_vm2, %v2347_v5  ;;  %311 = vst.msk [vmem:[#allocation2 + $0x49] sm:$0x7f] %vm304_vm2, %v2359_v7  ;;  %v2415_v17 = vld [vmem:[%s2328_s22 + $0x88] sm:$0xff]  ;;  %v2418_v18 = vld [vmem:[%s2328_s22 + $0x80] sm:$0xff] }
  0x19   : > { %308 = vst.msk [vmem:[#allocation2 + $0x31] sm:$0xff] %vm302_vm1, %v2356_v6  ;;  %310 = vst.msk [vmem:[#allocation2 + $0x41] sm:$0xff] %vm302_vm1, %v2362_v8  ;;  %v2421_v19 = vld [vmem:[%s2328_s22 + $0x98] sm:$0xff]  ;;  %v2428_v20 = vld [vmem:[%s2328_s22 + $0x90] sm:$0xff]  ;;  %374 = vrot.lane.b32.xlu1 %v2347_v5, %s2200_s23  ;;  %372 = vrot.lane.b32.xlu0 %v2356_v6, %s2200_s23 }
  0x1a   : > { %312 = vst.msk [vmem:[#allocation2 + $0x51] sm:$0xff] %vm302_vm1, %v2372_v10  ;;  %314 = vst.msk [vmem:[#allocation2 + $0x61] sm:$0xff] %vm302_vm1, %v2384_v12  ;;  %v2431_v21 = vld [vmem:[%s2328_s22 + $0xa8] sm:$0xff]  ;;  %v2434_v22 = vld [vmem:[%s2328_s22 + $0xa0] sm:$0xff] }
  0x1b   : > { %313 = vst.msk [vmem:[#allocation2 + $0x59] sm:$0x7f] %vm304_vm2, %v2369_v9  ;;  %315 = vst.msk [vmem:[#allocation2 + $0x69] sm:$0x7f] %vm304_vm2, %v2375_v11  ;;  %v2443_v23 = vld [vmem:[%s2328_s22 + $0xb8] sm:$0xff]  ;;  %v2446_v24 = vld [vmem:[%s2328_s22 + $0xb0] sm:$0xff] }
  0x1c   : > { %316 = vst.msk [vmem:[#allocation2 + $0x71] sm:$0xff] %vm302_vm1, %v2390_v14  ;;  %318 = vst.msk [vmem:[#allocation2 + $0x81] sm:$0xff] %vm302_vm1, %v2406_v16  ;;  %v2449_v25 = vld [vmem:[%s2328_s22 + $0xc8] sm:$0xff]  ;;  %v2462_v26 = vld [vmem:[%s2328_s22 + $0xc0] sm:$0xff] }
  0x1d   : > { %317 = vst.msk [vmem:[#allocation2 + $0x79] sm:$0x7f] %vm304_vm2, %v2387_v13  ;;  %319 = vst.msk [vmem:[#allocation2 + $0x89] sm:$0x7f] %vm304_vm2, %v2403_v15  ;;  %v2465_v27 = vld [vmem:[%s2328_s22 + $0xd8] sm:$0xff]  ;;  %v2474_v28 = vld [vmem:[%s2328_s22 + $0xd0] sm:$0xff]  ;;  %378 = vrot.lane.b32.xlu1 %v2359_v7, %s2200_s23  ;;  %376 = vrot.lane.b32.xlu0 %v2362_v8, %s2200_s23 }
  0x1e   : > { %320 = vst.msk [vmem:[#allocation2 + $0x91] sm:$0xff] %vm302_vm1, %v2418_v18  ;;  %322 = vst.msk [vmem:[#allocation2 + $0xa1] sm:$0xff] %vm302_vm1, %v2428_v20  ;;  %v2477_v29 = vld [vmem:[%s2328_s22 + $0xe8] sm:$0xff]  ;;  %v2480_v30 = vld [vmem:[%s2328_s22 + $0xe0] sm:$0xff] }
  0x1f   : > { %321 = vst.msk [vmem:[#allocation2 + $0x99] sm:$0x7f] %vm304_vm2, %v2415_v17  ;;  %323 = vst.msk [vmem:[#allocation2 + $0xa9] sm:$0x7f] %vm304_vm2, %v2421_v19 }
  0x20   : > { %324 = vst.msk [vmem:[#allocation2 + $0xb1] sm:$0xff] %vm302_vm1, %v2434_v22  ;;  %326 = vst.msk [vmem:[#allocation2 + $0xc1] sm:$0xff] %vm302_vm1, %v2446_v24 }
  0x21   : > { %325 = vst.msk [vmem:[#allocation2 + $0xb9] sm:$0x7f] %vm304_vm2, %v2431_v21  ;;  %327 = vst.msk [vmem:[#allocation2 + $0xc9] sm:$0x7f] %vm304_vm2, %v2443_v23  ;;  %382 = vrot.lane.b32.xlu1 %v2369_v9, %s2200_s23  ;;  %380 = vrot.lane.b32.xlu0 %v2372_v10, %s2200_s23 }
  0x22   : > { %329 = vst.msk [vmem:[#allocation2 + $0xd9] sm:$0x7f] %vm304_vm2, %v2449_v25  ;;  %331 = vst.msk [vmem:[#allocation2 + $0xe9] sm:$0x7f] %vm304_vm2, %v2465_v27 }
  0x23   : > { %328 = vst.msk [vmem:[#allocation2 + $0xd1] sm:$0xff] %vm302_vm1, %v2462_v26  ;;  %330 = vst.msk [vmem:[#allocation2 + $0xe1] sm:$0xff] %vm302_vm1, %v2474_v28 }
  0x24   : > { %332 = vst.msk [vmem:[#allocation2 + $0xf1] sm:$0xff] %vm302_vm1, %v2480_v30  ;;  %vm1333_vm1 = vcmask 294144  }
  0x25   : > { %333 = vst.msk [vmem:[#allocation2 + $0xf9] sm:$0x7f] %vm304_vm2, %v2477_v29  ;;  %386 = vrot.lane.b32.xlu1 %v2375_v11, %s2200_s23  ;;  %384 = vrot.lane.b32.xlu0 %v2384_v12, %s2200_s23  ;;  %vm1725_vm2 = vcmask 64512  }
  0x29   : > { %390 = vrot.lane.b32.xlu1 %v2387_v13, %s2200_s23  ;;  %388 = vrot.lane.b32.xlu0 %v2390_v14, %s2200_s23 }
  0x2d   : > { %394 = vrot.lane.b32.xlu1 %v2403_v15, %s2200_s23  ;;  %392 = vrot.lane.b32.xlu0 %v2406_v16, %s2200_s23 }
  0x31   : > { %398 = vrot.lane.b32.xlu1 %v2415_v17, %s2200_s23  ;;  %396 = vrot.lane.b32.xlu0 %v2418_v18, %s2200_s23 }
  0x35   : > { %402 = vrot.lane.b32.xlu1 %v2421_v19, %s2200_s23  ;;  %400 = vrot.lane.b32.xlu0 %v2428_v20, %s2200_s23 }
  0x39   : > { %406 = vrot.lane.b32.xlu1 %v2431_v21, %s2200_s23  ;;  %404 = vrot.lane.b32.xlu0 %v2434_v22, %s2200_s23 }
  0x3d   : > { %410 = vrot.lane.b32.xlu1 %v2443_v23, %s2200_s23  ;;  %408 = vrot.lane.b32.xlu0 %v2446_v24, %s2200_s23 }
  0x41   : > { %414 = vrot.lane.b32.xlu1 %v2449_v25, %s2200_s23  ;;  %412 = vrot.lane.b32.xlu0 %v2462_v26, %s2200_s23 }
  0x45   : > { %418 = vrot.lane.b32.xlu1 %v2465_v27, %s2200_s23  ;;  %416 = vrot.lane.b32.xlu0 %v2474_v28, %s2200_s23 }
  0x49   : > { %422 = vrot.lane.b32.xlu1 %v2477_v29, %s2200_s23  ;;  %420 = vrot.lane.b32.xlu0 %v2480_v30, %s2200_s23 }
  0x4d   : > { %487 = vrot.lane.b32.xlu1 %v2344_v4, %s2201_s24  ;;  %485 = vrot.lane.b32.xlu0 %v2334_v2, %s2201_s24 }
  0x51   : > { %491 = vrot.lane.b32.xlu1 %v2337_v3, %s2201_s24  ;;  %489 = vrot.lane.b32.xlu0 %v2331_v1, %s2201_s24 }
  0x55   : > { %495 = vrot.lane.b32.xlu1 %v2347_v5, %s2201_s24  ;;  %493 = vrot.lane.b32.xlu0 %v2356_v6, %s2201_s24 }
  0x59   : > { %499 = vrot.lane.b32.xlu1 %v2359_v7, %s2201_s24  ;;  %497 = vrot.lane.b32.xlu0 %v2362_v8, %s2201_s24 }
  0x5d   : > { %503 = vrot.lane.b32.xlu1 %v2369_v9, %s2201_s24  ;;  %501 = vrot.lane.b32.xlu0 %v2372_v10, %s2201_s24 }
  0x61   : > { %507 = vrot.lane.b32.xlu1 %v2375_v11, %s2201_s24  ;;  %505 = vrot.lane.b32.xlu0 %v2384_v12, %s2201_s24 }
  0x65   : > { %511 = vrot.lane.b32.xlu1 %v2387_v13, %s2201_s24  ;;  %509 = vrot.lane.b32.xlu0 %v2390_v14, %s2201_s24 }
  0x69   : > { %515 = vrot.lane.b32.xlu1 %v2403_v15, %s2201_s24  ;;  %513 = vrot.lane.b32.xlu0 %v2406_v16, %s2201_s24 }
  0x6d   : > { %519 = vrot.lane.b32.xlu1 %v2415_v17, %s2201_s24  ;;  %517 = vrot.lane.b32.xlu0 %v2418_v18, %s2201_s24 }
  0x71   : > { %523 = vrot.lane.b32.xlu1 %v2421_v19, %s2201_s24  ;;  %521 = vrot.lane.b32.xlu0 %v2428_v20, %s2201_s24 }
  0x75   : > { %527 = vrot.lane.b32.xlu1 %v2431_v21, %s2201_s24  ;;  %525 = vrot.lane.b32.xlu0 %v2434_v22, %s2201_s24 }
  0x79   : > { %531 = vrot.lane.b32.xlu1 %v2443_v23, %s2201_s24  ;;  %529 = vrot.lane.b32.xlu0 %v2446_v24, %s2201_s24 }
  0x7d   : > { %535 = vrot.lane.b32.xlu1 %v2449_v25, %s2201_s24  ;;  %533 = vrot.lane.b32.xlu0 %v2462_v26, %s2201_s24 }
  0x81   : > { %539 = vrot.lane.b32.xlu1 %v2465_v27, %s2201_s24  ;;  %537 = vrot.lane.b32.xlu0 %v2474_v28, %s2201_s24 }
  0x83   : > { %v369_v31 = vpop.permute.xlu1 %368  ;;  %v365_v32 = vpop.permute.xlu0 %364 }
  0x84   : > { %457 = vst.msk [vmem:[#allocation2 + $0x20] sm:$0xff] %vm454_vm3, %v369_v31  ;;  %455 = vst.msk [vmem:[#allocation2 + $0x10] sm:$0xff] %vm454_vm3, %v365_v32 }
  0x85   : > { %543 = vrot.lane.b32.xlu1 %v2477_v29, %s2201_s24  ;;  %541 = vrot.lane.b32.xlu0 %v2480_v30, %s2201_s24 }
  0x87   : > { %v371_v33 = vpop.permute.xlu1 %370  ;;  %v367_v34 = vpop.permute.xlu0 %366 }
  0x88   : > { %458 = vst.msk [vmem:[#allocation2 + $0x28] sm:$0xff] %vm454_vm3, %v371_v33  ;;  %456 = vst.msk [vmem:[#allocation2 + $0x18] sm:$0xff] %vm454_vm3, %v367_v34 }
  0x89   : > { %611 = vrot.lane.b32.xlu1 %v2344_v4, %s2202_s25  ;;  %609 = vrot.lane.b32.xlu0 %v2334_v2, %s2202_s25 }
  0x8b   : > { %v375_v35 = vpop.permute.xlu1 %374  ;;  %v373_v36 = vpop.permute.xlu0 %372 }
  0x8c   : > { %460 = vst.msk [vmem:[#allocation2 + $0x38] sm:$0xff] %vm454_vm3, %v375_v35  ;;  %459 = vst.msk [vmem:[#allocation2 + $0x30] sm:$0xff] %vm454_vm3, %v373_v36 }
  0x8d   : > { %615 = vrot.lane.b32.xlu1 %v2337_v3, %s2202_s25  ;;  %613 = vrot.lane.b32.xlu0 %v2331_v1, %s2202_s25 }
  0x8f   : > { %v379_v37 = vpop.permute.xlu1 %378  ;;  %v377_v38 = vpop.permute.xlu0 %376 }
  0x90   : > { %462 = vst.msk [vmem:[#allocation2 + $0x48] sm:$0xff] %vm454_vm3, %v379_v37  ;;  %461 = vst.msk [vmem:[#allocation2 + $0x40] sm:$0xff] %vm454_vm3, %v377_v38 }
  0x91   : > { %739 = vrot.lane.b32.xlu1 %v2334_v2, %s2203_s26  ;;  %617 = vrot.lane.b32.xlu0 %v2356_v6, %s2202_s25 }
  0x93   : > { %v383_v39 = vpop.permute.xlu1 %382  ;;  %v381_v40 = vpop.permute.xlu0 %380 }
  0x94   : > { %464 = vst.msk [vmem:[#allocation2 + $0x58] sm:$0xff] %vm454_vm3, %v383_v39  ;;  %463 = vst.msk [vmem:[#allocation2 + $0x50] sm:$0xff] %vm454_vm3, %v381_v40 }
  0x95   : > { %868 = vrot.lane.b32.xlu1 %v2334_v2, %s2204_s27  ;;  %741 = vrot.lane.b32.xlu0 %v2344_v4, %s2203_s26 }
  0x97   : > { %v387_v41 = vpop.permute.xlu1 %386  ;;  %v385_v42 = vpop.permute.xlu0 %384 }
  0x98   : > { %466 = vst.msk [vmem:[#allocation2 + $0x68] sm:$0xff] %vm454_vm3, %v387_v41  ;;  %465 = vst.msk [vmem:[#allocation2 + $0x60] sm:$0xff] %vm454_vm3, %v385_v42 }
  0x99   : > { %998 = vrot.lane.b32.xlu1 %v2331_v1, %s2205_s7  ;;  %870 = vrot.lane.b32.xlu0 %v2344_v4, %s2204_s27 }
  0x9b   : > { %v391_v46 = vpop.permute.xlu1 %390  ;;  %v389_v47 = vpop.permute.xlu0 %388 }
  0x9c   : > { %468 = vst.msk [vmem:[#allocation2 + $0x78] sm:$0xff] %vm454_vm3, %v391_v46  ;;  %467 = vst.msk [vmem:[#allocation2 + $0x70] sm:$0xff] %vm454_vm3, %v389_v47 }
  0x9d   : > { %1120 = vrot.lane.b32.xlu1 %v2331_v1, %s2206_s12  ;;  %1000 = vrot.lane.b32.xlu0 %v2337_v3, %s2205_s7 }
  0x9f   : > { %v395_v51 = vpop.permute.xlu1 %394  ;;  %v393_v52 = vpop.permute.xlu0 %392 }
  0xa0   : > { %470 = vst.msk [vmem:[#allocation2 + $0x88] sm:$0xff] %vm454_vm3, %v395_v51  ;;  %469 = vst.msk [vmem:[#allocation2 + $0x80] sm:$0xff] %vm454_vm3, %v393_v52 }
  0xa1   : > { %743 = vrot.lane.b32.xlu1 %v2331_v1, %s2203_s26  ;;  %1122 = vrot.lane.b32.xlu0 %v2337_v3, %s2206_s12 }
  0xa3   : > { %v399_v54 = vpop.permute.xlu1 %398  ;;  %v397_v55 = vpop.permute.xlu0 %396 }
  0xa4   : > { %472 = vst.msk [vmem:[#allocation2 + $0x98] sm:$0xff] %vm454_vm3, %v399_v54  ;;  %471 = vst.msk [vmem:[#allocation2 + $0x90] sm:$0xff] %vm454_vm3, %v397_v55 }
  0xa5   : > { %1241 = vrot.lane.b32.xlu1 %v2331_v1, %s2207_s15  ;;  %745 = vrot.lane.b32.xlu0 %v2337_v3, %s2203_s26 }
  0xa7   : > { %v403_v56 = vpop.permute.xlu1 %402  ;;  %v401_v57 = vpop.permute.xlu0 %400 }
  0xa8   : > { %474 = vst.msk [vmem:[#allocation2 + $0xa8] sm:$0xff] %vm454_vm3, %v403_v56  ;;  %473 = vst.msk [vmem:[#allocation2 + $0xa0] sm:$0xff] %vm454_vm3, %v401_v57 }
  0xa9   : > { %872 = vrot.lane.b32.xlu1 %v2331_v1, %s2204_s27  ;;  %1243 = vrot.lane.b32.xlu0 %v2337_v3, %s2207_s15 }
  0xab   : > { %v407_v58 = vpop.permute.xlu1 %406  ;;  %v405_v59 = vpop.permute.xlu0 %404 }
  0xac   : > { %476 = vst.msk [vmem:[#allocation2 + $0xb8] sm:$0xff] %vm454_vm3, %v407_v58  ;;  %475 = vst.msk [vmem:[#allocation2 + $0xb0] sm:$0xff] %vm454_vm3, %v405_v59 }
  0xad   : > { %1002 = vrot.lane.b32.xlu1 %v2356_v6, %s2205_s7  ;;  %874 = vrot.lane.b32.xlu0 %v2337_v3, %s2204_s27 }
  0xaf   : > { %v411_v60 = vpop.permute.xlu1 %410  ;;  %v409_v61 = vpop.permute.xlu0 %408 }
  0xb0   : > { %478 = vst.msk [vmem:[#allocation2 + $0xc8] sm:$0xff] %vm454_vm3, %v411_v60  ;;  %477 = vst.msk [vmem:[#allocation2 + $0xc0] sm:$0xff] %vm454_vm3, %v409_v61 }
  0xb1   : > { %619 = vrot.lane.b32.xlu1 %v2347_v5, %s2202_s25  ;;  %1004 = vrot.lane.b32.xlu0 %v2347_v5, %s2205_s7 }
  0xb3   : > { %v415_v62 = vpop.permute.xlu1 %414  ;;  %v413_v63 = vpop.permute.xlu0 %412 }
  0xb4   : > { %480 = vst.msk [vmem:[#allocation2 + $0xd8] sm:$0xff] %vm454_vm3, %v415_v62  ;;  %479 = vst.msk [vmem:[#allocation2 + $0xd0] sm:$0xff] %vm454_vm3, %v413_v63 }
  0xb5   : > { %1126 = vrot.lane.b32.xlu1 %v2347_v5, %s2206_s12  ;;  %1124 = vrot.lane.b32.xlu0 %v2356_v6, %s2206_s12 }
  0xb7   : > { %v419_v1 = vpop.permute.xlu1 %418  ;;  %v417_v2 = vpop.permute.xlu0 %416 }
  0xb8   : > { %482 = vst.msk [vmem:[#allocation2 + $0xe8] sm:$0xff] %vm454_vm3, %v419_v1  ;;  %481 = vst.msk [vmem:[#allocation2 + $0xe0] sm:$0xff] %vm454_vm3, %v417_v2 }
  0xb9   : > { %749 = vrot.lane.b32.xlu1 %v2347_v5, %s2203_s26  ;;  %747 = vrot.lane.b32.xlu0 %v2356_v6, %s2203_s26 }
  0xbb   : > { %v423_v3 = vpop.permute.xlu1 %422  ;;  %v421_v4 = vpop.permute.xlu0 %420 }
  0xbc   : > { %484 = vst.msk [vmem:[#allocation2 + $0xf8] sm:$0xff] %vm454_vm3, %v423_v3  ;;  %483 = vst.msk [vmem:[#allocation2 + $0xf0] sm:$0xff] %vm454_vm3, %v421_v4 }
  0xbd   : > { %1247 = vrot.lane.b32.xlu1 %v2347_v5, %s2207_s15  ;;  %1245 = vrot.lane.b32.xlu0 %v2356_v6, %s2207_s15 }
  0xbf   : > { %v488_v31 = vpop.permute.xlu1 %487  ;;  %v486_v32 = vpop.permute.xlu0 %485 }
  0xc0   : > { %578 = vst.msk [vmem:[#allocation2 + $0x17] sm:$0xff] %vm577_vm5, %v488_v31 }
  0xc1   : > { %576 = vst.msk [vmem:[#allocation2 + $0xf] sm:$0xfe] %vm575_vm6, %v486_v32  ;;  %878 = vrot.lane.b32.xlu1 %v2347_v5, %s2204_s27  ;;  %876 = vrot.lane.b32.xlu0 %v2356_v6, %s2204_s27 }
  0xc3   : > { %v492_v33 = vpop.permute.xlu1 %491  ;;  %v490_v34 = vpop.permute.xlu0 %489 }
  0xc4   : > { %580 = vst.msk [vmem:[#allocation2 + $0x27] sm:$0xff] %vm577_vm5, %v492_v33 }
  0xc5   : > { %579 = vst.msk [vmem:[#allocation2 + $0x1f] sm:$0xfe] %vm575_vm6, %v490_v34  ;;  %1008 = vrot.lane.b32.xlu1 %v2359_v7, %s2205_s7  ;;  %1006 = vrot.lane.b32.xlu0 %v2362_v8, %s2205_s7 }
  0xc7   : > { %v496_v35 = vpop.permute.xlu1 %495  ;;  %v494_v36 = vpop.permute.xlu0 %493 }
  0xc8   : > { %582 = vst.msk [vmem:[#allocation2 + $0x37] sm:$0xff] %vm577_vm5, %v496_v35 }
  0xc9   : > { %581 = vst.msk [vmem:[#allocation2 + $0x2f] sm:$0xfe] %vm575_vm6, %v494_v36  ;;  %623 = vrot.lane.b32.xlu1 %v2359_v7, %s2202_s25  ;;  %621 = vrot.lane.b32.xlu0 %v2362_v8, %s2202_s25 }
  0xcb   : > { %v500_v5 = vpop.permute.xlu1 %499  ;;  %v498_v6 = vpop.permute.xlu0 %497 }
  0xcc   : > { %584 = vst.msk [vmem:[#allocation2 + $0x47] sm:$0xff] %vm577_vm5, %v500_v5 }
  0xcd   : > { %583 = vst.msk [vmem:[#allocation2 + $0x3f] sm:$0xfe] %vm575_vm6, %v498_v6  ;;  %1130 = vrot.lane.b32.xlu1 %v2359_v7, %s2206_s12  ;;  %1128 = vrot.lane.b32.xlu0 %v2362_v8, %s2206_s12 }
  0xcf   : > { %v504_v37 = vpop.permute.xlu1 %503  ;;  %v502_v38 = vpop.permute.xlu0 %501 }
  0xd0   : > { %586 = vst.msk [vmem:[#allocation2 + $0x57] sm:$0xff] %vm577_vm5, %v504_v37 }
  0xd1   : > { %585 = vst.msk [vmem:[#allocation2 + $0x4f] sm:$0xfe] %vm575_vm6, %v502_v38  ;;  %753 = vrot.lane.b32.xlu1 %v2359_v7, %s2203_s26  ;;  %751 = vrot.lane.b32.xlu0 %v2362_v8, %s2203_s26 }
  0xd3   : > { %v508_v39 = vpop.permute.xlu1 %507  ;;  %v506_v40 = vpop.permute.xlu0 %505 }
  0xd4   : > { %588 = vst.msk [vmem:[#allocation2 + $0x67] sm:$0xff] %vm577_vm5, %v508_v39 }
  0xd5   : > { %587 = vst.msk [vmem:[#allocation2 + $0x5f] sm:$0xfe] %vm575_vm6, %v506_v40  ;;  %1251 = vrot.lane.b32.xlu1 %v2359_v7, %s2207_s15  ;;  %1249 = vrot.lane.b32.xlu0 %v2362_v8, %s2207_s15 }
  0xd7   : > { %v512_v41 = vpop.permute.xlu1 %511  ;;  %v510_v42 = vpop.permute.xlu0 %509 }
  0xd8   : > { %590 = vst.msk [vmem:[#allocation2 + $0x77] sm:$0xff] %vm577_vm5, %v512_v41 }
  0xd9   : > { %589 = vst.msk [vmem:[#allocation2 + $0x6f] sm:$0xfe] %vm575_vm6, %v510_v42  ;;  %882 = vrot.lane.b32.xlu1 %v2359_v7, %s2204_s27  ;;  %880 = vrot.lane.b32.xlu0 %v2362_v8, %s2204_s27 }
  0xdb   : > { %v516_v43 = vpop.permute.xlu1 %515  ;;  %v514_v44 = vpop.permute.xlu0 %513 }
  0xdc   : > { %592 = vst.msk [vmem:[#allocation2 + $0x87] sm:$0xff] %vm577_vm5, %v516_v43 }
  0xdd   : > { %591 = vst.msk [vmem:[#allocation2 + $0x7f] sm:$0xfe] %vm575_vm6, %v514_v44  ;;  %1012 = vrot.lane.b32.xlu1 %v2369_v9, %s2205_s7  ;;  %1010 = vrot.lane.b32.xlu0 %v2372_v10, %s2205_s7 }
  0xdf   : > { %v520_v45 = vpop.permute.xlu1 %519  ;;  %v518_v46 = vpop.permute.xlu0 %517 }
  0xe0   : > { %594 = vst.msk [vmem:[#allocation2 + $0x97] sm:$0xff] %vm577_vm5, %v520_v45 }
  0xe1   : > { %593 = vst.msk [vmem:[#allocation2 + $0x8f] sm:$0xfe] %vm575_vm6, %v518_v46  ;;  %627 = vrot.lane.b32.xlu1 %v2369_v9, %s2202_s25  ;;  %625 = vrot.lane.b32.xlu0 %v2372_v10, %s2202_s25 }
  0xe3   : > { %v524_v7 = vpop.permute.xlu1 %523  ;;  %v522_v8 = vpop.permute.xlu0 %521 }
  0xe4   : > { %596 = vst.msk [vmem:[#allocation2 + $0xa7] sm:$0xff] %vm577_vm5, %v524_v7 }
  0xe5   : > { %595 = vst.msk [vmem:[#allocation2 + $0x9f] sm:$0xfe] %vm575_vm6, %v522_v8  ;;  %1134 = vrot.lane.b32.xlu1 %v2369_v9, %s2206_s12  ;;  %1132 = vrot.lane.b32.xlu0 %v2372_v10, %s2206_s12 }
  0xe7   : > { %v528_v47 = vpop.permute.xlu1 %527  ;;  %v526_v48 = vpop.permute.xlu0 %525 }
  0xe8   : > { %598 = vst.msk [vmem:[#allocation2 + $0xb7] sm:$0xff] %vm577_vm5, %v528_v47 }
  0xe9   : > { %597 = vst.msk [vmem:[#allocation2 + $0xaf] sm:$0xfe] %vm575_vm6, %v526_v48  ;;  %757 = vrot.lane.b32.xlu1 %v2369_v9, %s2203_s26  ;;  %755 = vrot.lane.b32.xlu0 %v2372_v10, %s2203_s26 }
  0xeb   : > { %v532_v49 = vpop.permute.xlu1 %531  ;;  %v530_v50 = vpop.permute.xlu0 %529 }
  0xec   : > { %600 = vst.msk [vmem:[#allocation2 + $0xc7] sm:$0xff] %vm577_vm5, %v532_v49 }
  0xed   : > { %599 = vst.msk [vmem:[#allocation2 + $0xbf] sm:$0xfe] %vm575_vm6, %v530_v50  ;;  %1255 = vrot.lane.b32.xlu1 %v2369_v9, %s2207_s15  ;;  %1253 = vrot.lane.b32.xlu0 %v2372_v10, %s2207_s15 }
  0xef   : > { %v536_v51 = vpop.permute.xlu1 %535  ;;  %v534_v52 = vpop.permute.xlu0 %533 }
  0xf0   : > { %602 = vst.msk [vmem:[#allocation2 + $0xd7] sm:$0xff] %vm577_vm5, %v536_v51 }
  0xf1   : > { %601 = vst.msk [vmem:[#allocation2 + $0xcf] sm:$0xfe] %vm575_vm6, %v534_v52  ;;  %886 = vrot.lane.b32.xlu1 %v2369_v9, %s2204_s27  ;;  %884 = vrot.lane.b32.xlu0 %v2372_v10, %s2204_s27 }
  0xf3   : > { %v540_v53 = vpop.permute.xlu1 %539  ;;  %v538_v54 = vpop.permute.xlu0 %537 }
  0xf4   : > { %604 = vst.msk [vmem:[#allocation2 + $0xe7] sm:$0xff] %vm577_vm5, %v540_v53 }
  0xf5   : > { %603 = vst.msk [vmem:[#allocation2 + $0xdf] sm:$0xfe] %vm575_vm6, %v538_v54  ;;  %1016 = vrot.lane.b32.xlu1 %v2375_v11, %s2205_s7  ;;  %1014 = vrot.lane.b32.xlu0 %v2384_v12, %s2205_s7 }
  0xf7   : > { %v544_v55 = vpop.permute.xlu1 %543  ;;  %v542_v56 = vpop.permute.xlu0 %541 }
  0xf8   : > { %606 = vst.msk [vmem:[#allocation2 + $0xf7] sm:$0xff] %vm577_vm5, %v544_v55 }
  0xf9   : > { %605 = vst.msk [vmem:[#allocation2 + $0xef] sm:$0xfe] %vm575_vm6, %v542_v56  ;;  %631 = vrot.lane.b32.xlu1 %v2375_v11, %s2202_s25  ;;  %629 = vrot.lane.b32.xlu0 %v2384_v12, %s2202_s25 }
  0xfb   : > { %v612_v9 = vpop.permute.xlu1 %611  ;;  %v610_v10 = vpop.permute.xlu0 %609 }
  0xfc   : > { %708 = vst.msk [vmem:[#allocation2 + $0x9] sm:$0x7f] %vm707_vm7, %v612_v9 }
  0xfd   : > { %706 = vst.msk [vmem:[#allocation2 + $0x1] sm:$0xff] %vm705_vm8, %v610_v10  ;;  %1138 = vrot.lane.b32.xlu1 %v2375_v11, %s2206_s12  ;;  %1136 = vrot.lane.b32.xlu0 %v2384_v12, %s2206_s12 }
  0xff   : > { %v616_v57 = vpop.permute.xlu1 %615  ;;  %v614_v58 = vpop.permute.xlu0 %613 }
 0x100   : > { %710 = vst.msk [vmem:[#allocation2 + $0x19] sm:$0x7f] %vm707_vm7, %v616_v57 }
 0x101   : > { %709 = vst.msk [vmem:[#allocation2 + $0x11] sm:$0xff] %vm705_vm8, %v614_v58  ;;  %761 = vrot.lane.b32.xlu1 %v2375_v11, %s2203_s26  ;;  %759 = vrot.lane.b32.xlu0 %v2384_v12, %s2203_s26 }
 0x103   : > { %v740_v59 = vpop.permute.xlu1 %739  ;;  %v618_v60 = vpop.permute.xlu0 %617 }
 0x104   : > { %836 = vst.msk [vmem:[#allocation2] sm:$0xff] %vm835_vm9, %v740_v59 }
 0x105   : > { %711 = vst.msk [vmem:[#allocation2 + $0x21] sm:$0xff] %vm705_vm8, %v618_v60  ;;  %1259 = vrot.lane.b32.xlu1 %v2375_v11, %s2207_s15  ;;  %1257 = vrot.lane.b32.xlu0 %v2384_v12, %s2207_s15 }
 0x107   : > { %v869_v61 = vpop.permute.xlu1 %868  ;;  %v742_v62 = vpop.permute.xlu0 %741 }
 0x108   : > { %965 = vst.msk [vmem:[#allocation2 - $0x1] sm:$0xfe] %vm964_vm10, %v869_v61 }
 0x109   : > { %837 = vst.msk [vmem:[#allocation2 + $0x8] sm:$0xff] %vm835_vm9, %v742_v62  ;;  %890 = vrot.lane.b32.xlu1 %v2375_v11, %s2204_s27  ;;  %888 = vrot.lane.b32.xlu0 %v2384_v12, %s2204_s27 }
 0x10b   : > { %v999_v63 = vpop.permute.xlu1 %998  ;;  %v871_v1 = vpop.permute.xlu0 %870 }
 0x10c   : > { %967 = vst.msk [vmem:[#allocation2 + $0x7] sm:$0xff] %vm966_vm11, %v871_v1 }
 0x10d   : > { %1020 = vrot.lane.b32.xlu1 %v2387_v13, %s2205_s7  ;;  %1018 = vrot.lane.b32.xlu0 %v2390_v14, %s2205_s7  ;;  %1089 = vst.msk [vmem:[#allocation2 + $0x1] sm:$0xff] %vm1088_vm12, %v999_v63 }
 0x10f   : > { %v1121_v11 = vpop.permute.xlu1 %1120  ;;  %v1001_v2 = vpop.permute.xlu0 %1000 }
 0x110   : > { %1211 = vst.msk [vmem:[#allocation2] sm:$0xff] %vm1210_vm13, %v1121_v11 }
 0x111   : > { %1091 = vst.msk [vmem:[#allocation2 + $0x9] sm:$0x7f] %vm1090_vm14, %v1001_v2  ;;  %635 = vrot.lane.b32.xlu1 %v2387_v13, %s2202_s25  ;;  %633 = vrot.lane.b32.xlu0 %v2390_v14, %s2202_s25 }
 0x113   : > { %v744_v12 = vpop.permute.xlu1 %743  ;;  %v1123_v3 = vpop.permute.xlu0 %1122 }
 0x114   : > { %838 = vst.msk [vmem:[#allocation2 + $0x10] sm:$0xff] %vm835_vm9, %v744_v12 }
 0x115   : > { %1212 = vst.msk [vmem:[#allocation2 + $0x8] sm:$0xff] %vm1210_vm13, %v1123_v3  ;;  %1142 = vrot.lane.b32.xlu1 %v2387_v13, %s2206_s12  ;;  %1140 = vrot.lane.b32.xlu0 %v2390_v14, %s2206_s12 }
 0x117   : > { %v1242_v4 = vpop.permute.xlu1 %1241  ;;  %v746_v31 = vpop.permute.xlu0 %745 }
 0x118   : > { %1332 = vst.msk [vmem:[#allocation2 - $0x1] sm:$0xfe] %vm1331_vm15, %v1242_v4 }
 0x119   : > { %839 = vst.msk [vmem:[#allocation2 + $0x18] sm:$0xff] %vm835_vm9, %v746_v31  ;;  %765 = vrot.lane.b32.xlu1 %v2387_v13, %s2203_s26  ;;  %763 = vrot.lane.b32.xlu0 %v2390_v14, %s2203_s26 }
 0x11b   : > { %v873_v32 = vpop.permute.xlu1 %872  ;;  %v1244_v33 = vpop.permute.xlu0 %1243 }
 0x11c   : > { %968 = vst.msk [vmem:[#allocation2 + $0xf] sm:$0xfe] %vm964_vm10, %v873_v32 }
 0x11d   : > { %1334 = vst.msk [vmem:[#allocation2 + $0x7] sm:$0xff] %vm1333_vm1, %v1244_v33  ;;  %1263 = vrot.lane.b32.xlu1 %v2387_v13, %s2207_s15  ;;  %1261 = vrot.lane.b32.xlu0 %v2390_v14, %s2207_s15 }
 0x11f   : > { %v1003_v34 = vpop.permute.xlu1 %1002  ;;  %v875_v35 = vpop.permute.xlu0 %874 }
 0x120   : > { %969 = vst.msk [vmem:[#allocation2 + $0x17] sm:$0xff] %vm966_vm11, %v875_v35 }
 0x121   : > { %1092 = vst.msk [vmem:[#allocation2 + $0x11] sm:$0xff] %vm1088_vm12, %v1003_v34  ;;  %894 = vrot.lane.b32.xlu1 %v2387_v13, %s2204_s27  ;;  %892 = vrot.lane.b32.xlu0 %v2390_v14, %s2204_s27 }
 0x123   : > { %v620_v36 = vpop.permute.xlu1 %619  ;;  %v1005_v5 = vpop.permute.xlu0 %1004 }
 0x124   : > { %v1363_v6 = vld [vmem:[#allocation2] sm:$0xff]  ;;  %v1364_v37 = vld [vmem:[#allocation2 + $0x8] sm:$0xff]  ;;  %712 = vst.msk [vmem:[#allocation2 + $0x29] sm:$0x7f] %vm707_vm7, %v620_v36 }
 0x125   : > { %1093 = vst.msk [vmem:[#allocation2 + $0x19] sm:$0x7f] %vm1090_vm14, %v1005_v5  ;;  %2112 = vmatprep.mubr.msk.f32.mxu0 %vm268_vm0, %v1363_v6  ;;  %1024 = vrot.lane.b32.xlu1 %v2403_v15, %s2205_s7 }
 0x126   : > { %1022 = vrot.lane.b32.xlu0 %v2406_v16, %s2205_s7  ;;  %2113 = vmatmul.mubr.msk.f32.vlgmr.msra.gmra.mrb[0].mxu0 %vm268_vm0, %v1364_v37 }
 0x127   : > { %v1127_v13 = vpop.permute.xlu1 %1126  ;;  %v1125_v14 = vpop.permute.xlu0 %1124 }
 0x128   : > { %1214 = vst.msk [vmem:[#allocation2 + $0x18] sm:$0xff] %vm1210_vm13, %v1127_v13  ;;  %1213 = vst.msk [vmem:[#allocation2 + $0x10] sm:$0xff] %vm1210_vm13, %v1125_v14 }
 0x129   : > { %639 = vrot.lane.b32.xlu1 %v2403_v15, %s2202_s25 }
 0x12a   : > { %637 = vrot.lane.b32.xlu0 %v2406_v16, %s2202_s25 }
 0x12b   : > { %v750_v38 = vpop.permute.xlu1 %749  ;;  %v748_v39 = vpop.permute.xlu0 %747 }
 0x12c   : > { %841 = vst.msk [vmem:[#allocation2 + $0x28] sm:$0xff] %vm835_vm9, %v750_v38  ;;  %840 = vst.msk [vmem:[#allocation2 + $0x20] sm:$0xff] %vm835_vm9, %v748_v39 }
 0x12d   : > { %1146 = vrot.lane.b32.xlu1 %v2403_v15, %s2206_s12 }
 0x12e   : > { %1144 = vrot.lane.b32.xlu0 %v2406_v16, %s2206_s12 }
 0x12f   : > { %v1248_v40 = vpop.permute.xlu1 %1247  ;;  %v1246_v41 = vpop.permute.xlu0 %1245 }
 0x130   : > { %1336 = vst.msk [vmem:[#allocation2 + $0x17] sm:$0xff] %vm1333_vm1, %v1248_v40 }
 0x131   : > { %1335 = vst.msk [vmem:[#allocation2 + $0xf] sm:$0xfe] %vm1331_vm15, %v1246_v41  ;;  %769 = vrot.lane.b32.xlu1 %v2403_v15, %s2203_s26 }
 0x132   : > { %767 = vrot.lane.b32.xlu0 %v2406_v16, %s2203_s26 }
 0x133   : > { %v879_v42 = vpop.permute.xlu1 %878  ;;  %v877_v43 = vpop.permute.xlu0 %876 }
 0x134   : > { %971 = vst.msk [vmem:[#allocation2 + $0x27] sm:$0xff] %vm966_vm11, %v879_v42 }
 0x135   : > { %970 = vst.msk [vmem:[#allocation2 + $0x1f] sm:$0xfe] %vm964_vm10, %v877_v43  ;;  %1267 = vrot.lane.b32.xlu1 %v2403_v15, %s2207_s15 }
 0x136   : > { %1265 = vrot.lane.b32.xlu0 %v2406_v16, %s2207_s15 }
 0x137   : > { %v1009_v44 = vpop.permute.xlu1 %1008  ;;  %v1007_v45 = vpop.permute.xlu0 %1006  ;;  %v1366_v7 = vld [vmem:[#allocation2 + $0x18] sm:$0xff] }
 0x138   : > { %v1365_v46 = vld [vmem:[#allocation2 + $0x10] sm:$0xff]  ;;  %1095 = vst.msk [vmem:[#allocation2 + $0x29] sm:$0x7f] %vm1090_vm14, %v1009_v44 }
 0x139   : > { %1094 = vst.msk [vmem:[#allocation2 + $0x21] sm:$0xff] %vm1088_vm12, %v1007_v45  ;;  %2115 = vmatprep.mubr.msk.f32.mxu0 %vm268_vm0, %v1365_v46  ;;  %898 = vrot.lane.b32.xlu1 %v2403_v15, %s2204_s27 }
 0x13a   : > { %896 = vrot.lane.b32.xlu0 %v2406_v16, %s2204_s27  ;;  %2116 = vmatmul.mubr.msk.f32.gmra.mrb[2].mxu0 %vm268_vm0, %v1366_v7 }
 0x13b   : > { %v624_v8 = vpop.permute.xlu1 %623  ;;  %v622_v47 = vpop.permute.xlu0 %621 }
 0x13c   : > { %714 = vst.msk [vmem:[#allocation2 + $0x39] sm:$0x7f] %vm707_vm7, %v624_v8 }
 0x13d   : > { %713 = vst.msk [vmem:[#allocation2 + $0x31] sm:$0xff] %vm705_vm8, %v622_v47  ;;  %1028 = vrot.lane.b32.xlu1 %v2415_v17, %s2205_s7 }
 0x13e   : > { %1026 = vrot.lane.b32.xlu0 %v2418_v18, %s2205_s7 }
 0x13f   : > { %v1131_v48 = vpop.permute.xlu1 %1130  ;;  %v1129_v49 = vpop.permute.xlu0 %1128 }
 0x140   : > { %1216 = vst.msk [vmem:[#allocation2 + $0x28] sm:$0xff] %vm1210_vm13, %v1131_v48  ;;  %1215 = vst.msk [vmem:[#allocation2 + $0x20] sm:$0xff] %vm1210_vm13, %v1129_v49 }
 0x141   : > { %643 = vrot.lane.b32.xlu1 %v2415_v17, %s2202_s25 }
 0x142   : > { %641 = vrot.lane.b32.xlu0 %v2418_v18, %s2202_s25 }
 0x143   : > { %v754_v15 = vpop.permute.xlu1 %753  ;;  %v752_v16 = vpop.permute.xlu0 %751 }
 0x144   : > { %843 = vst.msk [vmem:[#allocation2 + $0x38] sm:$0xff] %vm835_vm9, %v754_v15  ;;  %842 = vst.msk [vmem:[#allocation2 + $0x30] sm:$0xff] %vm835_vm9, %v752_v16 }
 0x145   : > { %1150 = vrot.lane.b32.xlu1 %v2415_v17, %s2206_s12 }
 0x146   : > { %1148 = vrot.lane.b32.xlu0 %v2418_v18, %s2206_s12 }
 0x147   : > { %v1252_v50 = vpop.permute.xlu1 %1251  ;;  %v1250_v51 = vpop.permute.xlu0 %1249 }
 0x148   : > { %1338 = vst.msk [vmem:[#allocation2 + $0x27] sm:$0xff] %vm1333_vm1, %v1252_v50 }
 0x149   : > { %1337 = vst.msk [vmem:[#allocation2 + $0x1f] sm:$0xfe] %vm1331_vm15, %v1250_v51  ;;  %773 = vrot.lane.b32.xlu1 %v2415_v17, %s2203_s26 }
 0x14a   : > { %771 = vrot.lane.b32.xlu0 %v2418_v18, %s2203_s26 }
 0x14b   : > { %v883_v52 = vpop.permute.xlu1 %882  ;;  %v881_v53 = vpop.permute.xlu0 %880 }
 0x14c   : > { %973 = vst.msk [vmem:[#allocation2 + $0x37] sm:$0xff] %vm966_vm11, %v883_v52 }
 0x14d   : > { %972 = vst.msk [vmem:[#allocation2 + $0x2f] sm:$0xfe] %vm964_vm10, %v881_v53  ;;  %1271 = vrot.lane.b32.xlu1 %v2415_v17, %s2207_s15 }
 0x14e   : > { %1269 = vrot.lane.b32.xlu0 %v2418_v18, %s2207_s15 }
 0x14f   : > { %v1013_v54 = vpop.permute.xlu1 %1012  ;;  %v1011_v55 = vpop.permute.xlu0 %1010  ;;  %v1368_v9 = vld [vmem:[#allocation2 + $0x28] sm:$0xff] }
 0x150   : > { %v1367_v56 = vld [vmem:[#allocation2 + $0x20] sm:$0xff]  ;;  %1097 = vst.msk [vmem:[#allocation2 + $0x39] sm:$0x7f] %vm1090_vm14, %v1013_v54 }
 0x151   : > { %1096 = vst.msk [vmem:[#allocation2 + $0x31] sm:$0xff] %vm1088_vm12, %v1011_v55  ;;  %2118 = vmatprep.mubr.msk.f32.mxu0 %vm268_vm0, %v1367_v56  ;;  %902 = vrot.lane.b32.xlu1 %v2415_v17, %s2204_s27 }
 0x152   : > { %900 = vrot.lane.b32.xlu0 %v2418_v18, %s2204_s27  ;;  %2119 = vmatmul.mubr.msk.f32.gmra.mrb[4].mxu0 %vm268_vm0, %v1368_v9 }
 0x153   : > { %v628_v10 = vpop.permute.xlu1 %627  ;;  %v626_v57 = vpop.permute.xlu0 %625 }
 0x154   : > { %716 = vst.msk [vmem:[#allocation2 + $0x49] sm:$0x7f] %vm707_vm7, %v628_v10 }
 0x155   : > { %715 = vst.msk [vmem:[#allocation2 + $0x41] sm:$0xff] %vm705_vm8, %v626_v57  ;;  %1032 = vrot.lane.b32.xlu1 %v2421_v19, %s2205_s7 }
 0x156   : > { %1030 = vrot.lane.b32.xlu0 %v2428_v20, %s2205_s7 }
 0x157   : > { %v1135_v58 = vpop.permute.xlu1 %1134  ;;  %v1133_v59 = vpop.permute.xlu0 %1132 }
 0x158   : > { %1218 = vst.msk [vmem:[#allocation2 + $0x38] sm:$0xff] %vm1210_vm13, %v1135_v58  ;;  %1217 = vst.msk [vmem:[#allocation2 + $0x30] sm:$0xff] %vm1210_vm13, %v1133_v59 }
 0x159   : > { %647 = vrot.lane.b32.xlu1 %v2421_v19, %s2202_s25 }
 0x15a   : > { %645 = vrot.lane.b32.xlu0 %v2428_v20, %s2202_s25 }
 0x15b   : > { %v758_v17 = vpop.permute.xlu1 %757  ;;  %v756_v18 = vpop.permute.xlu0 %755 }
 0x15c   : > { %845 = vst.msk [vmem:[#allocation2 + $0x48] sm:$0xff] %vm835_vm9, %v758_v17  ;;  %844 = vst.msk [vmem:[#allocation2 + $0x40] sm:$0xff] %vm835_vm9, %v756_v18 }
 0x15d   : > { %1154 = vrot.lane.b32.xlu1 %v2421_v19, %s2206_s12 }
 0x15e   : > { %1152 = vrot.lane.b32.xlu0 %v2428_v20, %s2206_s12 }
 0x15f   : > { %v1256_v60 = vpop.permute.xlu1 %1255  ;;  %v1254_v61 = vpop.permute.xlu0 %1253 }
 0x160   : > { %1340 = vst.msk [vmem:[#allocation2 + $0x37] sm:$0xff] %vm1333_vm1, %v1256_v60 }
 0x161   : > { %1339 = vst.msk [vmem:[#allocation2 + $0x2f] sm:$0xfe] %vm1331_vm15, %v1254_v61  ;;  %777 = vrot.lane.b32.xlu1 %v2421_v19, %s2203_s26 }
 0x162   : > { %775 = vrot.lane.b32.xlu0 %v2428_v20, %s2203_s26 }
 0x163   : > { %v887_v62 = vpop.permute.xlu1 %886  ;;  %v885_v63 = vpop.permute.xlu0 %884 }
 0x164   : > { %975 = vst.msk [vmem:[#allocation2 + $0x47] sm:$0xff] %vm966_vm11, %v887_v62 }
 0x165   : > { %974 = vst.msk [vmem:[#allocation2 + $0x3f] sm:$0xfe] %vm964_vm10, %v885_v63  ;;  %1275 = vrot.lane.b32.xlu1 %v2421_v19, %s2207_s15 }
 0x166   : > { %1273 = vrot.lane.b32.xlu0 %v2428_v20, %s2207_s15 }
 0x167   : > { %v1017_v1 = vpop.permute.xlu1 %1016  ;;  %v1015_v11 = vpop.permute.xlu0 %1014  ;;  %v1370_v12 = vld [vmem:[#allocation2 + $0x38] sm:$0xff] }
 0x168   : > { %v1369_v2 = vld [vmem:[#allocation2 + $0x30] sm:$0xff]  ;;  %1099 = vst.msk [vmem:[#allocation2 + $0x49] sm:$0x7f] %vm1090_vm14, %v1017_v1 }
 0x169   : > { %1098 = vst.msk [vmem:[#allocation2 + $0x41] sm:$0xff] %vm1088_vm12, %v1015_v11  ;;  %2121 = vmatprep.mubr.msk.f32.mxu0 %vm268_vm0, %v1369_v2  ;;  %906 = vrot.lane.b32.xlu1 %v2421_v19, %s2204_s27 }
 0x16a   : > { %904 = vrot.lane.b32.xlu0 %v2428_v20, %s2204_s27  ;;  %2122 = vmatmul.mubr.msk.f32.gmra.mrb[6].mxu0 %vm268_vm0, %v1370_v12 }
 0x16b   : > { %v632_v3 = vpop.permute.xlu1 %631  ;;  %v630_v4 = vpop.permute.xlu0 %629 }
 0x16c   : > { %718 = vst.msk [vmem:[#allocation2 + $0x59] sm:$0x7f] %vm707_vm7, %v632_v3 }
 0x16d   : > { %717 = vst.msk [vmem:[#allocation2 + $0x51] sm:$0xff] %vm705_vm8, %v630_v4  ;;  %1036 = vrot.lane.b32.xlu1 %v2431_v21, %s2205_s7 }
 0x16e   : > { %1034 = vrot.lane.b32.xlu0 %v2434_v22, %s2205_s7 }
 0x16f   : > { %v1139_v31 = vpop.permute.xlu1 %1138  ;;  %v1137_v32 = vpop.permute.xlu0 %1136 }
 0x170   : > { %1220 = vst.msk [vmem:[#allocation2 + $0x48] sm:$0xff] %vm1210_vm13, %v1139_v31  ;;  %1219 = vst.msk [vmem:[#allocation2 + $0x40] sm:$0xff] %vm1210_vm13, %v1137_v32 }
 0x171   : > { %651 = vrot.lane.b32.xlu1 %v2431_v21, %s2202_s25 }
 0x172   : > { %649 = vrot.lane.b32.xlu0 %v2434_v22, %s2202_s25 }
 0x173   : > { %v762_v19 = vpop.permute.xlu1 %761  ;;  %v760_v20 = vpop.permute.xlu0 %759 }
 0x174   : > { %847 = vst.msk [vmem:[#allocation2 + $0x58] sm:$0xff] %vm835_vm9, %v762_v19  ;;  %846 = vst.msk [vmem:[#allocation2 + $0x50] sm:$0xff] %vm835_vm9, %v760_v20 }
 0x175   : > { %1158 = vrot.lane.b32.xlu1 %v2431_v21, %s2206_s12 }
 0x176   : > { %1156 = vrot.lane.b32.xlu0 %v2434_v22, %s2206_s12 }
 0x177   : > { %v1260_v33 = vpop.permute.xlu1 %1259  ;;  %v1258_v34 = vpop.permute.xlu0 %1257 }
 0x178   : > { %1342 = vst.msk [vmem:[#allocation2 + $0x47] sm:$0xff] %vm1333_vm1, %v1260_v33 }
 0x179   : > { %1341 = vst.msk [vmem:[#allocation2 + $0x3f] sm:$0xfe] %vm1331_vm15, %v1258_v34  ;;  %781 = vrot.lane.b32.xlu1 %v2431_v21, %s2203_s26 }
 0x17a   : > { %779 = vrot.lane.b32.xlu0 %v2434_v22, %s2203_s26 }
 0x17b   : > { %v891_v35 = vpop.permute.xlu1 %890  ;;  %v889_v36 = vpop.permute.xlu0 %888 }
 0x17c   : > { %977 = vst.msk [vmem:[#allocation2 + $0x57] sm:$0xff] %vm966_vm11, %v891_v35 }
 0x17d   : > { %976 = vst.msk [vmem:[#allocation2 + $0x4f] sm:$0xfe] %vm964_vm10, %v889_v36  ;;  %1279 = vrot.lane.b32.xlu1 %v2431_v21, %s2207_s15  ;;  %v267_v36 = vld [vmem:[%s2328_s22 + $0xf8] sm:$0xff] }
 0x17e   : > { %1277 = vrot.lane.b32.xlu0 %v2434_v22, %s2207_s15 }
 0x17f   : > { %v1021_v5 = vpop.permute.xlu1 %1020  ;;  %v1019_v6 = vpop.permute.xlu0 %1018  ;;  %v1372_v13 = vld [vmem:[#allocation2 + $0x48] sm:$0xff] }
 0x180   : > { %v1371_v37 = vld [vmem:[#allocation2 + $0x40] sm:$0xff]  ;;  %1101 = vst.msk [vmem:[#allocation2 + $0x59] sm:$0x7f] %vm1090_vm14, %v1021_v5  ;;  %v266_v5 = vld [vmem:[%s2328_s22 + $0xf0] sm:$0xff]  ;;  %s3338_s22 = scalar_lea.vmem %s3409_s5, %s2027_s19 }
 0x181   : > { %1100 = vst.msk [vmem:[#allocation2 + $0x51] sm:$0xff] %vm1088_vm12, %v1019_v6  ;;  %2124 = vmatprep.mubr.msk.f32.mxu0 %vm268_vm0, %v1371_v37  ;;  %910 = vrot.lane.b32.xlu1 %v2431_v21, %s2204_s27 }
 0x182   : > { %908 = vrot.lane.b32.xlu0 %v2434_v22, %s2204_s27  ;;  %2125 = vmatmul.mubr.msk.f32.gmra.mrb[8].mxu0 %vm268_vm0, %v1372_v13  ;;  %1726 = vst.msk [vmem:[%s3338_s22] sm:$0xff] %vm1725_vm2, %v2199_v0 }
 0x183   : > { %v636_v14 = vpop.permute.xlu1 %635  ;;  %v634_v38 = vpop.permute.xlu0 %633 }
 0x184   : > { %720 = vst.msk [vmem:[#allocation2 + $0x69] sm:$0x7f] %vm707_vm7, %v636_v14 }
 0x185   : > { %719 = vst.msk [vmem:[#allocation2 + $0x61] sm:$0xff] %vm705_vm8, %v634_v38  ;;  %1040 = vrot.lane.b32.xlu1 %v2443_v23, %s2205_s7 }
 0x186   : > { %1038 = vrot.lane.b32.xlu0 %v2446_v24, %s2205_s7 }
 0x187   : > { %v1143_v39 = vpop.permute.xlu1 %1142  ;;  %v1141_v40 = vpop.permute.xlu0 %1140 }
 0x188   : > { %1222 = vst.msk [vmem:[#allocation2 + $0x58] sm:$0xff] %vm1210_vm13, %v1143_v39  ;;  %1221 = vst.msk [vmem:[#allocation2 + $0x50] sm:$0xff] %vm1210_vm13, %v1141_v40 }
 0x189   : > { %655 = vrot.lane.b32.xlu1 %v2443_v23, %s2202_s25 }
 0x18a   : > { %653 = vrot.lane.b32.xlu0 %v2446_v24, %s2202_s25 }
 0x18b   : > { %v766_v21 = vpop.permute.xlu1 %765  ;;  %v764_v22 = vpop.permute.xlu0 %763 }
 0x18c   : > { %849 = vst.msk [vmem:[#allocation2 + $0x68] sm:$0xff] %vm835_vm9, %v766_v21  ;;  %848 = vst.msk [vmem:[#allocation2 + $0x60] sm:$0xff] %vm835_vm9, %v764_v22 }
 0x18d   : > { %1162 = vrot.lane.b32.xlu1 %v2443_v23, %s2206_s12 }
 0x18e   : > { %1160 = vrot.lane.b32.xlu0 %v2446_v24, %s2206_s12 }
 0x18f   : > { %v1264_v41 = vpop.permute.xlu1 %1263  ;;  %v1262_v42 = vpop.permute.xlu0 %1261 }
 0x190   : > { %1344 = vst.msk [vmem:[#allocation2 + $0x57] sm:$0xff] %vm1333_vm1, %v1264_v41 }
 0x191   : > { %1343 = vst.msk [vmem:[#allocation2 + $0x4f] sm:$0xfe] %vm1331_vm15, %v1262_v42  ;;  %785 = vrot.lane.b32.xlu1 %v2443_v23, %s2203_s26 }
 0x192   : > { %783 = vrot.lane.b32.xlu0 %v2446_v24, %s2203_s26 }
 0x193   : > { %v895_v43 = vpop.permute.xlu1 %894  ;;  %v893_v44 = vpop.permute.xlu0 %892 }
 0x194   : > { %979 = vst.msk [vmem:[#allocation2 + $0x67] sm:$0xff] %vm966_vm11, %v895_v43 }
 0x195   : > { %978 = vst.msk [vmem:[#allocation2 + $0x5f] sm:$0xfe] %vm964_vm10, %v893_v44  ;;  %1283 = vrot.lane.b32.xlu1 %v2443_v23, %s2207_s15 }
 0x196   : > { %1281 = vrot.lane.b32.xlu0 %v2446_v24, %s2207_s15 }
 0x197   : > { %v1025_v45 = vpop.permute.xlu1 %1024  ;;  %v1374_v8 = vld [vmem:[#allocation2 + $0x58] sm:$0xff] }
 0x198   : > { %v1023_v46 = vpop.permute.xlu0 %1022  ;;  %v1373_v7 = vld [vmem:[#allocation2 + $0x50] sm:$0xff]  ;;  %1103 = vst.msk [vmem:[#allocation2 + $0x69] sm:$0x7f] %vm1090_vm14, %v1025_v45 }
 0x199   : > { %1102 = vst.msk [vmem:[#allocation2 + $0x61] sm:$0xff] %vm1088_vm12, %v1023_v46  ;;  %2127 = vmatprep.mubr.msk.f32.mxu0 %vm268_vm0, %v1373_v7  ;;  %914 = vrot.lane.b32.xlu1 %v2443_v23, %s2204_s27 }
 0x19a   : > { %912 = vrot.lane.b32.xlu0 %v2446_v24, %s2204_s27  ;;  %2128 = vmatmul.mubr.msk.f32.gmra.mrb[10].mxu0 %vm268_vm0, %v1374_v8 }
 0x19b   : > { %v640_v47 = vpop.permute.xlu1 %639 }
 0x19c   : > { %v638_v48 = vpop.permute.xlu0 %637  ;;  %722 = vst.msk [vmem:[#allocation2 + $0x79] sm:$0x7f] %vm707_vm7, %v640_v47 }
 0x19d   : > { %721 = vst.msk [vmem:[#allocation2 + $0x71] sm:$0xff] %vm705_vm8, %v638_v48  ;;  %1044 = vrot.lane.b32.xlu1 %v2449_v25, %s2205_s7 }
 0x19e   : > { %1042 = vrot.lane.b32.xlu0 %v2462_v26, %s2205_s7 }
 0x19f   : > { %v1147_v49 = vpop.permute.xlu1 %1146 }
 0x1a0   : > { %v1145_v15 = vpop.permute.xlu0 %1144  ;;  %1224 = vst.msk [vmem:[#allocation2 + $0x68] sm:$0xff] %vm1210_vm13, %v1147_v49 }
 0x1a1   : > { %1223 = vst.msk [vmem:[#allocation2 + $0x60] sm:$0xff] %vm1210_vm13, %v1145_v15  ;;  %659 = vrot.lane.b32.xlu1 %v2449_v25, %s2202_s25 }
 0x1a2   : > { %657 = vrot.lane.b32.xlu0 %v2462_v26, %s2202_s25 }
 0x1a3   : > { %v770_v23 = vpop.permute.xlu1 %769 }
 0x1a4   : > { %v768_v24 = vpop.permute.xlu0 %767  ;;  %851 = vst.msk [vmem:[#allocation2 + $0x78] sm:$0xff] %vm835_vm9, %v770_v23 }
 0x1a5   : > { %850 = vst.msk [vmem:[#allocation2 + $0x70] sm:$0xff] %vm835_vm9, %v768_v24  ;;  %1166 = vrot.lane.b32.xlu1 %v2449_v25, %s2206_s12 }
 0x1a6   : > { %1164 = vrot.lane.b32.xlu0 %v2462_v26, %s2206_s12 }
 0x1a7   : > { %v1268_v16 = vpop.permute.xlu1 %1267 }
 0x1a8   : > { %v1266_v50 = vpop.permute.xlu0 %1265  ;;  %1346 = vst.msk [vmem:[#allocation2 + $0x67] sm:$0xff] %vm1333_vm1, %v1268_v16 }
 0x1a9   : > { %1345 = vst.msk [vmem:[#allocation2 + $0x5f] sm:$0xfe] %vm1331_vm15, %v1266_v50  ;;  %789 = vrot.lane.b32.xlu1 %v2449_v25, %s2203_s26 }
 0x1aa   : > { %787 = vrot.lane.b32.xlu0 %v2462_v26, %s2203_s26 }
 0x1ab   : > { %v899_v51 = vpop.permute.xlu1 %898 }
 0x1ac   : > { %v897_v52 = vpop.permute.xlu0 %896  ;;  %981 = vst.msk [vmem:[#allocation2 + $0x77] sm:$0xff] %vm966_vm11, %v899_v51 }
 0x1ad   : > { %980 = vst.msk [vmem:[#allocation2 + $0x6f] sm:$0xfe] %vm964_vm10, %v897_v52  ;;  %1287 = vrot.lane.b32.xlu1 %v2449_v25, %s2207_s15 }
 0x1ae   : > { %1285 = vrot.lane.b32.xlu0 %v2462_v26, %s2207_s15 }
 0x1af   : > { %v1029_v53 = vpop.permute.xlu1 %1028  ;;  %v1376_v56 = vld [vmem:[#allocation2 + $0x68] sm:$0xff] }
 0x1b0   : > { %v1027_v54 = vpop.permute.xlu0 %1026  ;;  %v1375_v55 = vld [vmem:[#allocation2 + $0x60] sm:$0xff]  ;;  %1105 = vst.msk [vmem:[#allocation2 + $0x79] sm:$0x7f] %vm1090_vm14, %v1029_v53 }
 0x1b1   : > { %1104 = vst.msk [vmem:[#allocation2 + $0x71] sm:$0xff] %vm1088_vm12, %v1027_v54  ;;  %2130 = vmatprep.mubr.msk.f32.mxu0 %vm268_vm0, %v1375_v55  ;;  %918 = vrot.lane.b32.xlu1 %v2449_v25, %s2204_s27 }
 0x1b2   : > { %916 = vrot.lane.b32.xlu0 %v2462_v26, %s2204_s27  ;;  %2131 = vmatmul.mubr.msk.f32.gmra.mrb[12].mxu0 %vm268_vm0, %v1376_v56 }
 0x1b3   : > { %v644_v9 = vpop.permute.xlu1 %643 }
 0x1b4   : > { %v642_v10 = vpop.permute.xlu0 %641  ;;  %724 = vst.msk [vmem:[#allocation2 + $0x89] sm:$0x7f] %vm707_vm7, %v644_v9 }
 0x1b5   : > { %723 = vst.msk [vmem:[#allocation2 + $0x81] sm:$0xff] %vm705_vm8, %v642_v10  ;;  %1048 = vrot.lane.b32.xlu1 %v2465_v27, %s2205_s7 }
 0x1b6   : > { %1046 = vrot.lane.b32.xlu0 %v2474_v28, %s2205_s7 }
 0x1b7   : > { %v1151_v57 = vpop.permute.xlu1 %1150 }
 0x1b8   : > { %v1149_v58 = vpop.permute.xlu0 %1148  ;;  %1226 = vst.msk [vmem:[#allocation2 + $0x78] sm:$0xff] %vm1210_vm13, %v1151_v57 }
 0x1b9   : > { %1225 = vst.msk [vmem:[#allocation2 + $0x70] sm:$0xff] %vm1210_vm13, %v1149_v58  ;;  %663 = vrot.lane.b32.xlu1 %v2465_v27, %s2202_s25 }
 0x1ba   : > { %661 = vrot.lane.b32.xlu0 %v2474_v28, %s2202_s25 }
 0x1bb   : > { %v774_v25 = vpop.permute.xlu1 %773 }
 0x1bc   : > { %v772_v26 = vpop.permute.xlu0 %771  ;;  %853 = vst.msk [vmem:[#allocation2 + $0x88] sm:$0xff] %vm835_vm9, %v774_v25 }
 0x1bd   : > { %852 = vst.msk [vmem:[#allocation2 + $0x80] sm:$0xff] %vm835_vm9, %v772_v26  ;;  %1170 = vrot.lane.b32.xlu1 %v2465_v27, %s2206_s12 }
 0x1be   : > { %1168 = vrot.lane.b32.xlu0 %v2474_v28, %s2206_s12 }
 0x1bf   : > { %v1272_v59 = vpop.permute.xlu1 %1271 }
 0x1c0   : > { %v1270_v17 = vpop.permute.xlu0 %1269  ;;  %1348 = vst.msk [vmem:[#allocation2 + $0x77] sm:$0xff] %vm1333_vm1, %v1272_v59 }
 0x1c1   : > { %1347 = vst.msk [vmem:[#allocation2 + $0x6f] sm:$0xfe] %vm1331_vm15, %v1270_v17  ;;  %793 = vrot.lane.b32.xlu1 %v2465_v27, %s2203_s26 }
 0x1c2   : > { %791 = vrot.lane.b32.xlu0 %v2474_v28, %s2203_s26 }
 0x1c3   : > { %v903_v18 = vpop.permute.xlu1 %902 }
 0x1c4   : > { %v901_v60 = vpop.permute.xlu0 %900  ;;  %983 = vst.msk [vmem:[#allocation2 + $0x87] sm:$0xff] %vm966_vm11, %v903_v18 }
 0x1c5   : > { %982 = vst.msk [vmem:[#allocation2 + $0x7f] sm:$0xfe] %vm964_vm10, %v901_v60  ;;  %1291 = vrot.lane.b32.xlu1 %v2465_v27, %s2207_s15 }
 0x1c6   : > { %1289 = vrot.lane.b32.xlu0 %v2474_v28, %s2207_s15 }
 0x1c7   : > { %v1033_v61 = vpop.permute.xlu1 %1032  ;;  %v1378_v1 = vld [vmem:[#allocation2 + $0x78] sm:$0xff] }
 0x1c8   : > { %v1031_v62 = vpop.permute.xlu0 %1030  ;;  %v1377_v63 = vld [vmem:[#allocation2 + $0x70] sm:$0xff]  ;;  %1107 = vst.msk [vmem:[#allocation2 + $0x89] sm:$0x7f] %vm1090_vm14, %v1033_v61 }
 0x1c9   : > { %1106 = vst.msk [vmem:[#allocation2 + $0x81] sm:$0xff] %vm1088_vm12, %v1031_v62  ;;  %2133 = vmatprep.mubr.msk.f32.mxu0 %vm268_vm0, %v1377_v63  ;;  %922 = vrot.lane.b32.xlu1 %v2465_v27, %s2204_s27 }
 0x1ca   : > { %920 = vrot.lane.b32.xlu0 %v2474_v28, %s2204_s27  ;;  %2134 = vmatmul.mubr.msk.f32.gmra.mrb[14].mxu0 %vm268_vm0, %v1378_v1 }
 0x1cb   : > { %v648_v11 = vpop.permute.xlu1 %647 }
 0x1cc   : > { %v646_v2 = vpop.permute.xlu0 %645  ;;  %726 = vst.msk [vmem:[#allocation2 + $0x99] sm:$0x7f] %vm707_vm7, %v648_v11 }
 0x1cd   : > { %725 = vst.msk [vmem:[#allocation2 + $0x91] sm:$0xff] %vm705_vm8, %v646_v2  ;;  %1052 = vrot.lane.b32.xlu1 %v2477_v29, %s2205_s7 }
 0x1ce   : > { %1050 = vrot.lane.b32.xlu0 %v2480_v30, %s2205_s7 }
 0x1cf   : > { %v1155_v12 = vpop.permute.xlu1 %1154 }
 0x1d0   : > { %v1153_v3 = vpop.permute.xlu0 %1152  ;;  %1228 = vst.msk [vmem:[#allocation2 + $0x88] sm:$0xff] %vm1210_vm13, %v1155_v12 }
 0x1d1   : > { %1227 = vst.msk [vmem:[#allocation2 + $0x80] sm:$0xff] %vm1210_vm13, %v1153_v3  ;;  %667 = vrot.lane.b32.xlu1 %v2477_v29, %s2202_s25 }
 0x1d2   : > { %665 = vrot.lane.b32.xlu0 %v2480_v30, %s2202_s25 }
 0x1d3   : > { %v778_v27 = vpop.permute.xlu1 %777 }
 0x1d4   : > { %v776_v28 = vpop.permute.xlu0 %775  ;;  %855 = vst.msk [vmem:[#allocation2 + $0x98] sm:$0xff] %vm835_vm9, %v778_v27 }
 0x1d5   : > { %854 = vst.msk [vmem:[#allocation2 + $0x90] sm:$0xff] %vm835_vm9, %v776_v28  ;;  %1174 = vrot.lane.b32.xlu1 %v2477_v29, %s2206_s12 }
 0x1d6   : > { %1172 = vrot.lane.b32.xlu0 %v2480_v30, %s2206_s12 }
 0x1d7   : > { %v1276_v4 = vpop.permute.xlu1 %1275 }
 0x1d8   : > { %v1274_v31 = vpop.permute.xlu0 %1273  ;;  %1350 = vst.msk [vmem:[#allocation2 + $0x87] sm:$0xff] %vm1333_vm1, %v1276_v4 }
 0x1d9   : > { %1349 = vst.msk [vmem:[#allocation2 + $0x7f] sm:$0xfe] %vm1331_vm15, %v1274_v31  ;;  %797 = vrot.lane.b32.xlu1 %v2477_v29, %s2203_s26 }
 0x1da   : > { %795 = vrot.lane.b32.xlu0 %v2480_v30, %s2203_s26 }
 0x1db   : > { %v907_v32 = vpop.permute.xlu1 %906 }
 0x1dc   : > { %v905_v19 = vpop.permute.xlu0 %904  ;;  %985 = vst.msk [vmem:[#allocation2 + $0x97] sm:$0xff] %vm966_vm11, %v907_v32 }
 0x1dd   : > { %984 = vst.msk [vmem:[#allocation2 + $0x8f] sm:$0xfe] %vm964_vm10, %v905_v19  ;;  %1295 = vrot.lane.b32.xlu1 %v2477_v29, %s2207_s15 }
 0x1de   : > { %1293 = vrot.lane.b32.xlu0 %v2480_v30, %s2207_s15 }
 0x1df   : > { %v1037_v20 = vpop.permute.xlu1 %1036  ;;  %v1380_v35 = vld [vmem:[#allocation2 + $0x88] sm:$0xff] }
 0x1e0   : > { %v1035_v33 = vpop.permute.xlu0 %1034  ;;  %v1379_v34 = vld [vmem:[#allocation2 + $0x80] sm:$0xff]  ;;  %1109 = vst.msk [vmem:[#allocation2 + $0x99] sm:$0x7f] %vm1090_vm14, %v1037_v20 }
 0x1e1   : > { %1108 = vst.msk [vmem:[#allocation2 + $0x91] sm:$0xff] %vm1088_vm12, %v1035_v33  ;;  %2136 = vmatprep.mubr.msk.f32.mxu1 %vm268_vm0, %v1379_v34  ;;  %926 = vrot.lane.b32.xlu1 %v2477_v29, %s2204_s27 }
 0x1e2   : > { %924 = vrot.lane.b32.xlu0 %v2480_v30, %s2204_s27  ;;  %2137 = vmatmul.mubr.msk.f32.vlgmr.msra.gmra.mrb[0].mxu1 %vm268_vm0, %v1380_v35 }
 0x1e3   : > { %v652_v6 = vpop.permute.xlu1 %651 }
 0x1e4   : > { %v650_v37 = vpop.permute.xlu0 %649  ;;  %728 = vst.msk [vmem:[#allocation2 + $0xa9] sm:$0x7f] %vm707_vm7, %v652_v6 }
 0x1e5   : > { %727 = vst.msk [vmem:[#allocation2 + $0xa1] sm:$0xff] %vm705_vm8, %v650_v37  ;;  %1056 = vrot.lane.b32.xlu1 %v267_v36, %s2205_s7 }
 0x1e6   : > { %1054 = vrot.lane.b32.xlu0 %v266_v5, %s2205_s7 }
 0x1e7   : > { %v1159_v13 = vpop.permute.xlu1 %1158 }
 0x1e8   : > { %v1157_v14 = vpop.permute.xlu0 %1156  ;;  %1230 = vst.msk [vmem:[#allocation2 + $0x98] sm:$0xff] %vm1210_vm13, %v1159_v13 }
 0x1e9   : > { %1229 = vst.msk [vmem:[#allocation2 + $0x90] sm:$0xff] %vm1210_vm13, %v1157_v14  ;;  %1178 = vrot.lane.b32.xlu1 %v267_v36, %s2206_s12 }
 0x1ea   : > { %1176 = vrot.lane.b32.xlu0 %v266_v5, %s2206_s12 }
 0x1eb   : > { %v782_v29 = vpop.permute.xlu1 %781 }
 0x1ec   : > { %v780_v30 = vpop.permute.xlu0 %779  ;;  %857 = vst.msk [vmem:[#allocation2 + $0xa8] sm:$0xff] %vm835_vm9, %v782_v29 }
 0x1ed   : > { %856 = vst.msk [vmem:[#allocation2 + $0xa0] sm:$0xff] %vm835_vm9, %v780_v30  ;;  %1299 = vrot.lane.b32.xlu1 %v267_v36, %s2207_s15 }
 0x1ee   : > { %1297 = vrot.lane.b32.xlu0 %v266_v5, %s2207_s15 }
 0x1ef   : > { %v1280_v38 = vpop.permute.xlu1 %1279 }
 0x1f0   : > { %v1278_v39 = vpop.permute.xlu0 %1277  ;;  %1352 = vst.msk [vmem:[#allocation2 + $0x97] sm:$0xff] %vm1333_vm1, %v1280_v38 }
 0x1f1   : > { %1351 = vst.msk [vmem:[#allocation2 + $0x8f] sm:$0xfe] %vm1331_vm15, %v1278_v39  ;;  %671 = vrot.lane.b32.xlu1 %v267_v36, %s2202_s25 }
 0x1f2   : > { %669 = vrot.lane.b32.xlu0 %v266_v5, %s2202_s25 }
 0x1f3   : > { %v911_v40 = vpop.permute.xlu1 %910 }
 0x1f4   : > { %v909_v21 = vpop.permute.xlu0 %908  ;;  %987 = vst.msk [vmem:[#allocation2 + $0xa7] sm:$0xff] %vm966_vm11, %v911_v40 }
 0x1f5   : > { %986 = vst.msk [vmem:[#allocation2 + $0x9f] sm:$0xfe] %vm964_vm10, %v909_v21  ;;  %801 = vrot.lane.b32.xlu1 %v267_v36, %s2203_s26 }
 0x1f6   : > { %799 = vrot.lane.b32.xlu0 %v266_v5, %s2203_s26 }
 0x1f7   : > { %v1041_v22 = vpop.permute.xlu1 %1040  ;;  %v1382_v43 = vld [vmem:[#allocation2 + $0x98] sm:$0xff] }
 0x1f8   : > { %v1039_v41 = vpop.permute.xlu0 %1038  ;;  %v1381_v42 = vld [vmem:[#allocation2 + $0x90] sm:$0xff]  ;;  %1111 = vst.msk [vmem:[#allocation2 + $0xa9] sm:$0x7f] %vm1090_vm14, %v1041_v22 }
 0x1f9   : > { %1110 = vst.msk [vmem:[#allocation2 + $0xa1] sm:$0xff] %vm1088_vm12, %v1039_v41  ;;  %2139 = vmatprep.mubr.msk.f32.mxu1 %vm268_vm0, %v1381_v42  ;;  %v2114_v44 = vpop.f32.mrb[0].mxu0  ;;  %930 = vrot.lane.b32.xlu1 %v267_v36, %s2204_s27 }
 0x1fa   : > { %928 = vrot.lane.b32.xlu0 %v266_v5, %s2204_s27  ;;  %v1728_v45 = vsel %vm1725_vm2, %v2114_v44, 0.0  ;;  %v1799_v46 = vmul.f32 %v2114_v44, %v2114_v44  ;;  %1901 = vst.msk [vmem:[%s3184_s3 + $0x8] sm:$0xff] %vm1725_vm2, %v2114_v44  ;;  %v1566_v7 = vpop.f32.mrb[1].mxu0  ;;  %2140 = vmatmul.mubr.msk.f32.gmra.mrb[2].mxu1 %vm268_vm0, %v1382_v43 }
 0x1fb   : > { %v1727_v8 = vsel %vm1725_vm2, %v1566_v7, 0.0  ;;  %v1798_v47 = vmul.f32 %v1566_v7, %v1566_v7  ;;  %1900 = vst.msk [vmem:[%s3184_s3] sm:$0xff] %vm1725_vm2, %v1566_v7  ;;  %v656_v48 = vpop.permute.xlu1 %655 }
 0x1fc   : > { %v654_v49 = vpop.permute.xlu0 %653  ;;  %v1831_v15 = vsel %vm1725_vm2, %v1799_v46, 0.0  ;;  %v1729_v23 = vadd.f32 %v1728_v45, %v1727_v8  ;;  %730 = vst.msk [vmem:[#allocation2 + $0xb9] sm:$0x7f] %vm707_vm7, %v656_v48 }
 0x1fd   : > { %729 = vst.msk [vmem:[#allocation2 + $0xb1] sm:$0xff] %vm705_vm8, %v654_v49  ;;  %v1830_v24 = vsel %vm1725_vm2, %v1798_v47, 0.0 }
 0x1fe   : > { %v1832_v16 = vadd.f32 %v1831_v15, %v1830_v24 }
 0x1ff   : > { %v1163_v50 = vpop.permute.xlu1 %1162 }
 0x200   : > { %v1161_v51 = vpop.permute.xlu0 %1160  ;;  %1232 = vst.msk [vmem:[#allocation2 + $0xa8] sm:$0xff] %vm1210_vm13, %v1163_v50 }
 0x201   : > { %1231 = vst.msk [vmem:[#allocation2 + $0xa0] sm:$0xff] %vm1210_vm13, %v1161_v51 }
 0x203   : > { %v786_v52 = vpop.permute.xlu1 %785 }
 0x204   : > { %v784_v53 = vpop.permute.xlu0 %783  ;;  %859 = vst.msk [vmem:[#allocation2 + $0xb8] sm:$0xff] %vm835_vm9, %v786_v52 }
 0x205   : > { %858 = vst.msk [vmem:[#allocation2 + $0xb0] sm:$0xff] %vm835_vm9, %v784_v53 }
 0x207   : > { %v1284_v54 = vpop.permute.xlu1 %1283 }
 0x208   : > { %v1282_v55 = vpop.permute.xlu0 %1281  ;;  %1354 = vst.msk [vmem:[#allocation2 + $0xa7] sm:$0xff] %vm1333_vm1, %v1284_v54 }
 0x209   : > { %1353 = vst.msk [vmem:[#allocation2 + $0x9f] sm:$0xfe] %vm1331_vm15, %v1282_v55 }
 0x20b   : > { %v915_v56 = vpop.permute.xlu1 %914 }
 0x20c   : > { %v913_v9 = vpop.permute.xlu0 %912  ;;  %989 = vst.msk [vmem:[#allocation2 + $0xb7] sm:$0xff] %vm966_vm11, %v915_v56 }
 0x20d   : > { %988 = vst.msk [vmem:[#allocation2 + $0xaf] sm:$0xfe] %vm964_vm10, %v913_v9  ;;  %v2117_v10 = vpop.f32.mrb[2].mxu0 }
 0x20e   : > { %1903 = vst.msk [vmem:[%s3184_s3 + $0x18] sm:$0xff] %vm1725_vm2, %v2117_v10  ;;  %v1576_v57 = vpop.f32.mrb[3].mxu0  ;;  %v1801_v58 = vmul.f32 %v2117_v10, %v2117_v10  ;;  %v1732_v62 = vsel %vm1725_vm2, %v2117_v10, 0.0 }
 0x20f   : > { %v1730_v25 = vsel %vm1725_vm2, %v1576_v57, 0.0  ;;  %v1800_v26 = vmul.f32 %v1576_v57, %v1576_v57  ;;  %1902 = vst.msk [vmem:[%s3184_s3 + $0x10] sm:$0xff] %vm1725_vm2, %v1576_v57  ;;  %v1045_v59 = vpop.permute.xlu1 %1044  ;;  %v1384_v60 = vld [vmem:[#allocation2 + $0xa8] sm:$0xff] }
 0x210   : > { %v1043_v17 = vpop.permute.xlu0 %1042  ;;  %v1383_v18 = vld [vmem:[#allocation2 + $0xa0] sm:$0xff]  ;;  %v1731_v61 = vadd.f32 %v1730_v25, %v1729_v23  ;;  %1113 = vst.msk [vmem:[#allocation2 + $0xb9] sm:$0x7f] %vm1090_vm14, %v1045_v59  ;;  %v1835_v2 = vsel %vm1725_vm2, %v1801_v58, 0.0 }
 0x211   : > { %1112 = vst.msk [vmem:[#allocation2 + $0xb1] sm:$0xff] %vm1088_vm12, %v1043_v17  ;;  %2142 = vmatprep.mubr.msk.f32.mxu1 %vm268_vm0, %v1383_v18  ;;  %v1833_v63 = vsel %vm1725_vm2, %v1800_v26, 0.0 }
 0x212   : > { %2143 = vmatmul.mubr.msk.f32.gmra.mrb[4].mxu1 %vm268_vm0, %v1384_v60  ;;  %v1834_v1 = vadd.f32 %v1833_v63, %v1832_v16  ;;  %v1733_v11 = vadd.f32 %v1732_v62, %v1731_v61 }
 0x213   : > { %v660_v12 = vpop.permute.xlu1 %659 }
 0x214   : > { %v658_v3 = vpop.permute.xlu0 %657  ;;  %732 = vst.msk [vmem:[#allocation2 + $0xc9] sm:$0x7f] %vm707_vm7, %v660_v12  ;;  %v1836_v27 = vadd.f32 %v1835_v2, %v1834_v1 }
 0x215   : > { %731 = vst.msk [vmem:[#allocation2 + $0xc1] sm:$0xff] %vm705_vm8, %v658_v3 }
 0x217   : > { %v1167_v28 = vpop.permute.xlu1 %1166 }
 0x218   : > { %v1165_v4 = vpop.permute.xlu0 %1164  ;;  %1234 = vst.msk [vmem:[#allocation2 + $0xb8] sm:$0xff] %vm1210_vm13, %v1167_v28 }
 0x219   : > { %1233 = vst.msk [vmem:[#allocation2 + $0xb0] sm:$0xff] %vm1210_vm13, %v1165_v4 }
 0x21b   : > { %v790_v31 = vpop.permute.xlu1 %789 }
 0x21c   : > { %v788_v32 = vpop.permute.xlu0 %787  ;;  %861 = vst.msk [vmem:[#allocation2 + $0xc8] sm:$0xff] %vm835_vm9, %v790_v31 }
 0x21d   : > { %860 = vst.msk [vmem:[#allocation2 + $0xc0] sm:$0xff] %vm835_vm9, %v788_v32 }
 0x21f   : > { %v1288_v19 = vpop.permute.xlu1 %1287 }
 0x220   : > { %v1286_v20 = vpop.permute.xlu0 %1285  ;;  %1356 = vst.msk [vmem:[#allocation2 + $0xb7] sm:$0xff] %vm1333_vm1, %v1288_v19 }
 0x221   : > { %1355 = vst.msk [vmem:[#allocation2 + $0xaf] sm:$0xfe] %vm1331_vm15, %v1286_v20 }
 0x223   : > { %v919_v33 = vpop.permute.xlu1 %918 }
 0x224   : > { %v917_v34 = vpop.permute.xlu0 %916  ;;  %991 = vst.msk [vmem:[#allocation2 + $0xc7] sm:$0xff] %vm966_vm11, %v919_v33 }
 0x225   : > { %990 = vst.msk [vmem:[#allocation2 + $0xbf] sm:$0xfe] %vm964_vm10, %v917_v34  ;;  %v2120_v35 = vpop.f32.mrb[4].mxu0 }
 0x226   : > { %1905 = vst.msk [vmem:[%s3184_s3 + $0x28] sm:$0xff] %vm1725_vm2, %v2120_v35  ;;  %v1586_v36 = vpop.f32.mrb[5].mxu0  ;;  %v1803_v5 = vmul.f32 %v2120_v35, %v2120_v35  ;;  %v1736_v39 = vsel %vm1725_vm2, %v2120_v35, 0.0 }
 0x227   : > { %v1734_v6 = vsel %vm1725_vm2, %v1586_v36, 0.0  ;;  %v1802_v37 = vmul.f32 %v1586_v36, %v1586_v36  ;;  %1904 = vst.msk [vmem:[%s3184_s3 + $0x20] sm:$0xff] %vm1725_vm2, %v1586_v36  ;;  %v1049_v13 = vpop.permute.xlu1 %1048  ;;  %v1386_v30 = vld [vmem:[#allocation2 + $0xb8] sm:$0xff] }
 0x228   : > { %v1047_v14 = vpop.permute.xlu0 %1046  ;;  %v1385_v29 = vld [vmem:[#allocation2 + $0xb0] sm:$0xff]  ;;  %v1735_v38 = vadd.f32 %v1734_v6, %v1733_v11  ;;  %1115 = vst.msk [vmem:[#allocation2 + $0xc9] sm:$0x7f] %vm1090_vm14, %v1049_v13  ;;  %v1839_v41 = vsel %vm1725_vm2, %v1803_v5, 0.0 }
 0x229   : > { %1114 = vst.msk [vmem:[#allocation2 + $0xc1] sm:$0xff] %vm1088_vm12, %v1047_v14  ;;  %2145 = vmatprep.mubr.msk.f32.mxu1 %vm268_vm0, %v1385_v29  ;;  %v1837_v40 = vsel %vm1725_vm2, %v1802_v37, 0.0 }
 0x22a   : > { %2146 = vmatmul.mubr.msk.f32.gmra.mrb[6].mxu1 %vm268_vm0, %v1386_v30  ;;  %v1838_v21 = vadd.f32 %v1837_v40, %v1836_v27  ;;  %v1737_v22 = vadd.f32 %v1736_v39, %v1735_v38 }
 0x22b   : > { %v664_v42 = vpop.permute.xlu1 %663 }
 0x22c   : > { %v662_v43 = vpop.permute.xlu0 %661  ;;  %734 = vst.msk [vmem:[#allocation2 + $0xd9] sm:$0x7f] %vm707_vm7, %v664_v42  ;;  %v1840_v44 = vadd.f32 %v1839_v41, %v1838_v21 }
 0x22d   : > { %733 = vst.msk [vmem:[#allocation2 + $0xd1] sm:$0xff] %vm705_vm8, %v662_v43 }
 0x22f   : > { %v1171_v45 = vpop.permute.xlu1 %1170 }
 0x230   : > { %v1169_v46 = vpop.permute.xlu0 %1168  ;;  %1236 = vst.msk [vmem:[#allocation2 + $0xc8] sm:$0xff] %vm1210_vm13, %v1171_v45 }
 0x231   : > { %1235 = vst.msk [vmem:[#allocation2 + $0xc0] sm:$0xff] %vm1210_vm13, %v1169_v46 }
 0x233   : > { %v794_v7 = vpop.permute.xlu1 %793 }
 0x234   : > { %v792_v8 = vpop.permute.xlu0 %791  ;;  %863 = vst.msk [vmem:[#allocation2 + $0xd8] sm:$0xff] %vm835_vm9, %v794_v7 }
 0x235   : > { %862 = vst.msk [vmem:[#allocation2 + $0xd0] sm:$0xff] %vm835_vm9, %v792_v8 }
 0x237   : > { %v1292_v47 = vpop.permute.xlu1 %1291 }
 0x238   : > { %v1290_v48 = vpop.permute.xlu0 %1289  ;;  %1358 = vst.msk [vmem:[#allocation2 + $0xc7] sm:$0xff] %vm1333_vm1, %v1292_v47 }
 0x239   : > { %1357 = vst.msk [vmem:[#allocation2 + $0xbf] sm:$0xfe] %vm1331_vm15, %v1290_v48 }
 0x23b   : > { %v923_v49 = vpop.permute.xlu1 %922 }
 0x23c   : > { %v921_v15 = vpop.permute.xlu0 %920  ;;  %993 = vst.msk [vmem:[#allocation2 + $0xd7] sm:$0xff] %vm966_vm11, %v923_v49 }
 0x23d   : > { %992 = vst.msk [vmem:[#allocation2 + $0xcf] sm:$0xfe] %vm964_vm10, %v921_v15  ;;  %v2123_v23 = vpop.f32.mrb[6].mxu0 }
 0x23e   : > { %1907 = vst.msk [vmem:[%s3184_s3 + $0x38] sm:$0xff] %vm1725_vm2, %v2123_v23  ;;  %v1596_v24 = vpop.f32.mrb[7].mxu0  ;;  %v1805_v16 = vmul.f32 %v2123_v23, %v2123_v23  ;;  %v1740_v9 = vsel %vm1725_vm2, %v2123_v23, 0.0 }
 0x23f   : > { %v1738_v50 = vsel %vm1725_vm2, %v1596_v24, 0.0  ;;  %v1804_v51 = vmul.f32 %v1596_v24, %v1596_v24  ;;  %1906 = vst.msk [vmem:[%s3184_s3 + $0x30] sm:$0xff] %vm1725_vm2, %v1596_v24  ;;  %v1053_v52 = vpop.permute.xlu1 %1052  ;;  %v1388_v55 = vld [vmem:[#allocation2 + $0xc8] sm:$0xff] }
 0x240   : > { %v1051_v53 = vpop.permute.xlu0 %1050  ;;  %v1387_v54 = vld [vmem:[#allocation2 + $0xc0] sm:$0xff]  ;;  %v1739_v56 = vadd.f32 %v1738_v50, %v1737_v22  ;;  %1117 = vst.msk [vmem:[#allocation2 + $0xd9] sm:$0x7f] %vm1090_vm14, %v1053_v52  ;;  %v1843_v25 = vsel %vm1725_vm2, %v1805_v16, 0.0 }
 0x241   : > { %1116 = vst.msk [vmem:[#allocation2 + $0xd1] sm:$0xff] %vm1088_vm12, %v1051_v53  ;;  %2148 = vmatprep.mubr.msk.f32.mxu1 %vm268_vm0, %v1387_v54  ;;  %v1841_v10 = vsel %vm1725_vm2, %v1804_v51, 0.0 }
 0x242   : > { %2149 = vmatmul.mubr.msk.f32.gmra.mrb[8].mxu1 %vm268_vm0, %v1388_v55  ;;  %v1842_v57 = vadd.f32 %v1841_v10, %v1840_v44  ;;  %v1741_v58 = vadd.f32 %v1740_v9, %v1739_v56 }
 0x243   : > { %v668_v26 = vpop.permute.xlu1 %667 }
 0x244   : > { %v666_v59 = vpop.permute.xlu0 %665  ;;  %736 = vst.msk [vmem:[#allocation2 + $0xe9] sm:$0x7f] %vm707_vm7, %v668_v26  ;;  %v1844_v17 = vadd.f32 %v1843_v25, %v1842_v57 }
 0x245   : > { %735 = vst.msk [vmem:[#allocation2 + $0xe1] sm:$0xff] %vm705_vm8, %v666_v59 }
 0x247   : > { %v1175_v18 = vpop.permute.xlu1 %1174 }
 0x248   : > { %v1173_v60 = vpop.permute.xlu0 %1172  ;;  %1238 = vst.msk [vmem:[#allocation2 + $0xd8] sm:$0xff] %vm1210_vm13, %v1175_v18 }
 0x249   : > { %1237 = vst.msk [vmem:[#allocation2 + $0xd0] sm:$0xff] %vm1210_vm13, %v1173_v60 }
 0x24b   : > { %v798_v61 = vpop.permute.xlu1 %797 }
 0x24c   : > { %v796_v62 = vpop.permute.xlu0 %795  ;;  %865 = vst.msk [vmem:[#allocation2 + $0xe8] sm:$0xff] %vm835_vm9, %v798_v61 }
 0x24d   : > { %864 = vst.msk [vmem:[#allocation2 + $0xe0] sm:$0xff] %vm835_vm9, %v796_v62 }
 0x24f   : > { %v1296_v63 = vpop.permute.xlu1 %1295 }
 0x250   : > { %v1294_v1 = vpop.permute.xlu0 %1293  ;;  %1360 = vst.msk [vmem:[#allocation2 + $0xd7] sm:$0xff] %vm1333_vm1, %v1296_v63 }
 0x251   : > { %1359 = vst.msk [vmem:[#allocation2 + $0xcf] sm:$0xfe] %vm1331_vm15, %v1294_v1 }
 0x253   : > { %v927_v11 = vpop.permute.xlu1 %926 }
 0x254   : > { %v925_v2 = vpop.permute.xlu0 %924  ;;  %995 = vst.msk [vmem:[#allocation2 + $0xe7] sm:$0xff] %vm966_vm11, %v927_v11 }
 0x255   : > { %994 = vst.msk [vmem:[#allocation2 + $0xdf] sm:$0xfe] %vm964_vm10, %v925_v2  ;;  %v2126_v12 = vpop.f32.mrb[8].mxu0 }
 0x256   : > { %1909 = vst.msk [vmem:[%s3184_s3 + $0x48] sm:$0xff] %vm1725_vm2, %v2126_v12  ;;  %v1606_v3 = vpop.f32.mrb[9].mxu0  ;;  %v1807_v27 = vmul.f32 %v2126_v12, %v2126_v12  ;;  %v1744_v34 = vsel %vm1725_vm2, %v2126_v12, 0.0 }
 0x257   : > { %v1742_v28 = vsel %vm1725_vm2, %v1606_v3, 0.0  ;;  %v1806_v4 = vmul.f32 %v1606_v3, %v1606_v3  ;;  %1908 = vst.msk [vmem:[%s3184_s3 + $0x40] sm:$0xff] %vm1725_vm2, %v1606_v3  ;;  %v1057_v31 = vpop.permute.xlu1 %1056  ;;  %v1390_v20 = vld [vmem:[#allocation2 + $0xd8] sm:$0xff] }
 0x258   : > { %v1055_v32 = vpop.permute.xlu0 %1054  ;;  %v1389_v19 = vld [vmem:[#allocation2 + $0xd0] sm:$0xff]  ;;  %v1743_v33 = vadd.f32 %v1742_v28, %v1741_v58  ;;  %1119 = vst.msk [vmem:[#allocation2 + $0xe9] sm:$0x7f] %vm1090_vm14, %v1057_v31  ;;  %v1847_v6 = vsel %vm1725_vm2, %v1807_v27, 0.0 }
 0x259   : > { %1118 = vst.msk [vmem:[#allocation2 + $0xe1] sm:$0xff] %vm1088_vm12, %v1055_v32  ;;  %2151 = vmatprep.mubr.msk.f32.mxu1 %vm268_vm0, %v1389_v19  ;;  %v1845_v35 = vsel %vm1725_vm2, %v1806_v4, 0.0 }
 0x25a   : > { %2152 = vmatmul.mubr.msk.f32.gmra.mrb[10].mxu1 %vm268_vm0, %v1390_v20  ;;  %v1846_v36 = vadd.f32 %v1845_v35, %v1844_v17  ;;  %v1745_v5 = vadd.f32 %v1744_v34, %v1743_v33 }
 0x25b   : > { %v1179_v37 = vpop.permute.xlu1 %1178 }
 0x25c   : > { %v1177_v13 = vpop.permute.xlu0 %1176  ;;  %1240 = vst.msk [vmem:[#allocation2 + $0xe8] sm:$0xff] %vm1210_vm13, %v1179_v37  ;;  %v1848_v14 = vadd.f32 %v1847_v6, %v1846_v36 }
 0x25d   : > { %1239 = vst.msk [vmem:[#allocation2 + $0xe0] sm:$0xff] %vm1210_vm13, %v1177_v13 }
 0x25f   : > { %v1300_v29 = vpop.permute.xlu1 %1299 }
 0x260   : > { %v1298_v30 = vpop.permute.xlu0 %1297  ;;  %1362 = vst.msk [vmem:[#allocation2 + $0xe7] sm:$0xff] %vm1333_vm1, %v1300_v29 }
 0x261   : > { %1361 = vst.msk [vmem:[#allocation2 + $0xdf] sm:$0xfe] %vm1331_vm15, %v1298_v30 }
 0x263   : > { %v672_v38 = vpop.permute.xlu1 %671 }
 0x264   : > { %v670_v39 = vpop.permute.xlu0 %669  ;;  %738 = vst.msk [vmem:[#allocation2 + $0xf9] sm:$0x7f] %vm707_vm7, %v672_v38 }
 0x265   : > { %737 = vst.msk [vmem:[#allocation2 + $0xf1] sm:$0xff] %vm705_vm8, %v670_v39 }
 0x267   : > { %v802_v40 = vpop.permute.xlu1 %801  ;;  %v1392_v41 = vld [vmem:[#allocation2 + $0xe8] sm:$0xff] }
 0x268   : > { %v800_v21 = vpop.permute.xlu0 %799  ;;  %v1391_v22 = vld [vmem:[#allocation2 + $0xe0] sm:$0xff]  ;;  %867 = vst.msk [vmem:[#allocation2 + $0xf8] sm:$0xff] %vm835_vm9, %v802_v40 }
 0x269   : > { %866 = vst.msk [vmem:[#allocation2 + $0xf0] sm:$0xff] %vm835_vm9, %v800_v21  ;;  %2154 = vmatprep.mubr.msk.f32.mxu1 %vm268_vm0, %v1391_v22 }
 0x26a   : > { %2155 = vmatmul.mubr.msk.f32.gmra.mrb[12].mxu1 %vm268_vm0, %v1392_v41 }
 0x26b   : > { %v931_v42 = vpop.permute.xlu1 %930 }
 0x26c   : > { %v929_v43 = vpop.permute.xlu0 %928  ;;  %997 = vst.msk [vmem:[#allocation2 + $0xf7] sm:$0xff] %vm966_vm11, %v931_v42 }
 0x26d   : > { %996 = vst.msk [vmem:[#allocation2 + $0xef] sm:$0xfe] %vm964_vm10, %v929_v43  ;;  %v2129_v44 = vpop.f32.mrb[10].mxu0 }
 0x26e   : > { %1911 = vst.msk [vmem:[%s3184_s3 + $0x58] sm:$0xff] %vm1725_vm2, %v2129_v44  ;;  %v1616_v45 = vpop.f32.mrb[11].mxu0  ;;  %v1809_v46 = vmul.f32 %v2129_v44, %v2129_v44  ;;  %v1748_v48 = vsel %vm1725_vm2, %v2129_v44, 0.0 }
 0x26f   : > { %v1746_v7 = vsel %vm1725_vm2, %v1616_v45, 0.0  ;;  %v1808_v8 = vmul.f32 %v1616_v45, %v1616_v45  ;;  %1910 = vst.msk [vmem:[%s3184_s3 + $0x50] sm:$0xff] %vm1725_vm2, %v1616_v45 }
 0x270   : > { %v1747_v47 = vadd.f32 %v1746_v7, %v1745_v5  ;;  %v1851_v24 = vsel %vm1725_vm2, %v1809_v46, 0.0 }
 0x271   : > { %v1849_v49 = vsel %vm1725_vm2, %v1808_v8, 0.0 }
 0x272   : > { %v1850_v15 = vadd.f32 %v1849_v49, %v1848_v14  ;;  %v1749_v23 = vadd.f32 %v1748_v48, %v1747_v47 }
 0x273   : > { %v1394_v50 = vld [vmem:[#allocation2 + $0xf8] sm:$0xff] }
 0x274   : > { %v1393_v16 = vld [vmem:[#allocation2 + $0xf0] sm:$0xff]  ;;  %v1852_v51 = vadd.f32 %v1851_v24, %v1850_v15 }
 0x275   : > { %2157 = vmatprep.mubr.msk.f32.mxu1 %vm268_vm0, %v1393_v16 }
 0x276   : > { %2158 = vmatmul.mubr.msk.f32.gmra.mrb[14].mxu1 %vm268_vm0, %v1394_v50  ;;  %vm1796_vm0 = vcmask 57344  }
 0x285   : > { %v2132_v52 = vpop.f32.mrb[12].mxu0 }
 0x286   : > { %1913 = vst.msk [vmem:[%s3184_s3 + $0x68] sm:$0xff] %vm1725_vm2, %v2132_v52  ;;  %v1626_v53 = vpop.f32.mrb[13].mxu0  ;;  %v1811_v54 = vmul.f32 %v2132_v52, %v2132_v52  ;;  %v1752_v10 = vsel %vm1725_vm2, %v2132_v52, 0.0 }
 0x287   : > { %v1750_v55 = vsel %vm1725_vm2, %v1626_v53, 0.0  ;;  %v1810_v56 = vmul.f32 %v1626_v53, %v1626_v53  ;;  %1912 = vst.msk [vmem:[%s3184_s3 + $0x60] sm:$0xff] %vm1725_vm2, %v1626_v53 }
 0x288   : > { %v1751_v9 = vadd.f32 %v1750_v55, %v1749_v23  ;;  %v1855_v26 = vsel %vm1725_vm2, %v1811_v54, 0.0 }
 0x289   : > { %v1853_v57 = vsel %vm1725_vm2, %v1810_v56, 0.0 }
 0x28a   : > { %v1854_v58 = vadd.f32 %v1853_v57, %v1852_v51  ;;  %v1753_v25 = vadd.f32 %v1752_v10, %v1751_v9 }
 0x28c   : > { %v1856_v59 = vadd.f32 %v1855_v26, %v1854_v58 }
 0x29d   : > { %v2135_v17 = vpop.f32.mrb[14].mxu0 }
 0x29e   : > { %1915 = vst.msk [vmem:[%s3184_s3 + $0x78] sm:$0xff] %vm1725_vm2, %v2135_v17  ;;  %v1636_v18 = vpop.f32.mrb[15].mxu0  ;;  %v1813_v60 = vmul.f32 %v2135_v17, %v2135_v17  ;;  %v1756_v1 = vsel %vm1725_vm2, %v2135_v17, 0.0 }
 0x29f   : > { %v1754_v61 = vsel %vm1725_vm2, %v1636_v18, 0.0  ;;  %v1812_v62 = vmul.f32 %v1636_v18, %v1636_v18  ;;  %1914 = vst.msk [vmem:[%s3184_s3 + $0x70] sm:$0xff] %vm1725_vm2, %v1636_v18 }
 0x2a0   : > { %v1755_v63 = vadd.f32 %v1754_v61, %v1753_v25  ;;  %v1859_v3 = vsel %vm1725_vm2, %v1813_v60, 0.0 }
 0x2a1   : > { %v1857_v11 = vsel %vm1725_vm2, %v1812_v62, 0.0 }
 0x2a2   : > { %v1757_v2 = vadd.f32 %v1756_v1, %v1755_v63  ;;  %v1858_v12 = vadd.f32 %v1857_v11, %v1856_v59 }
 0x2a4   : > { %v1860_v27 = vadd.f32 %v1859_v3, %v1858_v12 }
 0x2b5   : > { %v2138_v28 = vpop.f32.mrb[0].mxu1 }
 0x2b6   : > { %1917 = vst.msk [vmem:[%s3184_s3 + $0x88] sm:$0xff] %vm1725_vm2, %v2138_v28  ;;  %v1646_v4 = vpop.f32.mrb[1].mxu1  ;;  %v1815_v31 = vmul.f32 %v2138_v28, %v2138_v28  ;;  %v1760_v33 = vsel %vm1725_vm2, %v2138_v28, 0.0 }
 0x2b7   : > { %v1758_v32 = vsel %vm1725_vm2, %v1646_v4, 0.0  ;;  %v1814_v19 = vmul.f32 %v1646_v4, %v1646_v4  ;;  %1916 = vst.msk [vmem:[%s3184_s3 + $0x80] sm:$0xff] %vm1725_vm2, %v1646_v4 }
 0x2b8   : > { %v1759_v20 = vadd.f32 %v1758_v32, %v1757_v2  ;;  %v1863_v5 = vsel %vm1725_vm2, %v1815_v31, 0.0 }
 0x2b9   : > { %v1861_v34 = vsel %vm1725_vm2, %v1814_v19, 0.0 }
 0x2ba   : > { %v1862_v35 = vadd.f32 %v1861_v34, %v1860_v27  ;;  %v1761_v36 = vadd.f32 %v1760_v33, %v1759_v20 }
 0x2bc   : > { %v1864_v6 = vadd.f32 %v1863_v5, %v1862_v35 }
 0x2cd   : > { %v2141_v37 = vpop.f32.mrb[2].mxu1 }
 0x2ce   : > { %1919 = vst.msk [vmem:[%s3184_s3 + $0x98] sm:$0xff] %vm1725_vm2, %v2141_v37  ;;  %v1656_v13 = vpop.f32.mrb[3].mxu1  ;;  %v1817_v14 = vmul.f32 %v2141_v37, %v2141_v37  ;;  %v1764_v39 = vsel %vm1725_vm2, %v2141_v37, 0.0 }
 0x2cf   : > { %v1762_v29 = vsel %vm1725_vm2, %v1656_v13, 0.0  ;;  %v1816_v30 = vmul.f32 %v1656_v13, %v1656_v13  ;;  %1918 = vst.msk [vmem:[%s3184_s3 + $0x90] sm:$0xff] %vm1725_vm2, %v1656_v13 }
 0x2d0   : > { %v1763_v38 = vadd.f32 %v1762_v29, %v1761_v36  ;;  %v1867_v41 = vsel %vm1725_vm2, %v1817_v14, 0.0 }
 0x2d1   : > { %v1865_v40 = vsel %vm1725_vm2, %v1816_v30, 0.0 }
 0x2d2   : > { %v1866_v21 = vadd.f32 %v1865_v40, %v1864_v6  ;;  %v1765_v22 = vadd.f32 %v1764_v39, %v1763_v38 }
 0x2d4   : > { %v1868_v0 = vadd.f32 %v1867_v41, %v1866_v21 }
 0x2e5   : > { %v2144_v42 = vpop.f32.mrb[4].mxu1 }
 0x2e6   : > { %1921 = vst.msk [vmem:[%s3184_s3 + $0xa8] sm:$0xff] %vm1725_vm2, %v2144_v42  ;;  %v1666_v43 = vpop.f32.mrb[5].mxu1  ;;  %v1819_v44 = vmul.f32 %v2144_v42, %v2144_v42  ;;  %v1768_v8 = vsel %vm1725_vm2, %v2144_v42, 0.0 }
 0x2e7   : > { %v1766_v45 = vsel %vm1725_vm2, %v1666_v43, 0.0  ;;  %v1818_v46 = vmul.f32 %v1666_v43, %v1666_v43  ;;  %1920 = vst.msk [vmem:[%s3184_s3 + $0xa0] sm:$0xff] %vm1725_vm2, %v1666_v43 }
 0x2e8   : > { %v1767_v7 = vadd.f32 %v1766_v45, %v1765_v22  ;;  %v1871_v15 = vsel %vm1725_vm2, %v1819_v44, 0.0 }
 0x2e9   : > { %v1869_v47 = vsel %vm1725_vm2, %v1818_v46, 0.0 }
 0x2ea   : > { %v1870_v48 = vadd.f32 %v1869_v47, %v1868_v0  ;;  %v1769_v49 = vadd.f32 %v1768_v8, %v1767_v7 }
 0x2ec   : > { %v1872_v23 = vadd.f32 %v1871_v15, %v1870_v48 }
 0x2fd   : > { %v2147_v24 = vpop.f32.mrb[6].mxu1 }
 0x2fe   : > { %1923 = vst.msk [vmem:[%s3184_s3 + $0xb8] sm:$0xff] %vm1725_vm2, %v2147_v24  ;;  %v1676_v16 = vpop.f32.mrb[7].mxu1  ;;  %v1821_v50 = vmul.f32 %v2147_v24, %v2147_v24  ;;  %v1772_v54 = vsel %vm1725_vm2, %v2147_v24, 0.0 }
 0x2ff   : > { %v1770_v51 = vsel %vm1725_vm2, %v1676_v16, 0.0  ;;  %v1820_v52 = vmul.f32 %v1676_v16, %v1676_v16  ;;  %1922 = vst.msk [vmem:[%s3184_s3 + $0xb0] sm:$0xff] %vm1725_vm2, %v1676_v16 }
 0x300   : > { %v1771_v53 = vadd.f32 %v1770_v51, %v1769_v49  ;;  %v1875_v10 = vsel %vm1725_vm2, %v1821_v50, 0.0 }
 0x301   : > { %v1873_v55 = vsel %vm1725_vm2, %v1820_v52, 0.0 }
 0x302   : > { %v1874_v56 = vadd.f32 %v1873_v55, %v1872_v23  ;;  %v1773_v9 = vadd.f32 %v1772_v54, %v1771_v53 }
 0x304   : > { %v1876_v57 = vadd.f32 %v1875_v10, %v1874_v56 }
 0x315   : > { %v2150_v58 = vpop.f32.mrb[8].mxu1 }
 0x316   : > { %1925 = vst.msk [vmem:[%s3184_s3 + $0xc8] sm:$0xff] %vm1725_vm2, %v2150_v58  ;;  %v1686_v25 = vpop.f32.mrb[9].mxu1  ;;  %v1823_v26 = vmul.f32 %v2150_v58, %v2150_v58  ;;  %v1776_v60 = vsel %vm1725_vm2, %v2150_v58, 0.0 }
 0x317   : > { %v1774_v59 = vsel %vm1725_vm2, %v1686_v25, 0.0  ;;  %v1822_v17 = vmul.f32 %v1686_v25, %v1686_v25  ;;  %1924 = vst.msk [vmem:[%s3184_s3 + $0xc0] sm:$0xff] %vm1725_vm2, %v1686_v25 }
 0x318   : > { %v1775_v18 = vadd.f32 %v1774_v59, %v1773_v9  ;;  %v1879_v1 = vsel %vm1725_vm2, %v1823_v26, 0.0 }
 0x319   : > { %v1877_v61 = vsel %vm1725_vm2, %v1822_v17, 0.0 }
 0x31a   : > { %v1878_v62 = vadd.f32 %v1877_v61, %v1876_v57  ;;  %v1777_v63 = vadd.f32 %v1776_v60, %v1775_v18 }
 0x31c   : > { %v1880_v11 = vadd.f32 %v1879_v1, %v1878_v62 }
 0x32d   : > { %v2153_v2 = vpop.f32.mrb[10].mxu1 }
 0x32e   : > { %1927 = vst.msk [vmem:[%s3184_s3 + $0xd8] sm:$0xff] %vm1725_vm2, %v2153_v2  ;;  %v1696_v12 = vpop.f32.mrb[11].mxu1  ;;  %v1825_v3 = vmul.f32 %v2153_v2, %v2153_v2  ;;  %v1780_v31 = vsel %vm1725_vm2, %v2153_v2, 0.0 }
 0x32f   : > { %v1778_v27 = vsel %vm1725_vm2, %v1696_v12, 0.0  ;;  %v1824_v28 = vmul.f32 %v1696_v12, %v1696_v12  ;;  %1926 = vst.msk [vmem:[%s3184_s3 + $0xd0] sm:$0xff] %vm1725_vm2, %v1696_v12 }
 0x330   : > { %v1779_v4 = vadd.f32 %v1778_v27, %v1777_v63  ;;  %v1883_v33 = vsel %vm1725_vm2, %v1825_v3, 0.0 }
 0x331   : > { %v1881_v32 = vsel %vm1725_vm2, %v1824_v28, 0.0 }
 0x332   : > { %v1882_v19 = vadd.f32 %v1881_v32, %v1880_v11  ;;  %v1781_v20 = vadd.f32 %v1780_v31, %v1779_v4 }
 0x334   : > { %v1884_v34 = vadd.f32 %v1883_v33, %v1882_v19 }
 0x33d   : > { %v2156_v35 = vpop.f32.mrb[12].mxu1 }
 0x33e   : > { %1929 = vst.msk [vmem:[%s3184_s3 + $0xe8] sm:$0xff] %vm1725_vm2, %v2156_v35  ;;  %v1706_v36 = vpop.f32.mrb[13].mxu1  ;;  %v1827_v5 = vmul.f32 %v2156_v35, %v2156_v35  ;;  %v1784_v14 = vsel %vm1725_vm2, %v2156_v35, 0.0 }
 0x33f   : > { %v1782_v6 = vsel %vm1725_vm2, %v1706_v36, 0.0  ;;  %v1826_v37 = vmul.f32 %v1706_v36, %v1706_v36  ;;  %1928 = vst.msk [vmem:[%s3184_s3 + $0xe0] sm:$0xff] %vm1725_vm2, %v1706_v36 }
 0x340   : > { %v1783_v13 = vadd.f32 %v1782_v6, %v1781_v20  ;;  %v1887_v39 = vsel %vm1725_vm2, %v1827_v5, 0.0 }
 0x341   : > { %v1885_v29 = vsel %vm1725_vm2, %v1826_v37, 0.0 }
 0x342   : > { %v1886_v30 = vadd.f32 %v1885_v29, %v1884_v34  ;;  %v1785_v38 = vadd.f32 %v1784_v14, %v1783_v13 }
 0x344   : > { %v1888_v40 = vadd.f32 %v1887_v39, %v1886_v30 }
 0x349   : > { %v2159_v21 = vpop.f32.mrb[14].mxu1 }
 0x34a   : > { %1931 = vst.msk [vmem:[%s3184_s3 + $0xf8] sm:$0xff] %vm1725_vm2, %v2159_v21  ;;  %v1716_v22 = vpop.f32.mrb[15].mxu1  ;;  %v1829_v41 = vmul.f32 %v2159_v21, %v2159_v21  ;;  %v1788_v44 = vsel %vm1725_vm2, %v2159_v21, 0.0 }
 0x34b   : > { %v1786_v0 = vsel %vm1725_vm2, %v1716_v22, 0.0  ;;  %v1828_v42 = vmul.f32 %v1716_v22, %v1716_v22  ;;  %1930 = vst.msk [vmem:[%s3184_s3 + $0xf0] sm:$0xff] %vm1725_vm2, %v1716_v22 }
 0x34c   : > { %v1787_v43 = vadd.f32 %v1786_v0, %v1785_v38  ;;  %v1891_v8 = vsel %vm1725_vm2, %v1829_v41, 0.0 }
 0x34d   : > { %v1889_v45 = vsel %vm1725_vm2, %v1828_v42, 0.0 }
 0x34e   : > { %v1789_v46 = vadd.f32 %v1788_v44, %v1787_v43  ;;  %v1890_v7 = vadd.f32 %v1889_v45, %v1888_v40 }
 0x350   : > { %v1790_v47 = vrot.slane %v1789_v46, 4  ;;  %v1892_v48 = vadd.f32 %v1891_v8, %v1890_v7 }
 0x352   : > { %v1791_v49 = vadd.f32 %v1790_v47, %v1789_v46  ;;  %v1893_v15 = vrot.slane %v1892_v48, 4 }
 0x354   : > { %v1792_v23 = vrot.slane %v1791_v49, 2  ;;  %v1894_v24 = vadd.f32 %v1893_v15, %v1892_v48 }
 0x356   : > { %v1793_v16 = vadd.f32 %v1792_v23, %v1791_v49  ;;  %v1895_v50 = vrot.slane %v1894_v24, 2 }
 0x358   : > { %v1794_v51 = vrot.slane %v1793_v16, 1  ;;  %v1896_v52 = vadd.f32 %v1895_v50, %v1894_v24 }
 0x35a   : > { %v1795_v53 = vadd.f32 %v1794_v51, %v1793_v16  ;;  %v1897_v54 = vrot.slane %v1896_v52, 1 }
 0x35c   : > { %1797 = vst.msk [vmem:[%s3338_s22] sm:$0x1] %vm1796_vm0, %v1795_v53  ;;  %v1898_v55 = vadd.f32 %v1897_v54, %v1896_v52 }
 0x35e   : > { %1899 = vst.msk [vmem:[%s3338_s22 + $0x1] sm:$0x1] %vm1796_vm0, %v1898_v55 }
 0x35f PF: > { %s16_s18 = sadd.s32 1, %s2197_s18  }
 0x360   : > { %p13_p4 = scmp.ge.s32.totalorder %s16_s18, 4  }
 0x362   :  { %15 = sbr.rel (!%p13_p4) target bundleno = 1 (0x1), region = 79 }

// kernel: double_conv2d_bn_forward.4
= control target key start
LH: loop header
LB: loop body
LE: loop exit
PB: predicated region body
PF: predicated region fallthrough
CT: control target
= control target key end

     0   :  { %s2374_s18 = smov 0   ;;  %s3618_s0 = inlined_call_operand.vmem [shape: f32[2,16,16,8], index: 0, kind: input, shape index: {}]   ;;  %s3619_s1 = inlined_call_operand.vmem [shape: f32[72,8], index: 1, kind: input, shape index: {}]   ;;  %s3620_s2 = inlined_call_operand.vmem [shape: f32[1,8], index: 2, kind: input, shape index: {}]   ;;  %s3621_s3 = inlined_call_operand.vmem [shape: f32[1,8], index: 3, kind: input, shape index: {}]   ;;  %s3622_s4 = inlined_call_operand.vmem [shape: f32[2,16,16,8], index: 4, kind: output, shape index: {0}]   ;;  %s3623_s5 = inlined_call_operand.vmem [shape: f32[2,8,8], index: 5, kind: output, shape index: {1}]  }
   0x1 LB: > { %s2127_s19 = sadd.s32 4294967295, %s2333_s18   ;;  %p2131_p0 = scmp.ge.s32.totalorder %s2333_s18, 1  ;;  %s2333_s18 = sphi %s2374_s18, %s16_s18  }
   0x2   : > { %p190_p1 = scmp.lt.s32.totalorder %s2333_s18, 3 }
   0x4   : > { %p191_p2 = pnand %p2131_p0, %p190_p1 }
   0x5   : > { %p222_p3 = scmp.lt.s32.totalorder (!%p191_p2), %s2127_s19, 1  ;;  %vm378_vm0 = vcmask (!%p191_p2), 588800   ;;  %v2335_v0 = vmov (!%p191_p2), 0.0   ;;  %v2452_v1 = vld [vmem:[%s3620_s2] ss:$0 sm:$0xff] (!%p191_p2)  ;;  %vm412_vm1 = vcmask (!%p191_p2), 64512  }
   0x6   : > { %194 = sbr.rel (%p191_p2) target bundleno = 870 (0x366), region = 36  ;;  %383 = vst.msk [vmem:[#allocation2 + $0x20] sm:$0xff] (!%p191_p2), %vm378_vm0, %v2335_v0  ;;  %384 = vst.msk [vmem:[#allocation2 + $0x28] sm:$0xff] (!%p191_p2), %vm378_vm0, %v2335_v0  ;;  %v2464_v2 = vld [vmem:[%s3621_s3] ss:$0 sm:$0xff] (!%p191_p2)  ;;  %vm414_vm2 = vcmask (!%p191_p2), 63488  }
   0x7   : > { %379 = vst.msk [vmem:[#allocation2] sm:$0xff] (!%p191_p2), %vm378_vm0, %v2335_v0  ;;  %380 = vst.msk [vmem:[#allocation2 + $0x8] sm:$0xff] (!%p191_p2), %vm378_vm0, %v2335_v0  ;;  %s2336_s28 = smov (!%p191_p2), 8   ;;  %s2337_s29 = smov (!%p191_p2), 16   ;;  %vm564_vm3 = vcmask (!%p191_p2), 130112   ;;  %vm687_vm4 = vcmask (!%p191_p2), 195712  }
   0x8   : > { %381 = vst.msk [vmem:[#allocation2 + $0x10] sm:$0xff] (!%p191_p2), %vm378_vm0, %v2335_v0  ;;  %382 = vst.msk [vmem:[#allocation2 + $0x18] sm:$0xff] (!%p191_p2), %vm378_vm0, %v2335_v0  ;;  %s2338_s30 = smov (!%p191_p2), 24   ;;  %s2339_s10 = smov (!%p191_p2), 32   ;;  %vm685_vm5 = vcmask (!%p191_p2), 195713   ;;  %vm817_vm6 = vcmask (!%p191_p2), 260288  }
   0x9   : > { %385 = vst.msk [vmem:[#allocation2 + $0x30] sm:$0xff] (!%p191_p2), %vm378_vm0, %v2335_v0  ;;  %386 = vst.msk [vmem:[#allocation2 + $0x38] sm:$0xff] (!%p191_p2), %vm378_vm0, %v2335_v0  ;;  %s2340_s15 = smov (!%p191_p2), 40   ;;  %s2341_s23 = smov (!%p191_p2), 48   ;;  %vm815_vm7 = vcmask (!%p191_p2), 261312   ;;  %vm945_vm8 = vcmask (!%p191_p2), 326912  }
   0xa   : > { %387 = vst.msk [vmem:[#allocation2 + $0x40] sm:$0xff] (!%p191_p2), %vm378_vm0, %v2335_v0  ;;  %388 = vst.msk [vmem:[#allocation2 + $0x48] sm:$0xff] (!%p191_p2), %vm378_vm0, %v2335_v0  ;;  %s2343_s8 = smov (!%p191_p2), 64   ;;  %vm1074_vm9 = vcmask (!%p191_p2), 392513   ;;  %vm1076_vm10 = vcmask (!%p191_p2), 392512   ;;  %vm1198_vm11 = vcmask (!%p191_p2), 458112  }
   0xb   : > { %389 = vst.msk [vmem:[#allocation2 + $0x50] sm:$0xff] (!%p191_p2), %vm378_vm0, %v2335_v0  ;;  %390 = vst.msk [vmem:[#allocation2 + $0x58] sm:$0xff] (!%p191_p2), %vm378_vm0, %v2335_v0  ;;  %vm1320_vm12 = vcmask (!%p191_p2), 523712   ;;  %vm1200_vm13 = vcmask (!%p191_p2), 457088   ;;  %vm1441_vm14 = vcmask (!%p191_p2), 589313   ;;  %vm1443_vm15 = vcmask (!%p191_p2), 589312  }
   0xc   : > { %391 = vst.msk [vmem:[#allocation2 + $0x60] sm:$0xff] (!%p191_p2), %vm378_vm0, %v2335_v0  ;;  %392 = vst.msk [vmem:[#allocation2 + $0x68] sm:$0xff] (!%p191_p2), %vm378_vm0, %v2335_v0 }
   0xd   : > { %s3625_s19 = smov (!%p222_p3, %s2127_s19), 1  ;;  %393 = vst.msk [vmem:[#allocation2 + $0x70] sm:$0xff] %vm378_vm0, %v2335_v0  ;;  %394 = vst.msk [vmem:[#allocation2 + $0x78] sm:$0xff] %vm378_vm0, %v2335_v0 }
   0xe   : > { %395 = vst.msk [vmem:[#allocation2 + $0x80] sm:$0xff] %vm378_vm0, %v2335_v0  ;;  %396 = vst.msk [vmem:[#allocation2 + $0x88] sm:$0xff] %vm378_vm0, %v2335_v0  ;;  %s2173_s20 = sshll.u32 %s3625_s19, 8 }
   0xf   : > { %397 = vst.msk [vmem:[#allocation2 + $0x90] sm:$0xff] %vm378_vm0, %v2335_v0  ;;  %398 = vst.msk [vmem:[#allocation2 + $0x98] sm:$0xff] %vm378_vm0, %v2335_v0  ;;  %s2459_s25 = scalar_lea.vmem %s3618_s0, %s2173_s20  ;;  %s3398_s16 = scalar_lea.vmem %s3622_s4, %s2173_s20 }
  0x10   : > { %399 = vst.msk [vmem:[#allocation2 + $0xa0] sm:$0xff] %vm378_vm0, %v2335_v0  ;;  %400 = vst.msk [vmem:[#allocation2 + $0xa8] sm:$0xff] %vm378_vm0, %v2335_v0  ;;  %v238_v3 = vld [vmem:[%s2459_s25 + $0x10] sm:$0xff]  ;;  %v236_v4 = vld [vmem:[%s2459_s25] sm:$0xff]  ;;  %s2136_s20 = sshll.u32 %s3625_s19, 3 }
  0x11   : > { %401 = vst.msk [vmem:[#allocation2 + $0xb0] sm:$0xff] %vm378_vm0, %v2335_v0  ;;  %402 = vst.msk [vmem:[#allocation2 + $0xb8] sm:$0xff] %vm378_vm0, %v2335_v0  ;;  %v239_v5 = vld [vmem:[%s2459_s25 + $0x18] sm:$0xff]  ;;  %v277_v6 = vmul.f32 %v2452_v1, %v238_v3  ;;  %v275_v7 = vmul.f32 %v2452_v1, %v236_v4  ;;  %v237_v9 = vld [vmem:[%s2459_s25 + $0x8] sm:$0xff] }
  0x12   : > { %403 = vst.msk [vmem:[#allocation2 + $0xc0] sm:$0xff] %vm378_vm0, %v2335_v0  ;;  %404 = vst.msk [vmem:[#allocation2 + $0xc8] sm:$0xff] %vm378_vm0, %v2335_v0  ;;  %v278_v8 = vmul.f32 %v2452_v1, %v239_v5  ;;  %v241_v10 = vld [vmem:[%s2459_s25 + $0x28] sm:$0xff]  ;;  %v240_v11 = vld [vmem:[%s2459_s25 + $0x20] sm:$0xff]  ;;  %v276_v12 = vmul.f32 %v2452_v1, %v237_v9 }
  0x13   : > { %405 = vst.msk [vmem:[#allocation2 + $0xd0] sm:$0xff] %vm378_vm0, %v2335_v0  ;;  %406 = vst.msk [vmem:[#allocation2 + $0xd8] sm:$0xff] %vm378_vm0, %v2335_v0  ;;  %v280_v13 = vmul.f32 %v2452_v1, %v241_v10  ;;  %v279_v14 = vmul.f32 %v2452_v1, %v240_v11  ;;  %v243_v15 = vld [vmem:[%s2459_s25 + $0x38] sm:$0xff]  ;;  %v242_v16 = vld [vmem:[%s2459_s25 + $0x30] sm:$0xff]  ;;  %v316_v17 = vadd.f32 %v2464_v2, %v277_v6 }
  0x14   : > { %407 = vst.msk [vmem:[#allocation2 + $0xe0] sm:$0xff] %vm378_vm0, %v2335_v0  ;;  %408 = vst.msk [vmem:[#allocation2 + $0xe8] sm:$0xff] %vm378_vm0, %v2335_v0  ;;  %v314_v18 = vadd.f32 %v2464_v2, %v275_v7  ;;  %v317_v19 = vadd.f32 %v2464_v2, %v278_v8  ;;  %v282_v20 = vmul.f32 %v2452_v1, %v243_v15  ;;  %v245_v25 = vld [vmem:[%s2459_s25 + $0x48] sm:$0xff]  ;;  %v244_v26 = vld [vmem:[%s2459_s25 + $0x40] sm:$0xff] }
  0x15   : > { %409 = vst.msk [vmem:[#allocation2 + $0xf0] sm:$0xff] %vm378_vm0, %v2335_v0  ;;  %410 = vst.msk [vmem:[#allocation2 + $0xf8] sm:$0xff] %vm378_vm0, %v2335_v0  ;;  %v315_v21 = vadd.f32 %v2464_v2, %v276_v12  ;;  %v319_v22 = vadd.f32 %v2464_v2, %v280_v13  ;;  %v318_v23 = vadd.f32 %v2464_v2, %v279_v14  ;;  %v247_v27 = vld [vmem:[%s2459_s25 + $0x58] sm:$0xff]  ;;  %v2491_v28 = vmax.f32 %v316_v17, 0.0  ;;  %v246_v32 = vld [vmem:[%s2459_s25 + $0x50] sm:$0xff] }
  0x16   : > { %v281_v24 = vmul.f32 %v2452_v1, %v242_v16  ;;  %v2493_v29 = vmax.f32 %v314_v18, 0.0  ;;  %v2495_v30 = vmax.f32 %v317_v19, 0.0  ;;  %v321_v31 = vadd.f32 %v2464_v2, %v282_v20  ;;  %v249_v33 = vld [vmem:[%s2459_s25 + $0x68] sm:$0xff]  ;;  %v248_v34 = vld [vmem:[%s2459_s25 + $0x60] sm:$0xff]  ;;  %v251_v39 = vld [vmem:[%s2459_s25 + $0x78] sm:$0xff] }
  0x17   : > { %v2501_v35 = vmax.f32 %v315_v21, 0.0  ;;  %v2503_v36 = vmax.f32 %v319_v22, 0.0  ;;  %v2505_v37 = vmax.f32 %v318_v23, 0.0  ;;  %478 = vrot.lane.b32.xlu1 %v2491_v28, %s2336_s28  ;;  %v284_v41 = vmul.f32 %v2452_v1, %v245_v25  ;;  %v250_v44 = vld [vmem:[%s2459_s25 + $0x70] sm:$0xff]  ;;  %416 = vst.msk [vmem:[#allocation2 + $0x21] sm:$0xff] %vm412_vm1, %v2491_v28  ;;  %v253_v53 = vld [vmem:[%s2459_s25 + $0x88] sm:$0xff] }
  0x18   : > { %v320_v38 = vadd.f32 %v2464_v2, %v281_v24  ;;  %474 = vrot.lane.b32.xlu0 %v2493_v29, %s2336_s28  ;;  %v2513_v40 = vmax.f32 %v321_v31, 0.0  ;;  %v283_v42 = vmul.f32 %v2452_v1, %v244_v26  ;;  %v286_v43 = vmul.f32 %v2452_v1, %v247_v27  ;;  %413 = vst.msk [vmem:[#allocation2 + $0x11] sm:$0xff] %vm412_vm1, %v2493_v29  ;;  %v252_v58 = vld [vmem:[%s2459_s25 + $0x80] sm:$0xff]  ;;  %v255_v59 = vld [vmem:[%s2459_s25 + $0x98] sm:$0xff]  ;;  %v254_v60 = vld [vmem:[%s2459_s25 + $0x90] sm:$0xff] }
  0x19   : > { %417 = vst.msk [vmem:[#allocation2 + $0x29] sm:$0x7f] %vm414_vm2, %v2495_v30  ;;  %v285_v46 = vmul.f32 %v2452_v1, %v246_v32  ;;  %v288_v47 = vmul.f32 %v2452_v1, %v249_v33  ;;  %v287_v48 = vmul.f32 %v2452_v1, %v248_v34  ;;  %415 = vst.msk [vmem:[#allocation2 + $0x19] sm:$0x7f] %vm414_vm2, %v2501_v35  ;;  %v257_v4 = vld [vmem:[%s2459_s25 + $0xa8] sm:$0xff]  ;;  %v256_v5 = vld [vmem:[%s2459_s25 + $0xa0] sm:$0xff] }
  0x1a   : > { %v2525_v45 = vmax.f32 %v320_v38, 0.0  ;;  %418 = vst.msk [vmem:[#allocation2 + $0x31] sm:$0xff] %vm412_vm1, %v2505_v37  ;;  %v323_v49 = vadd.f32 %v2464_v2, %v284_v41  ;;  %v322_v50 = vadd.f32 %v2464_v2, %v283_v42  ;;  %v325_v51 = vadd.f32 %v2464_v2, %v286_v43  ;;  %v259_v14 = vld [vmem:[%s2459_s25 + $0xb8] sm:$0xff]  ;;  %v258_v19 = vld [vmem:[%s2459_s25 + $0xb0] sm:$0xff]  ;;  %v261_v27 = vld [vmem:[%s2459_s25 + $0xc8] sm:$0xff] }
  0x1b   : > { %419 = vst.msk [vmem:[#allocation2 + $0x39] sm:$0x7f] %vm414_vm2, %v2503_v36  ;;  %v290_v52 = vmul.f32 %v2452_v1, %v251_v39  ;;  %421 = vst.msk [vmem:[#allocation2 + $0x49] sm:$0x7f] %vm414_vm2, %v2513_v40  ;;  %v324_v54 = vadd.f32 %v2464_v2, %v285_v46  ;;  %v327_v55 = vadd.f32 %v2464_v2, %v288_v47  ;;  %480 = vrot.lane.b32.xlu1 %v2495_v30, %s2336_s28  ;;  %v260_v31 = vld [vmem:[%s2459_s25 + $0xc0] sm:$0xff]  ;;  %v263_v39 = vld [vmem:[%s2459_s25 + $0xd8] sm:$0xff] }
  0x1c   : > { %v326_v56 = vadd.f32 %v2464_v2, %v287_v48  ;;  %v289_v57 = vmul.f32 %v2452_v1, %v250_v44  ;;  %420 = vst.msk [vmem:[#allocation2 + $0x41] sm:$0xff] %vm412_vm1, %v2525_v45  ;;  %476 = vrot.lane.b32.xlu0 %v2501_v35, %s2336_s28  ;;  %v2556_v61 = vmax.f32 %v323_v49, 0.0  ;;  %v2558_v62 = vmax.f32 %v322_v50, 0.0  ;;  %v262_v41 = vld [vmem:[%s2459_s25 + $0xd0] sm:$0xff]  ;;  %v265_v42 = vld [vmem:[%s2459_s25 + $0xe8] sm:$0xff]  ;;  %v264_v48 = vld [vmem:[%s2459_s25 + $0xe0] sm:$0xff] }
  0x1d   : > { %v2560_v63 = vmax.f32 %v325_v51, 0.0  ;;  %v329_v3 = vadd.f32 %v2464_v2, %v290_v52  ;;  %v2565_v6 = vmax.f32 %v324_v54, 0.0  ;;  %v2567_v7 = vmax.f32 %v327_v55, 0.0 }
  0x1e   : > { %v2569_v8 = vmax.f32 %v326_v56, 0.0  ;;  %v328_v9 = vadd.f32 %v2464_v2, %v289_v57  ;;  %v292_v11 = vmul.f32 %v2452_v1, %v253_v53  ;;  %v291_v12 = vmul.f32 %v2452_v1, %v252_v58  ;;  %422 = vst.msk [vmem:[#allocation2 + $0x51] sm:$0xff] %vm412_vm1, %v2558_v62 }
  0x1f   : > { %v2572_v10 = vmax.f32 %v329_v3, 0.0  ;;  %v294_v13 = vmul.f32 %v2452_v1, %v255_v59  ;;  %423 = vst.msk [vmem:[#allocation2 + $0x59] sm:$0x7f] %vm414_vm2, %v2556_v61  ;;  %425 = vst.msk [vmem:[#allocation2 + $0x69] sm:$0x7f] %vm414_vm2, %v2560_v63  ;;  %v293_v16 = vmul.f32 %v2452_v1, %v254_v60  ;;  %v296_v17 = vmul.f32 %v2452_v1, %v257_v4 }
  0x20   : > { %v2584_v15 = vmax.f32 %v328_v9, 0.0  ;;  %v295_v18 = vmul.f32 %v2452_v1, %v256_v5  ;;  %424 = vst.msk [vmem:[#allocation2 + $0x61] sm:$0xff] %vm412_vm1, %v2565_v6  ;;  %426 = vst.msk [vmem:[#allocation2 + $0x71] sm:$0xff] %vm412_vm1, %v2569_v8  ;;  %484 = vrot.lane.b32.xlu1 %v2503_v36, %s2336_s28  ;;  %482 = vrot.lane.b32.xlu0 %v2505_v37, %s2336_s28  ;;  %v331_v20 = vadd.f32 %v2464_v2, %v292_v11 }
  0x21   : > { %427 = vst.msk [vmem:[#allocation2 + $0x79] sm:$0x7f] %vm414_vm2, %v2567_v7  ;;  %v330_v21 = vadd.f32 %v2464_v2, %v291_v12  ;;  %v333_v22 = vadd.f32 %v2464_v2, %v294_v13  ;;  %429 = vst.msk [vmem:[#allocation2 + $0x89] sm:$0x7f] %vm414_vm2, %v2572_v10  ;;  %v332_v23 = vadd.f32 %v2464_v2, %v293_v16 }
  0x22   : > { %v335_v24 = vadd.f32 %v2464_v2, %v296_v17  ;;  %v334_v25 = vadd.f32 %v2464_v2, %v295_v18  ;;  %v298_v26 = vmul.f32 %v2452_v1, %v259_v14  ;;  %428 = vst.msk [vmem:[#allocation2 + $0x81] sm:$0xff] %vm412_vm1, %v2584_v15  ;;  %v2613_v32 = vmax.f32 %v331_v20, 0.0 }
  0x23   : > { %v2615_v33 = vmax.f32 %v330_v21, 0.0  ;;  %v2617_v34 = vmax.f32 %v333_v22, 0.0  ;;  %v297_v38 = vmul.f32 %v2452_v1, %v258_v19  ;;  %v2623_v43 = vmax.f32 %v332_v23, 0.0  ;;  %v1505_v23 = vld [vmem:[%s3619_s1] sm:$0xff] }
  0x24   : > { %v2625_v44 = vmax.f32 %v335_v24, 0.0  ;;  %v2627_v46 = vmax.f32 %v334_v25, 0.0  ;;  %v337_v47 = vadd.f32 %v2464_v2, %v298_v26  ;;  %488 = vrot.lane.b32.xlu1 %v2513_v40, %s2336_s28  ;;  %486 = vrot.lane.b32.xlu0 %v2525_v45, %s2336_s28  ;;  %v300_v50 = vmul.f32 %v2452_v1, %v261_v27  ;;  %431 = vst.msk [vmem:[#allocation2 + $0x99] sm:$0x7f] %vm414_vm2, %v2613_v32  ;;  %v1506_v24 = vld [vmem:[%s3619_s1 + $0x8] sm:$0xff] }
  0x25   : > { %v336_v49 = vadd.f32 %v2464_v2, %v297_v38  ;;  %v299_v51 = vmul.f32 %v2452_v1, %v260_v31  ;;  %430 = vst.msk [vmem:[#allocation2 + $0x91] sm:$0xff] %vm412_vm1, %v2615_v33  ;;  %v302_v53 = vmul.f32 %v2452_v1, %v263_v39  ;;  %v301_v54 = vmul.f32 %v2452_v1, %v262_v41  ;;  %v1507_v31 = vld [vmem:[%s3619_s1 + $0x10] sm:$0xff]  ;;  %v1508_v38 = vld [vmem:[%s3619_s1 + $0x18] sm:$0xff] }
  0x26   : > { %433 = vst.msk [vmem:[#allocation2 + $0xa9] sm:$0x7f] %vm414_vm2, %v2617_v34  ;;  %v2644_v52 = vmax.f32 %v337_v47, 0.0  ;;  %v304_v55 = vmul.f32 %v2452_v1, %v265_v42  ;;  %435 = vst.msk [vmem:[#allocation2 + $0xb9] sm:$0x7f] %vm414_vm2, %v2625_v44  ;;  %v339_v57 = vadd.f32 %v2464_v2, %v300_v50  ;;  %v303_v59 = vmul.f32 %v2452_v1, %v264_v48  ;;  %v1509_v47 = vld [vmem:[%s3619_s1 + $0x20] sm:$0xff] }
  0x27   : > { %432 = vst.msk [vmem:[#allocation2 + $0xa1] sm:$0xff] %vm412_vm1, %v2623_v43  ;;  %434 = vst.msk [vmem:[#allocation2 + $0xb1] sm:$0xff] %vm412_vm1, %v2627_v46  ;;  %v2655_v56 = vmax.f32 %v336_v49, 0.0  ;;  %v338_v58 = vadd.f32 %v2464_v2, %v299_v51  ;;  %v341_v60 = vadd.f32 %v2464_v2, %v302_v53  ;;  %v340_v3 = vadd.f32 %v2464_v2, %v301_v54  ;;  %v1511_v51 = vld [vmem:[%s3619_s1 + $0x30] sm:$0xff]  ;;  %v1512_v53 = vld [vmem:[%s3619_s1 + $0x38] sm:$0xff] }
  0x28   : > { %v343_v4 = vadd.f32 %v2464_v2, %v304_v55  ;;  %437 = vst.msk [vmem:[#allocation2 + $0xc9] sm:$0x7f] %vm414_vm2, %v2644_v52  ;;  %492 = vrot.lane.b32.xlu1 %v2556_v61, %s2336_s28  ;;  %490 = vrot.lane.b32.xlu0 %v2558_v62, %s2336_s28  ;;  %v2669_v5 = vmax.f32 %v339_v57, 0.0  ;;  %v342_v1 = vadd.f32 %v2464_v2, %v303_v59  ;;  %v1513_v57 = vld [vmem:[%s3619_s1 + $0x40] sm:$0xff] }
  0x29   : > { %v2671_v9 = vmax.f32 %v338_v58, 0.0  ;;  %436 = vst.msk [vmem:[#allocation2 + $0xc1] sm:$0xff] %vm412_vm1, %v2655_v56  ;;  %v2676_v11 = vmax.f32 %v341_v60, 0.0  ;;  %v2678_v12 = vmax.f32 %v340_v3, 0.0  ;;  %v2282_v25 = vpack.c.bf16 %v1506_v24, %v1505_v23 }
  0x2a   : > { %v2680_v13 = vmax.f32 %v343_v4, 0.0  ;;  %v2682_v14 = vmax.f32 %v342_v1, 0.0  ;;  %439 = vst.msk [vmem:[#allocation2 + $0xd9] sm:$0x7f] %vm414_vm2, %v2669_v5  ;;  %v2286_v39 = vpack.c.bf16 %v1508_v38, %v1507_v31 }
  0x2b   : > { %438 = vst.msk [vmem:[#allocation2 + $0xd1] sm:$0xff] %vm412_vm1, %v2671_v9  ;;  %440 = vst.msk [vmem:[#allocation2 + $0xe1] sm:$0xff] %vm412_vm1, %v2678_v12  ;;  %2283 = vmatprep.subr.bf16.mxu0 %v2282_v25  ;;  %2298 = vmatprep.subr.bf16.mxu1 %v2282_v25 }
  0x2c   : > { %441 = vst.msk [vmem:[#allocation2 + $0xe9] sm:$0x7f] %vm414_vm2, %v2676_v11  ;;  %443 = vst.msk [vmem:[#allocation2 + $0xf9] sm:$0x7f] %vm414_vm2, %v2680_v13  ;;  %496 = vrot.lane.b32.xlu1 %v2560_v63, %s2336_s28  ;;  %494 = vrot.lane.b32.xlu0 %v2565_v6, %s2336_s28 }
  0x2d   : > { %442 = vst.msk [vmem:[#allocation2 + $0xf1] sm:$0xff] %vm412_vm1, %v2682_v14  ;;  %2285 = vmatpush3.bf16.msra.mxu0 %v2282_v25  ;;  %2303 = vmatpush3.bf16.msra.mxu1 %v2282_v25 }
  0x2e   : > { %2287 = vmatprep.subr.bf16.mxu0 %v2286_v39  ;;  %2299 = vmatprep.subr.bf16.mxu1 %v2286_v39 }
  0x30   : > { %500 = vrot.lane.b32.xlu1 %v2567_v7, %s2336_s28  ;;  %498 = vrot.lane.b32.xlu0 %v2569_v8, %s2336_s28 }
  0x31   : > { %2289 = vmatpush3.bf16.msra.mxu0 %v2286_v39  ;;  %2304 = vmatpush3.bf16.msra.mxu1 %v2286_v39 }
  0x34   : > { %504 = vrot.lane.b32.xlu1 %v2572_v10, %s2336_s28  ;;  %502 = vrot.lane.b32.xlu0 %v2584_v15, %s2336_s28 }
  0x38   : > { %508 = vrot.lane.b32.xlu1 %v2613_v32, %s2336_s28  ;;  %506 = vrot.lane.b32.xlu0 %v2615_v33, %s2336_s28 }
  0x3c   : > { %512 = vrot.lane.b32.xlu1 %v2617_v34, %s2336_s28  ;;  %510 = vrot.lane.b32.xlu0 %v2623_v43, %s2336_s28 }
  0x40   : > { %516 = vrot.lane.b32.xlu1 %v2625_v44, %s2336_s28  ;;  %514 = vrot.lane.b32.xlu0 %v2627_v46, %s2336_s28 }
  0x44   : > { %520 = vrot.lane.b32.xlu1 %v2644_v52, %s2336_s28  ;;  %518 = vrot.lane.b32.xlu0 %v2655_v56, %s2336_s28 }
  0x48   : > { %524 = vrot.lane.b32.xlu1 %v2669_v5, %s2336_s28  ;;  %522 = vrot.lane.b32.xlu0 %v2671_v9, %s2336_s28 }
  0x4c   : > { %528 = vrot.lane.b32.xlu1 %v2676_v11, %s2336_s28  ;;  %526 = vrot.lane.b32.xlu0 %v2678_v12, %s2336_s28 }
  0x50   : > { %532 = vrot.lane.b32.xlu1 %v2680_v13, %s2336_s28  ;;  %530 = vrot.lane.b32.xlu0 %v2682_v14, %s2336_s28 }
  0x54   : > { %597 = vrot.lane.b32.xlu1 %v2501_v35, %s2337_s29  ;;  %595 = vrot.lane.b32.xlu0 %v2493_v29, %s2337_s29 }
  0x58   : > { %601 = vrot.lane.b32.xlu1 %v2495_v30, %s2337_s29  ;;  %599 = vrot.lane.b32.xlu0 %v2491_v28, %s2337_s29 }
  0x5c   : > { %605 = vrot.lane.b32.xlu1 %v2503_v36, %s2337_s29  ;;  %603 = vrot.lane.b32.xlu0 %v2505_v37, %s2337_s29 }
  0x60   : > { %609 = vrot.lane.b32.xlu1 %v2513_v40, %s2337_s29  ;;  %607 = vrot.lane.b32.xlu0 %v2525_v45, %s2337_s29 }
  0x64   : > { %613 = vrot.lane.b32.xlu1 %v2556_v61, %s2337_s29  ;;  %611 = vrot.lane.b32.xlu0 %v2558_v62, %s2337_s29 }
  0x68   : > { %617 = vrot.lane.b32.xlu1 %v2560_v63, %s2337_s29  ;;  %615 = vrot.lane.b32.xlu0 %v2565_v6, %s2337_s29 }
  0x6c   : > { %621 = vrot.lane.b32.xlu1 %v2567_v7, %s2337_s29  ;;  %619 = vrot.lane.b32.xlu0 %v2569_v8, %s2337_s29 }
  0x70   : > { %625 = vrot.lane.b32.xlu1 %v2572_v10, %s2337_s29  ;;  %623 = vrot.lane.b32.xlu0 %v2584_v15, %s2337_s29 }
  0x74   : > { %629 = vrot.lane.b32.xlu1 %v2613_v32, %s2337_s29  ;;  %627 = vrot.lane.b32.xlu0 %v2615_v33, %s2337_s29 }
  0x78   : > { %633 = vrot.lane.b32.xlu1 %v2617_v34, %s2337_s29  ;;  %631 = vrot.lane.b32.xlu0 %v2623_v43, %s2337_s29 }
  0x7c   : > { %637 = vrot.lane.b32.xlu1 %v2625_v44, %s2337_s29  ;;  %635 = vrot.lane.b32.xlu0 %v2627_v46, %s2337_s29 }
  0x80   : > { %641 = vrot.lane.b32.xlu1 %v2644_v52, %s2337_s29  ;;  %639 = vrot.lane.b32.xlu0 %v2655_v56, %s2337_s29 }
  0x84   : > { %645 = vrot.lane.b32.xlu1 %v2669_v5, %s2337_s29  ;;  %643 = vrot.lane.b32.xlu0 %v2671_v9, %s2337_s29 }
  0x88   : > { %649 = vrot.lane.b32.xlu1 %v2676_v11, %s2337_s29  ;;  %647 = vrot.lane.b32.xlu0 %v2678_v12, %s2337_s29 }
  0x89   : > { %v479_v2 = vpop.permute.xlu1 %478 }
  0x8a   : > { %v475_v16 = vpop.permute.xlu0 %474  ;;  %567 = vst.msk [vmem:[#allocation2 + $0x20] sm:$0xff] %vm564_vm3, %v479_v2 }
  0x8b   : > { %565 = vst.msk [vmem:[#allocation2 + $0x10] sm:$0xff] %vm564_vm3, %v475_v16 }
  0x8c   : > { %653 = vrot.lane.b32.xlu1 %v2680_v13, %s2337_s29  ;;  %651 = vrot.lane.b32.xlu0 %v2682_v14, %s2337_s29  ;;  %s2342_s29 = smov 56  }
  0x8d   : > { %v481_v17 = vpop.permute.xlu1 %480 }
  0x8e   : > { %v477_v18 = vpop.permute.xlu0 %476  ;;  %568 = vst.msk [vmem:[#allocation2 + $0x28] sm:$0xff] %vm564_vm3, %v481_v17 }
  0x8f   : > { %566 = vst.msk [vmem:[#allocation2 + $0x18] sm:$0xff] %vm564_vm3, %v477_v18 }
  0x90   : > { %721 = vrot.lane.b32.xlu1 %v2501_v35, %s2338_s30  ;;  %719 = vrot.lane.b32.xlu0 %v2493_v29, %s2338_s30 }
  0x92   : > { %v485_v19 = vpop.permute.xlu1 %484  ;;  %v483_v20 = vpop.permute.xlu0 %482 }
  0x93   : > { %570 = vst.msk [vmem:[#allocation2 + $0x38] sm:$0xff] %vm564_vm3, %v485_v19  ;;  %569 = vst.msk [vmem:[#allocation2 + $0x30] sm:$0xff] %vm564_vm3, %v483_v20 }
  0x94   : > { %725 = vrot.lane.b32.xlu1 %v2495_v30, %s2338_s30  ;;  %723 = vrot.lane.b32.xlu0 %v2491_v28, %s2338_s30 }
  0x96   : > { %v489_v21 = vpop.permute.xlu1 %488  ;;  %v487_v22 = vpop.permute.xlu0 %486 }
  0x97   : > { %572 = vst.msk [vmem:[#allocation2 + $0x48] sm:$0xff] %vm564_vm3, %v489_v21  ;;  %571 = vst.msk [vmem:[#allocation2 + $0x40] sm:$0xff] %vm564_vm3, %v487_v22 }
  0x98   : > { %849 = vrot.lane.b32.xlu1 %v2493_v29, %s2339_s10  ;;  %727 = vrot.lane.b32.xlu0 %v2505_v37, %s2338_s30 }
  0x9a   : > { %v493_v26 = vpop.permute.xlu1 %492  ;;  %v491_v27 = vpop.permute.xlu0 %490 }
  0x9b   : > { %574 = vst.msk [vmem:[#allocation2 + $0x58] sm:$0xff] %vm564_vm3, %v493_v26  ;;  %573 = vst.msk [vmem:[#allocation2 + $0x50] sm:$0xff] %vm564_vm3, %v491_v27 }
  0x9c   : > { %978 = vrot.lane.b32.xlu1 %v2493_v29, %s2340_s15  ;;  %851 = vrot.lane.b32.xlu0 %v2501_v35, %s2339_s10  ;;  %v1510_v29 = vld [vmem:[%s3619_s1 + $0x28] sm:$0xff] }
  0x9d   : > { %v2290_v48 = vpack.c.bf16 %v1510_v29, %v1509_v47 }
  0x9e   : > { %v497_v41 = vpop.permute.xlu1 %496  ;;  %v495_v42 = vpop.permute.xlu0 %494 }
  0x9f   : > { %576 = vst.msk [vmem:[#allocation2 + $0x68] sm:$0xff] %vm564_vm3, %v497_v41  ;;  %575 = vst.msk [vmem:[#allocation2 + $0x60] sm:$0xff] %vm564_vm3, %v495_v42  ;;  %2291 = vmatprep.subr.bf16.mxu0 %v2290_v48  ;;  %2300 = vmatprep.subr.bf16.mxu1 %v2290_v48 }
  0xa0   : > { %1108 = vrot.lane.b32.xlu1 %v2491_v28, %s2341_s23  ;;  %980 = vrot.lane.b32.xlu0 %v2501_v35, %s2340_s15  ;;  %v2294_v35 = vpack.c.bf16 %v1512_v53, %v1511_v51 }
  0xa1   : > { %2293 = vmatpush3.bf16.msra.mxu0 %v2290_v48  ;;  %2305 = vmatpush3.bf16.msra.mxu1 %v2290_v48 }
  0xa2   : > { %v501_v49 = vpop.permute.xlu1 %500  ;;  %v499_v50 = vpop.permute.xlu0 %498  ;;  %2295 = vmatprep.subr.bf16.mxu0 %v2294_v35  ;;  %2301 = vmatprep.subr.bf16.mxu1 %v2294_v35 }
  0xa3   : > { %578 = vst.msk [vmem:[#allocation2 + $0x78] sm:$0xff] %vm564_vm3, %v501_v49  ;;  %577 = vst.msk [vmem:[#allocation2 + $0x70] sm:$0xff] %vm564_vm3, %v499_v50 }
  0xa4   : > { %1230 = vrot.lane.b32.xlu1 %v2491_v28, %s2342_s29  ;;  %1110 = vrot.lane.b32.xlu0 %v2495_v30, %s2341_s23 }
  0xa5   : > { %2297 = vmatpush3.bf16.msra.mxu0 %v2294_v35  ;;  %2306 = vmatpush3.bf16.msra.mxu1 %v2294_v35 }
  0xa6   : > { %v505_v54 = vpop.permute.xlu1 %504  ;;  %v503_v55 = vpop.permute.xlu0 %502  ;;  %2232 = vmatprep.subr.mxu0 %v1513_v57  ;;  %2302 = vmatprep.subr.mxu1 %v1513_v57 }
  0xa7   : > { %580 = vst.msk [vmem:[#allocation2 + $0x88] sm:$0xff] %vm564_vm3, %v505_v54  ;;  %579 = vst.msk [vmem:[#allocation2 + $0x80] sm:$0xff] %vm564_vm3, %v503_v55 }
  0xa8   : > { %853 = vrot.lane.b32.xlu1 %v2491_v28, %s2339_s10  ;;  %1232 = vrot.lane.b32.xlu0 %v2495_v30, %s2342_s29 }
  0xa9   : > { %2233 = vmatpush3.msra.mxu0 %v1513_v57  ;;  %2307 = vmatpush3.msra.mxu1 %v1513_v57 }
  0xaa   : > { %v509_v58 = vpop.permute.xlu1 %508  ;;  %v507_v59 = vpop.permute.xlu0 %506 }
  0xab   : > { %582 = vst.msk [vmem:[#allocation2 + $0x98] sm:$0xff] %vm564_vm3, %v509_v58  ;;  %581 = vst.msk [vmem:[#allocation2 + $0x90] sm:$0xff] %vm564_vm3, %v507_v59 }
  0xac   : > { %1351 = vrot.lane.b32.xlu1 %v2491_v28, %s2343_s8  ;;  %855 = vrot.lane.b32.xlu0 %v2495_v30, %s2339_s10 }
  0xae   : > { %v513_v60 = vpop.permute.xlu1 %512  ;;  %v511_v3 = vpop.permute.xlu0 %510 }
  0xaf   : > { %584 = vst.msk [vmem:[#allocation2 + $0xa8] sm:$0xff] %vm564_vm3, %v513_v60  ;;  %583 = vst.msk [vmem:[#allocation2 + $0xa0] sm:$0xff] %vm564_vm3, %v511_v3 }
  0xb0   : > { %982 = vrot.lane.b32.xlu1 %v2491_v28, %s2340_s15  ;;  %1353 = vrot.lane.b32.xlu0 %v2495_v30, %s2343_s8 }
  0xb2   : > { %v517_v4 = vpop.permute.xlu1 %516  ;;  %v515_v1 = vpop.permute.xlu0 %514 }
  0xb3   : > { %586 = vst.msk [vmem:[#allocation2 + $0xb8] sm:$0xff] %vm564_vm3, %v517_v4  ;;  %585 = vst.msk [vmem:[#allocation2 + $0xb0] sm:$0xff] %vm564_vm3, %v515_v1 }
  0xb4   : > { %1112 = vrot.lane.b32.xlu1 %v2505_v37, %s2341_s23  ;;  %984 = vrot.lane.b32.xlu0 %v2495_v30, %s2340_s15 }
  0xb6   : > { %v521_v2 = vpop.permute.xlu1 %520  ;;  %v519_v16 = vpop.permute.xlu0 %518 }
  0xb7   : > { %588 = vst.msk [vmem:[#allocation2 + $0xc8] sm:$0xff] %vm564_vm3, %v521_v2  ;;  %587 = vst.msk [vmem:[#allocation2 + $0xc0] sm:$0xff] %vm564_vm3, %v519_v16 }
  0xb8   : > { %729 = vrot.lane.b32.xlu1 %v2503_v36, %s2338_s30  ;;  %1114 = vrot.lane.b32.xlu0 %v2503_v36, %s2341_s23 }
  0xba   : > { %v525_v28 = vpop.permute.xlu1 %524  ;;  %v523_v17 = vpop.permute.xlu0 %522 }
  0xbb   : > { %590 = vst.msk [vmem:[#allocation2 + $0xd8] sm:$0xff] %vm564_vm3, %v525_v28  ;;  %589 = vst.msk [vmem:[#allocation2 + $0xd0] sm:$0xff] %vm564_vm3, %v523_v17 }
  0xbc   : > { %1236 = vrot.lane.b32.xlu1 %v2503_v36, %s2342_s29  ;;  %1234 = vrot.lane.b32.xlu0 %v2505_v37, %s2342_s29 }
  0xbe   : > { %v529_v30 = vpop.permute.xlu1 %528  ;;  %v527_v18 = vpop.permute.xlu0 %526 }
  0xbf   : > { %592 = vst.msk [vmem:[#allocation2 + $0xe8] sm:$0xff] %vm564_vm3, %v529_v30  ;;  %591 = vst.msk [vmem:[#allocation2 + $0xe0] sm:$0xff] %vm564_vm3, %v527_v18 }
  0xc0   : > { %859 = vrot.lane.b32.xlu1 %v2503_v36, %s2339_s10  ;;  %857 = vrot.lane.b32.xlu0 %v2505_v37, %s2339_s10 }
  0xc2   : > { %v533_v19 = vpop.permute.xlu1 %532  ;;  %v531_v20 = vpop.permute.xlu0 %530 }
  0xc3   : > { %594 = vst.msk [vmem:[#allocation2 + $0xf8] sm:$0xff] %vm564_vm3, %v533_v19  ;;  %593 = vst.msk [vmem:[#allocation2 + $0xf0] sm:$0xff] %vm564_vm3, %v531_v20 }
  0xc4   : > { %1357 = vrot.lane.b32.xlu1 %v2503_v36, %s2343_s8  ;;  %1355 = vrot.lane.b32.xlu0 %v2505_v37, %s2343_s8 }
  0xc6   : > { %v598_v21 = vpop.permute.xlu1 %597  ;;  %v596_v22 = vpop.permute.xlu0 %595 }
  0xc7   : > { %688 = vst.msk [vmem:[#allocation2 + $0x17] sm:$0xff] %vm687_vm4, %v598_v21 }
  0xc8   : > { %686 = vst.msk [vmem:[#allocation2 + $0xf] sm:$0xfe] %vm685_vm5, %v596_v22  ;;  %988 = vrot.lane.b32.xlu1 %v2503_v36, %s2340_s15  ;;  %986 = vrot.lane.b32.xlu0 %v2505_v37, %s2340_s15 }
  0xca   : > { %v602_v23 = vpop.permute.xlu1 %601  ;;  %v600_v24 = vpop.permute.xlu0 %599 }
  0xcb   : > { %690 = vst.msk [vmem:[#allocation2 + $0x27] sm:$0xff] %vm687_vm4, %v602_v23 }
  0xcc   : > { %689 = vst.msk [vmem:[#allocation2 + $0x1f] sm:$0xfe] %vm685_vm5, %v600_v24  ;;  %1118 = vrot.lane.b32.xlu1 %v2513_v40, %s2341_s23  ;;  %1116 = vrot.lane.b32.xlu0 %v2525_v45, %s2341_s23 }
  0xce   : > { %v606_v25 = vpop.permute.xlu1 %605  ;;  %v604_v26 = vpop.permute.xlu0 %603 }
  0xcf   : > { %692 = vst.msk [vmem:[#allocation2 + $0x37] sm:$0xff] %vm687_vm4, %v606_v25 }
  0xd0   : > { %691 = vst.msk [vmem:[#allocation2 + $0x2f] sm:$0xfe] %vm685_vm5, %v604_v26  ;;  %733 = vrot.lane.b32.xlu1 %v2513_v40, %s2338_s30  ;;  %731 = vrot.lane.b32.xlu0 %v2525_v45, %s2338_s30 }
  0xd2   : > { %v610_v36 = vpop.permute.xlu1 %609  ;;  %v608_v37 = vpop.permute.xlu0 %607 }
  0xd3   : > { %694 = vst.msk [vmem:[#allocation2 + $0x47] sm:$0xff] %vm687_vm4, %v610_v36 }
  0xd4   : > { %693 = vst.msk [vmem:[#allocation2 + $0x3f] sm:$0xfe] %vm685_vm5, %v608_v37  ;;  %1240 = vrot.lane.b32.xlu1 %v2513_v40, %s2342_s29  ;;  %1238 = vrot.lane.b32.xlu0 %v2525_v45, %s2342_s29 }
  0xd6   : > { %v614_v27 = vpop.permute.xlu1 %613  ;;  %v612_v31 = vpop.permute.xlu0 %611 }
  0xd7   : > { %696 = vst.msk [vmem:[#allocation2 + $0x57] sm:$0xff] %vm687_vm4, %v614_v27 }
  0xd8   : > { %695 = vst.msk [vmem:[#allocation2 + $0x4f] sm:$0xfe] %vm685_vm5, %v612_v31  ;;  %863 = vrot.lane.b32.xlu1 %v2513_v40, %s2339_s10  ;;  %861 = vrot.lane.b32.xlu0 %v2525_v45, %s2339_s10 }
  0xda   : > { %v618_v38 = vpop.permute.xlu1 %617  ;;  %v616_v39 = vpop.permute.xlu0 %615 }
  0xdb   : > { %698 = vst.msk [vmem:[#allocation2 + $0x67] sm:$0xff] %vm687_vm4, %v618_v38 }
  0xdc   : > { %697 = vst.msk [vmem:[#allocation2 + $0x5f] sm:$0xfe] %vm685_vm5, %v616_v39  ;;  %1361 = vrot.lane.b32.xlu1 %v2513_v40, %s2343_s8  ;;  %1359 = vrot.lane.b32.xlu0 %v2525_v45, %s2343_s8 }
  0xde   : > { %v622_v41 = vpop.permute.xlu1 %621  ;;  %v620_v42 = vpop.permute.xlu0 %619 }
  0xdf   : > { %700 = vst.msk [vmem:[#allocation2 + $0x77] sm:$0xff] %vm687_vm4, %v622_v41 }
  0xe0   : > { %699 = vst.msk [vmem:[#allocation2 + $0x6f] sm:$0xfe] %vm685_vm5, %v620_v42  ;;  %992 = vrot.lane.b32.xlu1 %v2513_v40, %s2340_s15  ;;  %990 = vrot.lane.b32.xlu0 %v2525_v45, %s2340_s15 }
  0xe2   : > { %v626_v47 = vpop.permute.xlu1 %625  ;;  %v624_v29 = vpop.permute.xlu0 %623 }
  0xe3   : > { %702 = vst.msk [vmem:[#allocation2 + $0x87] sm:$0xff] %vm687_vm4, %v626_v47 }
  0xe4   : > { %701 = vst.msk [vmem:[#allocation2 + $0x7f] sm:$0xfe] %vm685_vm5, %v624_v29  ;;  %1122 = vrot.lane.b32.xlu1 %v2556_v61, %s2341_s23  ;;  %1120 = vrot.lane.b32.xlu0 %v2558_v62, %s2341_s23 }
  0xe6   : > { %v630_v48 = vpop.permute.xlu1 %629  ;;  %v628_v49 = vpop.permute.xlu0 %627 }
  0xe7   : > { %704 = vst.msk [vmem:[#allocation2 + $0x97] sm:$0xff] %vm687_vm4, %v630_v48 }
  0xe8   : > { %703 = vst.msk [vmem:[#allocation2 + $0x8f] sm:$0xfe] %vm685_vm5, %v628_v49  ;;  %737 = vrot.lane.b32.xlu1 %v2556_v61, %s2338_s30  ;;  %735 = vrot.lane.b32.xlu0 %v2558_v62, %s2338_s30 }
  0xea   : > { %v634_v40 = vpop.permute.xlu1 %633  ;;  %v632_v45 = vpop.permute.xlu0 %631 }
  0xeb   : > { %706 = vst.msk [vmem:[#allocation2 + $0xa7] sm:$0xff] %vm687_vm4, %v634_v40 }
  0xec   : > { %705 = vst.msk [vmem:[#allocation2 + $0x9f] sm:$0xfe] %vm685_vm5, %v632_v45  ;;  %1244 = vrot.lane.b32.xlu1 %v2556_v61, %s2342_s29  ;;  %1242 = vrot.lane.b32.xlu0 %v2558_v62, %s2342_s29 }
  0xee   : > { %v638_v50 = vpop.permute.xlu1 %637  ;;  %v636_v51 = vpop.permute.xlu0 %635 }
  0xef   : > { %708 = vst.msk [vmem:[#allocation2 + $0xb7] sm:$0xff] %vm687_vm4, %v638_v50 }
  0xf0   : > { %707 = vst.msk [vmem:[#allocation2 + $0xaf] sm:$0xfe] %vm685_vm5, %v636_v51  ;;  %867 = vrot.lane.b32.xlu1 %v2556_v61, %s2339_s10  ;;  %865 = vrot.lane.b32.xlu0 %v2558_v62, %s2339_s10 }
  0xf2   : > { %v642_v53 = vpop.permute.xlu1 %641  ;;  %v640_v35 = vpop.permute.xlu0 %639 }
  0xf3   : > { %710 = vst.msk [vmem:[#allocation2 + $0xc7] sm:$0xff] %vm687_vm4, %v642_v53 }
  0xf4   : > { %709 = vst.msk [vmem:[#allocation2 + $0xbf] sm:$0xfe] %vm685_vm5, %v640_v35  ;;  %1365 = vrot.lane.b32.xlu1 %v2556_v61, %s2343_s8  ;;  %1363 = vrot.lane.b32.xlu0 %v2558_v62, %s2343_s8 }
  0xf6   : > { %v646_v54 = vpop.permute.xlu1 %645  ;;  %v644_v55 = vpop.permute.xlu0 %643 }
  0xf7   : > { %712 = vst.msk [vmem:[#allocation2 + $0xd7] sm:$0xff] %vm687_vm4, %v646_v54 }
  0xf8   : > { %711 = vst.msk [vmem:[#allocation2 + $0xcf] sm:$0xfe] %vm685_vm5, %v644_v55  ;;  %996 = vrot.lane.b32.xlu1 %v2556_v61, %s2340_s15  ;;  %994 = vrot.lane.b32.xlu0 %v2558_v62, %s2340_s15 }
  0xfa   : > { %v650_v57 = vpop.permute.xlu1 %649  ;;  %v648_v58 = vpop.permute.xlu0 %647 }
  0xfb   : > { %714 = vst.msk [vmem:[#allocation2 + $0xe7] sm:$0xff] %vm687_vm4, %v650_v57 }
  0xfc   : > { %713 = vst.msk [vmem:[#allocation2 + $0xdf] sm:$0xfe] %vm685_vm5, %v648_v58  ;;  %1126 = vrot.lane.b32.xlu1 %v2560_v63, %s2341_s23  ;;  %1124 = vrot.lane.b32.xlu0 %v2565_v6, %s2341_s23 }
  0xfe   : > { %v654_v59 = vpop.permute.xlu1 %653  ;;  %v652_v60 = vpop.permute.xlu0 %651 }
  0xff   : > { %716 = vst.msk [vmem:[#allocation2 + $0xf7] sm:$0xff] %vm687_vm4, %v654_v59 }
 0x100   : > { %715 = vst.msk [vmem:[#allocation2 + $0xef] sm:$0xfe] %vm685_vm5, %v652_v60  ;;  %741 = vrot.lane.b32.xlu1 %v2560_v63, %s2338_s30  ;;  %739 = vrot.lane.b32.xlu0 %v2565_v6, %s2338_s30 }
 0x102   : > { %v722_v61 = vpop.permute.xlu1 %721  ;;  %v720_v62 = vpop.permute.xlu0 %719 }
 0x103   : > { %818 = vst.msk [vmem:[#allocation2 + $0x9] sm:$0x7f] %vm817_vm6, %v722_v61 }
 0x104   : > { %816 = vst.msk [vmem:[#allocation2 + $0x1] sm:$0xff] %vm815_vm7, %v720_v62  ;;  %1248 = vrot.lane.b32.xlu1 %v2560_v63, %s2342_s29  ;;  %1246 = vrot.lane.b32.xlu0 %v2565_v6, %s2342_s29 }
 0x106   : > { %v726_v3 = vpop.permute.xlu1 %725  ;;  %v724_v4 = vpop.permute.xlu0 %723 }
 0x107   : > { %820 = vst.msk [vmem:[#allocation2 + $0x19] sm:$0x7f] %vm817_vm6, %v726_v3 }
 0x108   : > { %819 = vst.msk [vmem:[#allocation2 + $0x11] sm:$0xff] %vm815_vm7, %v724_v4  ;;  %871 = vrot.lane.b32.xlu1 %v2560_v63, %s2339_s10  ;;  %869 = vrot.lane.b32.xlu0 %v2565_v6, %s2339_s10 }
 0x10a   : > { %v850_v1 = vpop.permute.xlu1 %849  ;;  %v728_v2 = vpop.permute.xlu0 %727 }
 0x10b   : > { %946 = vst.msk [vmem:[#allocation2] sm:$0xff] %vm945_vm8, %v850_v1 }
 0x10c   : > { %821 = vst.msk [vmem:[#allocation2 + $0x21] sm:$0xff] %vm815_vm7, %v728_v2  ;;  %1369 = vrot.lane.b32.xlu1 %v2560_v63, %s2343_s8  ;;  %1367 = vrot.lane.b32.xlu0 %v2565_v6, %s2343_s8 }
 0x10e   : > { %v979_v16 = vpop.permute.xlu1 %978  ;;  %v852_v28 = vpop.permute.xlu0 %851 }
 0x10f   : > { %1075 = vst.msk [vmem:[#allocation2 - $0x1] sm:$0xfe] %vm1074_vm9, %v979_v16 }
 0x110   : > { %947 = vst.msk [vmem:[#allocation2 + $0x8] sm:$0xff] %vm945_vm8, %v852_v28  ;;  %1000 = vrot.lane.b32.xlu1 %v2560_v63, %s2340_s15  ;;  %998 = vrot.lane.b32.xlu0 %v2565_v6, %s2340_s15 }
 0x112   : > { %v1109_v17 = vpop.permute.xlu1 %1108  ;;  %v981_v30 = vpop.permute.xlu0 %980 }
 0x113   : > { %1077 = vst.msk [vmem:[#allocation2 + $0x7] sm:$0xff] %vm1076_vm10, %v981_v30 }
 0x114   : > { %1130 = vrot.lane.b32.xlu1 %v2567_v7, %s2341_s23  ;;  %1128 = vrot.lane.b32.xlu0 %v2569_v8, %s2341_s23  ;;  %1199 = vst.msk [vmem:[#allocation2 + $0x1] sm:$0xff] %vm1198_vm11, %v1109_v17 }
 0x116   : > { %v1231_v63 = vpop.permute.xlu1 %1230  ;;  %v1111_v18 = vpop.permute.xlu0 %1110 }
 0x117   : > { %1321 = vst.msk [vmem:[#allocation2] sm:$0xff] %vm1320_vm12, %v1231_v63 }
 0x118   : > { %1201 = vst.msk [vmem:[#allocation2 + $0x9] sm:$0x7f] %vm1200_vm13, %v1111_v18  ;;  %745 = vrot.lane.b32.xlu1 %v2567_v7, %s2338_s30  ;;  %743 = vrot.lane.b32.xlu0 %v2569_v8, %s2338_s30 }
 0x11a   : > { %v854_v6 = vpop.permute.xlu1 %853  ;;  %v1233_v19 = vpop.permute.xlu0 %1232 }
 0x11b   : > { %948 = vst.msk [vmem:[#allocation2 + $0x10] sm:$0xff] %vm945_vm8, %v854_v6 }
 0x11c   : > { %1322 = vst.msk [vmem:[#allocation2 + $0x8] sm:$0xff] %vm1320_vm12, %v1233_v19  ;;  %1252 = vrot.lane.b32.xlu1 %v2567_v7, %s2342_s29  ;;  %1250 = vrot.lane.b32.xlu0 %v2569_v8, %s2342_s29 }
 0x11e   : > { %v1352_v20 = vpop.permute.xlu1 %1351  ;;  %v856_v21 = vpop.permute.xlu0 %855 }
 0x11f   : > { %1442 = vst.msk [vmem:[#allocation2 - $0x1] sm:$0xfe] %vm1441_vm14, %v1352_v20 }
 0x120   : > { %949 = vst.msk [vmem:[#allocation2 + $0x18] sm:$0xff] %vm945_vm8, %v856_v21  ;;  %875 = vrot.lane.b32.xlu1 %v2567_v7, %s2339_s10  ;;  %873 = vrot.lane.b32.xlu0 %v2569_v8, %s2339_s10 }
 0x122   : > { %v983_v22 = vpop.permute.xlu1 %982  ;;  %v1354_v23 = vpop.permute.xlu0 %1353 }
 0x123   : > { %1078 = vst.msk [vmem:[#allocation2 + $0xf] sm:$0xfe] %vm1074_vm9, %v983_v22 }
 0x124   : > { %1444 = vst.msk [vmem:[#allocation2 + $0x7] sm:$0xff] %vm1443_vm15, %v1354_v23  ;;  %1373 = vrot.lane.b32.xlu1 %v2567_v7, %s2343_s8  ;;  %1371 = vrot.lane.b32.xlu0 %v2569_v8, %s2343_s8 }
 0x126   : > { %v1113_v24 = vpop.permute.xlu1 %1112  ;;  %v985_v25 = vpop.permute.xlu0 %984 }
 0x127   : > { %1079 = vst.msk [vmem:[#allocation2 + $0x17] sm:$0xff] %vm1076_vm10, %v985_v25 }
 0x128   : > { %1202 = vst.msk [vmem:[#allocation2 + $0x11] sm:$0xff] %vm1198_vm11, %v1113_v24  ;;  %1004 = vrot.lane.b32.xlu1 %v2567_v7, %s2340_s15  ;;  %1002 = vrot.lane.b32.xlu0 %v2569_v8, %s2340_s15 }
 0x12a   : > { %v730_v26 = vpop.permute.xlu1 %729  ;;  %v1115_v36 = vpop.permute.xlu0 %1114 }
 0x12b   : > { %v1473_v37 = vld [vmem:[#allocation2] sm:$0xff]  ;;  %v1474_v27 = vld [vmem:[#allocation2 + $0x8] sm:$0xff]  ;;  %822 = vst.msk [vmem:[#allocation2 + $0x29] sm:$0x7f] %vm817_vm6, %v730_v26 }
 0x12c   : > { %1203 = vst.msk [vmem:[#allocation2 + $0x19] sm:$0x7f] %vm1200_vm13, %v1115_v36  ;;  %2234 = vmatprep.mubr.msk.f32.mxu0 %vm378_vm0, %v1473_v37  ;;  %1134 = vrot.lane.b32.xlu1 %v2572_v10, %s2341_s23 }
 0x12d   : > { %1132 = vrot.lane.b32.xlu0 %v2584_v15, %s2341_s23  ;;  %2235 = vmatmul.mubr.msk.f32.vlgmr.msra.gmra.mrb[0].mxu0 %vm378_vm0, %v1474_v27 }
 0x12e   : > { %v1237_v7 = vpop.permute.xlu1 %1236  ;;  %v1235_v8 = vpop.permute.xlu0 %1234 }
 0x12f   : > { %1324 = vst.msk [vmem:[#allocation2 + $0x18] sm:$0xff] %vm1320_vm12, %v1237_v7  ;;  %1323 = vst.msk [vmem:[#allocation2 + $0x10] sm:$0xff] %vm1320_vm12, %v1235_v8 }
 0x130   : > { %749 = vrot.lane.b32.xlu1 %v2572_v10, %s2338_s30 }
 0x131   : > { %747 = vrot.lane.b32.xlu0 %v2584_v15, %s2338_s30 }
 0x132   : > { %v860_v31 = vpop.permute.xlu1 %859  ;;  %v858_v38 = vpop.permute.xlu0 %857 }
 0x133   : > { %951 = vst.msk [vmem:[#allocation2 + $0x28] sm:$0xff] %vm945_vm8, %v860_v31  ;;  %950 = vst.msk [vmem:[#allocation2 + $0x20] sm:$0xff] %vm945_vm8, %v858_v38 }
 0x134   : > { %1256 = vrot.lane.b32.xlu1 %v2572_v10, %s2342_s29 }
 0x135   : > { %1254 = vrot.lane.b32.xlu0 %v2584_v15, %s2342_s29 }
 0x136   : > { %v1358_v39 = vpop.permute.xlu1 %1357  ;;  %v1356_v41 = vpop.permute.xlu0 %1355 }
 0x137   : > { %1446 = vst.msk [vmem:[#allocation2 + $0x17] sm:$0xff] %vm1443_vm15, %v1358_v39 }
 0x138   : > { %1445 = vst.msk [vmem:[#allocation2 + $0xf] sm:$0xfe] %vm1441_vm14, %v1356_v41  ;;  %879 = vrot.lane.b32.xlu1 %v2572_v10, %s2339_s10 }
 0x139   : > { %877 = vrot.lane.b32.xlu0 %v2584_v15, %s2339_s10 }
 0x13a   : > { %v989_v42 = vpop.permute.xlu1 %988  ;;  %v987_v47 = vpop.permute.xlu0 %986 }
 0x13b   : > { %1081 = vst.msk [vmem:[#allocation2 + $0x27] sm:$0xff] %vm1076_vm10, %v989_v42 }
 0x13c   : > { %1080 = vst.msk [vmem:[#allocation2 + $0x1f] sm:$0xfe] %vm1074_vm9, %v987_v47  ;;  %1377 = vrot.lane.b32.xlu1 %v2572_v10, %s2343_s8 }
 0x13d   : > { %1375 = vrot.lane.b32.xlu0 %v2584_v15, %s2343_s8 }
 0x13e   : > { %v1119_v29 = vpop.permute.xlu1 %1118  ;;  %v1117_v48 = vpop.permute.xlu0 %1116  ;;  %v1476_v40 = vld [vmem:[#allocation2 + $0x18] sm:$0xff] }
 0x13f   : > { %v1475_v49 = vld [vmem:[#allocation2 + $0x10] sm:$0xff]  ;;  %1205 = vst.msk [vmem:[#allocation2 + $0x29] sm:$0x7f] %vm1200_vm13, %v1119_v29 }
 0x140   : > { %1204 = vst.msk [vmem:[#allocation2 + $0x21] sm:$0xff] %vm1198_vm11, %v1117_v48  ;;  %2237 = vmatprep.mubr.msk.f32.mxu0 %vm378_vm0, %v1475_v49  ;;  %1008 = vrot.lane.b32.xlu1 %v2572_v10, %s2340_s15 }
 0x141   : > { %1006 = vrot.lane.b32.xlu0 %v2584_v15, %s2340_s15  ;;  %2238 = vmatmul.mubr.msk.f32.gmra.mrb[2].mxu0 %vm378_vm0, %v1476_v40 }
 0x142   : > { %v734_v45 = vpop.permute.xlu1 %733  ;;  %v732_v50 = vpop.permute.xlu0 %731 }
 0x143   : > { %824 = vst.msk [vmem:[#allocation2 + $0x39] sm:$0x7f] %vm817_vm6, %v734_v45 }
 0x144   : > { %823 = vst.msk [vmem:[#allocation2 + $0x31] sm:$0xff] %vm815_vm7, %v732_v50  ;;  %1138 = vrot.lane.b32.xlu1 %v2613_v32, %s2341_s23 }
 0x145   : > { %1136 = vrot.lane.b32.xlu0 %v2615_v33, %s2341_s23 }
 0x146   : > { %v1241_v51 = vpop.permute.xlu1 %1240  ;;  %v1239_v53 = vpop.permute.xlu0 %1238 }
 0x147   : > { %1326 = vst.msk [vmem:[#allocation2 + $0x28] sm:$0xff] %vm1320_vm12, %v1241_v51  ;;  %1325 = vst.msk [vmem:[#allocation2 + $0x20] sm:$0xff] %vm1320_vm12, %v1239_v53 }
 0x148   : > { %753 = vrot.lane.b32.xlu1 %v2613_v32, %s2338_s30 }
 0x149   : > { %751 = vrot.lane.b32.xlu0 %v2615_v33, %s2338_s30 }
 0x14a   : > { %v864_v10 = vpop.permute.xlu1 %863  ;;  %v862_v15 = vpop.permute.xlu0 %861 }
 0x14b   : > { %953 = vst.msk [vmem:[#allocation2 + $0x38] sm:$0xff] %vm945_vm8, %v864_v10  ;;  %952 = vst.msk [vmem:[#allocation2 + $0x30] sm:$0xff] %vm945_vm8, %v862_v15 }
 0x14c   : > { %1260 = vrot.lane.b32.xlu1 %v2613_v32, %s2342_s29 }
 0x14d   : > { %1258 = vrot.lane.b32.xlu0 %v2615_v33, %s2342_s29 }
 0x14e   : > { %v1362_v35 = vpop.permute.xlu1 %1361  ;;  %v1360_v54 = vpop.permute.xlu0 %1359 }
 0x14f   : > { %1448 = vst.msk [vmem:[#allocation2 + $0x27] sm:$0xff] %vm1443_vm15, %v1362_v35 }
 0x150   : > { %1447 = vst.msk [vmem:[#allocation2 + $0x1f] sm:$0xfe] %vm1441_vm14, %v1360_v54  ;;  %883 = vrot.lane.b32.xlu1 %v2613_v32, %s2339_s10 }
 0x151   : > { %881 = vrot.lane.b32.xlu0 %v2615_v33, %s2339_s10 }
 0x152   : > { %v993_v55 = vpop.permute.xlu1 %992  ;;  %v991_v57 = vpop.permute.xlu0 %990 }
 0x153   : > { %1083 = vst.msk [vmem:[#allocation2 + $0x37] sm:$0xff] %vm1076_vm10, %v993_v55 }
 0x154   : > { %1082 = vst.msk [vmem:[#allocation2 + $0x2f] sm:$0xfe] %vm1074_vm9, %v991_v57  ;;  %1381 = vrot.lane.b32.xlu1 %v2613_v32, %s2343_s8 }
 0x155   : > { %1379 = vrot.lane.b32.xlu0 %v2615_v33, %s2343_s8 }
 0x156   : > { %v1123_v58 = vpop.permute.xlu1 %1122  ;;  %v1121_v59 = vpop.permute.xlu0 %1120  ;;  %v1478_v61 = vld [vmem:[#allocation2 + $0x28] sm:$0xff] }
 0x157   : > { %v1477_v60 = vld [vmem:[#allocation2 + $0x20] sm:$0xff]  ;;  %1207 = vst.msk [vmem:[#allocation2 + $0x39] sm:$0x7f] %vm1200_vm13, %v1123_v58 }
 0x158   : > { %1206 = vst.msk [vmem:[#allocation2 + $0x31] sm:$0xff] %vm1198_vm11, %v1121_v59  ;;  %2240 = vmatprep.mubr.msk.f32.mxu0 %vm378_vm0, %v1477_v60  ;;  %1012 = vrot.lane.b32.xlu1 %v2613_v32, %s2340_s15 }
 0x159   : > { %1010 = vrot.lane.b32.xlu0 %v2615_v33, %s2340_s15  ;;  %2241 = vmatmul.mubr.msk.f32.gmra.mrb[4].mxu0 %vm378_vm0, %v1478_v61 }
 0x15a   : > { %v738_v62 = vpop.permute.xlu1 %737  ;;  %v736_v3 = vpop.permute.xlu0 %735 }
 0x15b   : > { %826 = vst.msk [vmem:[#allocation2 + $0x49] sm:$0x7f] %vm817_vm6, %v738_v62 }
 0x15c   : > { %825 = vst.msk [vmem:[#allocation2 + $0x41] sm:$0xff] %vm815_vm7, %v736_v3  ;;  %1142 = vrot.lane.b32.xlu1 %v2617_v34, %s2341_s23 }
 0x15d   : > { %1140 = vrot.lane.b32.xlu0 %v2623_v43, %s2341_s23 }
 0x15e   : > { %v1245_v4 = vpop.permute.xlu1 %1244  ;;  %v1243_v1 = vpop.permute.xlu0 %1242 }
 0x15f   : > { %1328 = vst.msk [vmem:[#allocation2 + $0x38] sm:$0xff] %vm1320_vm12, %v1245_v4  ;;  %1327 = vst.msk [vmem:[#allocation2 + $0x30] sm:$0xff] %vm1320_vm12, %v1243_v1 }
 0x160   : > { %757 = vrot.lane.b32.xlu1 %v2617_v34, %s2338_s30 }
 0x161   : > { %755 = vrot.lane.b32.xlu0 %v2623_v43, %s2338_s30 }
 0x162   : > { %v868_v32 = vpop.permute.xlu1 %867  ;;  %v866_v33 = vpop.permute.xlu0 %865 }
 0x163   : > { %955 = vst.msk [vmem:[#allocation2 + $0x48] sm:$0xff] %vm945_vm8, %v868_v32  ;;  %954 = vst.msk [vmem:[#allocation2 + $0x40] sm:$0xff] %vm945_vm8, %v866_v33 }
 0x164   : > { %1264 = vrot.lane.b32.xlu1 %v2617_v34, %s2342_s29 }
 0x165   : > { %1262 = vrot.lane.b32.xlu0 %v2623_v43, %s2342_s29 }
 0x166   : > { %v1366_v2 = vpop.permute.xlu1 %1365  ;;  %v1364_v16 = vpop.permute.xlu0 %1363 }
 0x167   : > { %1450 = vst.msk [vmem:[#allocation2 + $0x37] sm:$0xff] %vm1443_vm15, %v1366_v2 }
 0x168   : > { %1449 = vst.msk [vmem:[#allocation2 + $0x2f] sm:$0xfe] %vm1441_vm14, %v1364_v16  ;;  %887 = vrot.lane.b32.xlu1 %v2617_v34, %s2339_s10 }
 0x169   : > { %885 = vrot.lane.b32.xlu0 %v2623_v43, %s2339_s10 }
 0x16a   : > { %v997_v28 = vpop.permute.xlu1 %996  ;;  %v995_v17 = vpop.permute.xlu0 %994 }
 0x16b   : > { %1085 = vst.msk [vmem:[#allocation2 + $0x47] sm:$0xff] %vm1076_vm10, %v997_v28 }
 0x16c   : > { %1084 = vst.msk [vmem:[#allocation2 + $0x3f] sm:$0xfe] %vm1074_vm9, %v995_v17  ;;  %1385 = vrot.lane.b32.xlu1 %v2617_v34, %s2343_s8 }
 0x16d   : > { %1383 = vrot.lane.b32.xlu0 %v2623_v43, %s2343_s8 }
 0x16e   : > { %v1127_v30 = vpop.permute.xlu1 %1126  ;;  %v1125_v63 = vpop.permute.xlu0 %1124  ;;  %v1480_v6 = vld [vmem:[#allocation2 + $0x38] sm:$0xff] }
 0x16f   : > { %v1479_v18 = vld [vmem:[#allocation2 + $0x30] sm:$0xff]  ;;  %1209 = vst.msk [vmem:[#allocation2 + $0x49] sm:$0x7f] %vm1200_vm13, %v1127_v30 }
 0x170   : > { %1208 = vst.msk [vmem:[#allocation2 + $0x41] sm:$0xff] %vm1198_vm11, %v1125_v63  ;;  %2243 = vmatprep.mubr.msk.f32.mxu0 %vm378_vm0, %v1479_v18  ;;  %1016 = vrot.lane.b32.xlu1 %v2617_v34, %s2340_s15 }
 0x171   : > { %1014 = vrot.lane.b32.xlu0 %v2623_v43, %s2340_s15  ;;  %2244 = vmatmul.mubr.msk.f32.gmra.mrb[6].mxu0 %vm378_vm0, %v1480_v6 }
 0x172   : > { %v742_v19 = vpop.permute.xlu1 %741  ;;  %v740_v20 = vpop.permute.xlu0 %739 }
 0x173   : > { %828 = vst.msk [vmem:[#allocation2 + $0x59] sm:$0x7f] %vm817_vm6, %v742_v19 }
 0x174   : > { %827 = vst.msk [vmem:[#allocation2 + $0x51] sm:$0xff] %vm815_vm7, %v740_v20  ;;  %1146 = vrot.lane.b32.xlu1 %v2625_v44, %s2341_s23  ;;  %v267_v20 = vld [vmem:[%s2459_s25 + $0xf8] sm:$0xff] }
 0x175   : > { %1144 = vrot.lane.b32.xlu0 %v2627_v46, %s2341_s23 }
 0x176   : > { %v1249_v21 = vpop.permute.xlu1 %1248  ;;  %v1247_v22 = vpop.permute.xlu0 %1246 }
 0x177   : > { %1330 = vst.msk [vmem:[#allocation2 + $0x48] sm:$0xff] %vm1320_vm12, %v1249_v21  ;;  %1329 = vst.msk [vmem:[#allocation2 + $0x40] sm:$0xff] %vm1320_vm12, %v1247_v22  ;;  %v266_v21 = vld [vmem:[%s2459_s25 + $0xf0] sm:$0xff] }
 0x178   : > { %761 = vrot.lane.b32.xlu1 %v2625_v44, %s2338_s30 }
 0x179   : > { %759 = vrot.lane.b32.xlu0 %v2627_v46, %s2338_s30 }
 0x17a   : > { %v872_v34 = vpop.permute.xlu1 %871  ;;  %v870_v43 = vpop.permute.xlu0 %869 }
 0x17b   : > { %957 = vst.msk [vmem:[#allocation2 + $0x58] sm:$0xff] %vm945_vm8, %v872_v34  ;;  %956 = vst.msk [vmem:[#allocation2 + $0x50] sm:$0xff] %vm945_vm8, %v870_v43  ;;  %v2325_v43 = vld [vmem:[%s3620_s2] ss:$0 sm:$0xff] }
 0x17c   : > { %1268 = vrot.lane.b32.xlu1 %v2625_v44, %s2342_s29 }
 0x17d   : > { %1266 = vrot.lane.b32.xlu0 %v2627_v46, %s2342_s29 }
 0x17e   : > { %v1370_v23 = vpop.permute.xlu1 %1369  ;;  %v1368_v24 = vpop.permute.xlu0 %1367 }
 0x17f   : > { %1452 = vst.msk [vmem:[#allocation2 + $0x47] sm:$0xff] %vm1443_vm15, %v1370_v23  ;;  %v306_v23 = vmul.f32 %v2325_v43, %v267_v20 }
 0x180   : > { %1451 = vst.msk [vmem:[#allocation2 + $0x3f] sm:$0xfe] %vm1441_vm14, %v1368_v24  ;;  %891 = vrot.lane.b32.xlu1 %v2625_v44, %s2339_s10  ;;  %v305_v24 = vmul.f32 %v2325_v43, %v266_v21 }
 0x181   : > { %889 = vrot.lane.b32.xlu0 %v2627_v46, %s2339_s10 }
 0x182   : > { %v1001_v25 = vpop.permute.xlu1 %1000  ;;  %v999_v26 = vpop.permute.xlu0 %998 }
 0x183   : > { %1087 = vst.msk [vmem:[#allocation2 + $0x57] sm:$0xff] %vm1076_vm10, %v1001_v25 }
 0x184   : > { %1086 = vst.msk [vmem:[#allocation2 + $0x4f] sm:$0xfe] %vm1074_vm9, %v999_v26  ;;  %1389 = vrot.lane.b32.xlu1 %v2625_v44, %s2343_s8 }
 0x185   : > { %1387 = vrot.lane.b32.xlu0 %v2627_v46, %s2343_s8 }
 0x186   : > { %v1131_v36 = vpop.permute.xlu1 %1130  ;;  %v1129_v37 = vpop.permute.xlu0 %1128  ;;  %v1482_v7 = vld [vmem:[#allocation2 + $0x48] sm:$0xff] }
 0x187   : > { %v1481_v27 = vld [vmem:[#allocation2 + $0x40] sm:$0xff]  ;;  %1211 = vst.msk [vmem:[#allocation2 + $0x59] sm:$0x7f] %vm1200_vm13, %v1131_v36 }
 0x188   : > { %1210 = vst.msk [vmem:[#allocation2 + $0x51] sm:$0xff] %vm1198_vm11, %v1129_v37  ;;  %2246 = vmatprep.mubr.msk.f32.mxu0 %vm378_vm0, %v1481_v27  ;;  %1020 = vrot.lane.b32.xlu1 %v2625_v44, %s2340_s15  ;;  %v2326_v36 = vld [vmem:[%s3621_s3] ss:$0 sm:$0xff] }
 0x189   : > { %1018 = vrot.lane.b32.xlu0 %v2627_v46, %s2340_s15  ;;  %2247 = vmatmul.mubr.msk.f32.gmra.mrb[8].mxu0 %vm378_vm0, %v1482_v7  ;;  %v345_v37 = vadd.f32 %v2326_v36, %v306_v23  ;;  %v344_v27 = vadd.f32 %v2326_v36, %v305_v24 }
 0x18a   : > { %v746_v8 = vpop.permute.xlu1 %745  ;;  %v744_v31 = vpop.permute.xlu0 %743 }
 0x18b   : > { %830 = vst.msk [vmem:[#allocation2 + $0x69] sm:$0x7f] %vm817_vm6, %v746_v8 }
 0x18c   : > { %829 = vst.msk [vmem:[#allocation2 + $0x61] sm:$0xff] %vm815_vm7, %v744_v31  ;;  %1150 = vrot.lane.b32.xlu1 %v2644_v52, %s2341_s23 }
 0x18d   : > { %1148 = vrot.lane.b32.xlu0 %v2655_v56, %s2341_s23 }
 0x18e   : > { %v1253_v38 = vpop.permute.xlu1 %1252  ;;  %v1251_v39 = vpop.permute.xlu0 %1250 }
 0x18f   : > { %1332 = vst.msk [vmem:[#allocation2 + $0x58] sm:$0xff] %vm1320_vm12, %v1253_v38  ;;  %1331 = vst.msk [vmem:[#allocation2 + $0x50] sm:$0xff] %vm1320_vm12, %v1251_v39  ;;  %v377_v39 = vmax.f32 %v345_v37, 0.0 }
 0x190   : > { %765 = vrot.lane.b32.xlu1 %v2644_v52, %s2338_s30 }
 0x191   : > { %763 = vrot.lane.b32.xlu0 %v2655_v56, %s2338_s30 }
 0x192   : > { %v876_v44 = vpop.permute.xlu1 %875  ;;  %v874_v46 = vpop.permute.xlu0 %873 }
 0x193   : > { %959 = vst.msk [vmem:[#allocation2 + $0x68] sm:$0xff] %vm945_vm8, %v876_v44  ;;  %958 = vst.msk [vmem:[#allocation2 + $0x60] sm:$0xff] %vm945_vm8, %v874_v46  ;;  %v376_v44 = vmax.f32 %v344_v27, 0.0 }
 0x194   : > { %1272 = vrot.lane.b32.xlu1 %v2644_v52, %s2342_s29 }
 0x195   : > { %1270 = vrot.lane.b32.xlu0 %v2655_v56, %s2342_s29 }
 0x196   : > { %v1374_v41 = vpop.permute.xlu1 %1373  ;;  %v1372_v42 = vpop.permute.xlu0 %1371 }
 0x197   : > { %1454 = vst.msk [vmem:[#allocation2 + $0x57] sm:$0xff] %vm1443_vm15, %v1374_v41 }
 0x198   : > { %1453 = vst.msk [vmem:[#allocation2 + $0x4f] sm:$0xfe] %vm1441_vm14, %v1372_v42  ;;  %895 = vrot.lane.b32.xlu1 %v2644_v52, %s2339_s10 }
 0x199   : > { %893 = vrot.lane.b32.xlu0 %v2655_v56, %s2339_s10 }
 0x19a   : > { %v1005_v47 = vpop.permute.xlu1 %1004  ;;  %v1003_v29 = vpop.permute.xlu0 %1002 }
 0x19b   : > { %1089 = vst.msk [vmem:[#allocation2 + $0x67] sm:$0xff] %vm1076_vm10, %v1005_v47 }
 0x19c   : > { %1088 = vst.msk [vmem:[#allocation2 + $0x5f] sm:$0xfe] %vm1074_vm9, %v1003_v29  ;;  %1393 = vrot.lane.b32.xlu1 %v2644_v52, %s2343_s8 }
 0x19d   : > { %1391 = vrot.lane.b32.xlu0 %v2655_v56, %s2343_s8 }
 0x19e   : > { %v1135_v48 = vpop.permute.xlu1 %1134  ;;  %v1484_v45 = vld [vmem:[#allocation2 + $0x58] sm:$0xff] }
 0x19f   : > { %v1133_v49 = vpop.permute.xlu0 %1132  ;;  %v1483_v40 = vld [vmem:[#allocation2 + $0x50] sm:$0xff]  ;;  %1213 = vst.msk [vmem:[#allocation2 + $0x69] sm:$0x7f] %vm1200_vm13, %v1135_v48 }
 0x1a0   : > { %1212 = vst.msk [vmem:[#allocation2 + $0x61] sm:$0xff] %vm1198_vm11, %v1133_v49  ;;  %2249 = vmatprep.mubr.msk.f32.mxu0 %vm378_vm0, %v1483_v40  ;;  %1024 = vrot.lane.b32.xlu1 %v2644_v52, %s2340_s15 }
 0x1a1   : > { %1022 = vrot.lane.b32.xlu0 %v2655_v56, %s2340_s15  ;;  %2250 = vmatmul.mubr.msk.f32.gmra.mrb[10].mxu0 %vm378_vm0, %v1484_v45 }
 0x1a2   : > { %v750_v50 = vpop.permute.xlu1 %749 }
 0x1a3   : > { %v748_v51 = vpop.permute.xlu0 %747  ;;  %832 = vst.msk [vmem:[#allocation2 + $0x79] sm:$0x7f] %vm817_vm6, %v750_v50 }
 0x1a4   : > { %831 = vst.msk [vmem:[#allocation2 + $0x71] sm:$0xff] %vm815_vm7, %v748_v51  ;;  %1154 = vrot.lane.b32.xlu1 %v2669_v5, %s2341_s23 }
 0x1a5   : > { %1152 = vrot.lane.b32.xlu0 %v2671_v9, %s2341_s23 }
 0x1a6   : > { %v1257_v53 = vpop.permute.xlu1 %1256 }
 0x1a7   : > { %v1255_v10 = vpop.permute.xlu0 %1254  ;;  %1334 = vst.msk [vmem:[#allocation2 + $0x68] sm:$0xff] %vm1320_vm12, %v1257_v53 }
 0x1a8   : > { %1333 = vst.msk [vmem:[#allocation2 + $0x60] sm:$0xff] %vm1320_vm12, %v1255_v10  ;;  %769 = vrot.lane.b32.xlu1 %v2669_v5, %s2338_s30 }
 0x1a9   : > { %767 = vrot.lane.b32.xlu0 %v2671_v9, %s2338_s30 }
 0x1aa   : > { %v880_v52 = vpop.permute.xlu1 %879 }
 0x1ab   : > { %v878_v56 = vpop.permute.xlu0 %877  ;;  %961 = vst.msk [vmem:[#allocation2 + $0x78] sm:$0xff] %vm945_vm8, %v880_v52 }
 0x1ac   : > { %960 = vst.msk [vmem:[#allocation2 + $0x70] sm:$0xff] %vm945_vm8, %v878_v56  ;;  %1276 = vrot.lane.b32.xlu1 %v2669_v5, %s2342_s29 }
 0x1ad   : > { %1274 = vrot.lane.b32.xlu0 %v2671_v9, %s2342_s29 }
 0x1ae   : > { %v1378_v15 = vpop.permute.xlu1 %1377 }
 0x1af   : > { %v1376_v35 = vpop.permute.xlu0 %1375  ;;  %1456 = vst.msk [vmem:[#allocation2 + $0x67] sm:$0xff] %vm1443_vm15, %v1378_v15 }
 0x1b0   : > { %1455 = vst.msk [vmem:[#allocation2 + $0x5f] sm:$0xfe] %vm1441_vm14, %v1376_v35  ;;  %899 = vrot.lane.b32.xlu1 %v2669_v5, %s2339_s10 }
 0x1b1   : > { %897 = vrot.lane.b32.xlu0 %v2671_v9, %s2339_s10 }
 0x1b2   : > { %v1009_v54 = vpop.permute.xlu1 %1008 }
 0x1b3   : > { %v1007_v55 = vpop.permute.xlu0 %1006  ;;  %1091 = vst.msk [vmem:[#allocation2 + $0x77] sm:$0xff] %vm1076_vm10, %v1009_v54 }
 0x1b4   : > { %1090 = vst.msk [vmem:[#allocation2 + $0x6f] sm:$0xfe] %vm1074_vm9, %v1007_v55  ;;  %1397 = vrot.lane.b32.xlu1 %v2669_v5, %s2343_s8 }
 0x1b5   : > { %1395 = vrot.lane.b32.xlu0 %v2671_v9, %s2343_s8 }
 0x1b6   : > { %v1139_v57 = vpop.permute.xlu1 %1138  ;;  %v1486_v60 = vld [vmem:[#allocation2 + $0x68] sm:$0xff] }
 0x1b7   : > { %v1137_v58 = vpop.permute.xlu0 %1136  ;;  %v1485_v59 = vld [vmem:[#allocation2 + $0x60] sm:$0xff]  ;;  %1215 = vst.msk [vmem:[#allocation2 + $0x79] sm:$0x7f] %vm1200_vm13, %v1139_v57 }
 0x1b8   : > { %1214 = vst.msk [vmem:[#allocation2 + $0x71] sm:$0xff] %vm1198_vm11, %v1137_v58  ;;  %2252 = vmatprep.mubr.msk.f32.mxu0 %vm378_vm0, %v1485_v59  ;;  %1028 = vrot.lane.b32.xlu1 %v2669_v5, %s2340_s15 }
 0x1b9   : > { %1026 = vrot.lane.b32.xlu0 %v2671_v9, %s2340_s15  ;;  %2253 = vmatmul.mubr.msk.f32.gmra.mrb[12].mxu0 %vm378_vm0, %v1486_v60 }
 0x1ba   : > { %v754_v61 = vpop.permute.xlu1 %753 }
 0x1bb   : > { %v752_v62 = vpop.permute.xlu0 %751  ;;  %834 = vst.msk [vmem:[#allocation2 + $0x89] sm:$0x7f] %vm817_vm6, %v754_v61 }
 0x1bc   : > { %833 = vst.msk [vmem:[#allocation2 + $0x81] sm:$0xff] %vm815_vm7, %v752_v62  ;;  %1158 = vrot.lane.b32.xlu1 %v2676_v11, %s2341_s23 }
 0x1bd   : > { %1156 = vrot.lane.b32.xlu0 %v2678_v12, %s2341_s23 }
 0x1be   : > { %v1261_v3 = vpop.permute.xlu1 %1260 }
 0x1bf   : > { %v1259_v4 = vpop.permute.xlu0 %1258  ;;  %1336 = vst.msk [vmem:[#allocation2 + $0x78] sm:$0xff] %vm1320_vm12, %v1261_v3 }
 0x1c0   : > { %1335 = vst.msk [vmem:[#allocation2 + $0x70] sm:$0xff] %vm1320_vm12, %v1259_v4  ;;  %773 = vrot.lane.b32.xlu1 %v2676_v11, %s2338_s30 }
 0x1c1   : > { %771 = vrot.lane.b32.xlu0 %v2678_v12, %s2338_s30 }
 0x1c2   : > { %v884_v5 = vpop.permute.xlu1 %883 }
 0x1c3   : > { %v882_v9 = vpop.permute.xlu0 %881  ;;  %963 = vst.msk [vmem:[#allocation2 + $0x88] sm:$0xff] %vm945_vm8, %v884_v5 }
 0x1c4   : > { %962 = vst.msk [vmem:[#allocation2 + $0x80] sm:$0xff] %vm945_vm8, %v882_v9  ;;  %1280 = vrot.lane.b32.xlu1 %v2676_v11, %s2342_s29 }
 0x1c5   : > { %1278 = vrot.lane.b32.xlu0 %v2678_v12, %s2342_s29 }
 0x1c6   : > { %v1382_v1 = vpop.permute.xlu1 %1381 }
 0x1c7   : > { %v1380_v32 = vpop.permute.xlu0 %1379  ;;  %1458 = vst.msk [vmem:[#allocation2 + $0x77] sm:$0xff] %vm1443_vm15, %v1382_v1 }
 0x1c8   : > { %1457 = vst.msk [vmem:[#allocation2 + $0x6f] sm:$0xfe] %vm1441_vm14, %v1380_v32  ;;  %903 = vrot.lane.b32.xlu1 %v2676_v11, %s2339_s10 }
 0x1c9   : > { %901 = vrot.lane.b32.xlu0 %v2678_v12, %s2339_s10 }
 0x1ca   : > { %v1013_v33 = vpop.permute.xlu1 %1012 }
 0x1cb   : > { %v1011_v2 = vpop.permute.xlu0 %1010  ;;  %1093 = vst.msk [vmem:[#allocation2 + $0x87] sm:$0xff] %vm1076_vm10, %v1013_v33 }
 0x1cc   : > { %1092 = vst.msk [vmem:[#allocation2 + $0x7f] sm:$0xfe] %vm1074_vm9, %v1011_v2  ;;  %1401 = vrot.lane.b32.xlu1 %v2676_v11, %s2343_s8 }
 0x1cd   : > { %1399 = vrot.lane.b32.xlu0 %v2678_v12, %s2343_s8 }
 0x1ce   : > { %v1143_v16 = vpop.permute.xlu1 %1142  ;;  %v1488_v30 = vld [vmem:[#allocation2 + $0x78] sm:$0xff] }
 0x1cf   : > { %v1141_v28 = vpop.permute.xlu0 %1140  ;;  %v1487_v17 = vld [vmem:[#allocation2 + $0x70] sm:$0xff]  ;;  %1217 = vst.msk [vmem:[#allocation2 + $0x89] sm:$0x7f] %vm1200_vm13, %v1143_v16 }
 0x1d0   : > { %1216 = vst.msk [vmem:[#allocation2 + $0x81] sm:$0xff] %vm1198_vm11, %v1141_v28  ;;  %2255 = vmatprep.mubr.msk.f32.mxu0 %vm378_vm0, %v1487_v17  ;;  %1032 = vrot.lane.b32.xlu1 %v2676_v11, %s2340_s15 }
 0x1d1   : > { %1030 = vrot.lane.b32.xlu0 %v2678_v12, %s2340_s15  ;;  %2256 = vmatmul.mubr.msk.f32.gmra.mrb[14].mxu0 %vm378_vm0, %v1488_v30 }
 0x1d2   : > { %v758_v63 = vpop.permute.xlu1 %757 }
 0x1d3   : > { %v756_v18 = vpop.permute.xlu0 %755  ;;  %836 = vst.msk [vmem:[#allocation2 + $0x99] sm:$0x7f] %vm817_vm6, %v758_v63 }
 0x1d4   : > { %835 = vst.msk [vmem:[#allocation2 + $0x91] sm:$0xff] %vm815_vm7, %v756_v18  ;;  %1162 = vrot.lane.b32.xlu1 %v2680_v13, %s2341_s23 }
 0x1d5   : > { %1160 = vrot.lane.b32.xlu0 %v2682_v14, %s2341_s23 }
 0x1d6   : > { %v1265_v11 = vpop.permute.xlu1 %1264 }
 0x1d7   : > { %v1263_v6 = vpop.permute.xlu0 %1262  ;;  %1338 = vst.msk [vmem:[#allocation2 + $0x88] sm:$0xff] %vm1320_vm12, %v1265_v11 }
 0x1d8   : > { %1337 = vst.msk [vmem:[#allocation2 + $0x80] sm:$0xff] %vm1320_vm12, %v1263_v6  ;;  %777 = vrot.lane.b32.xlu1 %v2680_v13, %s2338_s30 }
 0x1d9   : > { %775 = vrot.lane.b32.xlu0 %v2682_v14, %s2338_s30 }
 0x1da   : > { %v888_v12 = vpop.permute.xlu1 %887 }
 0x1db   : > { %v886_v19 = vpop.permute.xlu0 %885  ;;  %965 = vst.msk [vmem:[#allocation2 + $0x98] sm:$0xff] %vm945_vm8, %v888_v12 }
 0x1dc   : > { %964 = vst.msk [vmem:[#allocation2 + $0x90] sm:$0xff] %vm945_vm8, %v886_v19  ;;  %1284 = vrot.lane.b32.xlu1 %v2680_v13, %s2342_s29 }
 0x1dd   : > { %1282 = vrot.lane.b32.xlu0 %v2682_v14, %s2342_s29 }
 0x1de   : > { %v1386_v22 = vpop.permute.xlu1 %1385 }
 0x1df   : > { %v1384_v34 = vpop.permute.xlu0 %1383  ;;  %1460 = vst.msk [vmem:[#allocation2 + $0x87] sm:$0xff] %vm1443_vm15, %v1386_v22 }
 0x1e0   : > { %1459 = vst.msk [vmem:[#allocation2 + $0x7f] sm:$0xfe] %vm1441_vm14, %v1384_v34  ;;  %907 = vrot.lane.b32.xlu1 %v2680_v13, %s2339_s10 }
 0x1e1   : > { %905 = vrot.lane.b32.xlu0 %v2682_v14, %s2339_s10 }
 0x1e2   : > { %v1017_v25 = vpop.permute.xlu1 %1016 }
 0x1e3   : > { %v1015_v26 = vpop.permute.xlu0 %1014  ;;  %1095 = vst.msk [vmem:[#allocation2 + $0x97] sm:$0xff] %vm1076_vm10, %v1017_v25 }
 0x1e4   : > { %1094 = vst.msk [vmem:[#allocation2 + $0x8f] sm:$0xfe] %vm1074_vm9, %v1015_v26  ;;  %1405 = vrot.lane.b32.xlu1 %v2680_v13, %s2343_s8 }
 0x1e5   : > { %1403 = vrot.lane.b32.xlu0 %v2682_v14, %s2343_s8 }
 0x1e6   : > { %v1147_v7 = vpop.permute.xlu1 %1146  ;;  %v1490_v38 = vld [vmem:[#allocation2 + $0x88] sm:$0xff] }
 0x1e7   : > { %v1145_v8 = vpop.permute.xlu0 %1144  ;;  %v1489_v31 = vld [vmem:[#allocation2 + $0x80] sm:$0xff]  ;;  %1219 = vst.msk [vmem:[#allocation2 + $0x99] sm:$0x7f] %vm1200_vm13, %v1147_v7 }
 0x1e8   : > { %1218 = vst.msk [vmem:[#allocation2 + $0x91] sm:$0xff] %vm1198_vm11, %v1145_v8  ;;  %2258 = vmatprep.mubr.msk.f32.mxu1 %vm378_vm0, %v1489_v31  ;;  %1036 = vrot.lane.b32.xlu1 %v2680_v13, %s2340_s15 }
 0x1e9   : > { %1034 = vrot.lane.b32.xlu0 %v2682_v14, %s2340_s15  ;;  %2259 = vmatmul.mubr.msk.f32.vlgmr.msra.gmra.mrb[0].mxu1 %vm378_vm0, %v1490_v38 }
 0x1ea   : > { %v762_v46 = vpop.permute.xlu1 %761 }
 0x1eb   : > { %v760_v41 = vpop.permute.xlu0 %759  ;;  %838 = vst.msk [vmem:[#allocation2 + $0xa9] sm:$0x7f] %vm817_vm6, %v762_v46 }
 0x1ec   : > { %837 = vst.msk [vmem:[#allocation2 + $0xa1] sm:$0xff] %vm815_vm7, %v760_v41  ;;  %1166 = vrot.lane.b32.xlu1 %v377_v39, %s2341_s23 }
 0x1ed   : > { %1164 = vrot.lane.b32.xlu0 %v376_v44, %s2341_s23 }
 0x1ee   : > { %v1269_v42 = vpop.permute.xlu1 %1268 }
 0x1ef   : > { %v1267_v47 = vpop.permute.xlu0 %1266  ;;  %1340 = vst.msk [vmem:[#allocation2 + $0x98] sm:$0xff] %vm1320_vm12, %v1269_v42 }
 0x1f0   : > { %1339 = vst.msk [vmem:[#allocation2 + $0x90] sm:$0xff] %vm1320_vm12, %v1267_v47  ;;  %1288 = vrot.lane.b32.xlu1 %v377_v39, %s2342_s29 }
 0x1f1   : > { %1286 = vrot.lane.b32.xlu0 %v376_v44, %s2342_s29 }
 0x1f2   : > { %v892_v13 = vpop.permute.xlu1 %891 }
 0x1f3   : > { %v890_v14 = vpop.permute.xlu0 %889  ;;  %967 = vst.msk [vmem:[#allocation2 + $0xa8] sm:$0xff] %vm945_vm8, %v892_v13 }
 0x1f4   : > { %966 = vst.msk [vmem:[#allocation2 + $0xa0] sm:$0xff] %vm945_vm8, %v890_v14  ;;  %1409 = vrot.lane.b32.xlu1 %v377_v39, %s2343_s8 }
 0x1f5   : > { %1407 = vrot.lane.b32.xlu0 %v376_v44, %s2343_s8 }
 0x1f6   : > { %v1390_v29 = vpop.permute.xlu1 %1389 }
 0x1f7   : > { %v1388_v48 = vpop.permute.xlu0 %1387  ;;  %1462 = vst.msk [vmem:[#allocation2 + $0x97] sm:$0xff] %vm1443_vm15, %v1390_v29 }
 0x1f8   : > { %1461 = vst.msk [vmem:[#allocation2 + $0x8f] sm:$0xfe] %vm1441_vm14, %v1388_v48  ;;  %781 = vrot.lane.b32.xlu1 %v377_v39, %s2338_s30 }
 0x1f9   : > { %779 = vrot.lane.b32.xlu0 %v376_v44, %s2338_s30 }
 0x1fa   : > { %v1021_v49 = vpop.permute.xlu1 %1020 }
 0x1fb   : > { %v1019_v40 = vpop.permute.xlu0 %1018  ;;  %1097 = vst.msk [vmem:[#allocation2 + $0xa7] sm:$0xff] %vm1076_vm10, %v1021_v49 }
 0x1fc   : > { %1096 = vst.msk [vmem:[#allocation2 + $0x9f] sm:$0xfe] %vm1074_vm9, %v1019_v40  ;;  %911 = vrot.lane.b32.xlu1 %v377_v39, %s2339_s10 }
 0x1fd   : > { %909 = vrot.lane.b32.xlu0 %v376_v44, %s2339_s10 }
 0x1fe   : > { %v1151_v45 = vpop.permute.xlu1 %1150  ;;  %v1492_v53 = vld [vmem:[#allocation2 + $0x98] sm:$0xff] }
 0x1ff   : > { %v1149_v50 = vpop.permute.xlu0 %1148  ;;  %v1491_v51 = vld [vmem:[#allocation2 + $0x90] sm:$0xff]  ;;  %1221 = vst.msk [vmem:[#allocation2 + $0xa9] sm:$0x7f] %vm1200_vm13, %v1151_v45 }
 0x200   : > { %1220 = vst.msk [vmem:[#allocation2 + $0xa1] sm:$0xff] %vm1198_vm11, %v1149_v50  ;;  %2261 = vmatprep.mubr.msk.f32.mxu1 %vm378_vm0, %v1491_v51  ;;  %v2236_v10 = vpop.f32.mrb[0].mxu0  ;;  %1040 = vrot.lane.b32.xlu1 %v377_v39, %s2340_s15 }
 0x201   : > { %1038 = vrot.lane.b32.xlu0 %v376_v44, %s2340_s15  ;;  %v1837_v52 = vsel %vm412_vm1, %v2236_v10, 0.0  ;;  %v1908_v56 = vmul.f32 %v2236_v10, %v2236_v10  ;;  %2010 = vst.msk [vmem:[%s3398_s16 + $0x8] sm:$0xff] %vm412_vm1, %v2236_v10  ;;  %v1676_v15 = vpop.f32.mrb[1].mxu0  ;;  %2262 = vmatmul.mubr.msk.f32.gmra.mrb[2].mxu1 %vm378_vm0, %v1492_v53  ;;  %s3552_s15 = scalar_lea.vmem %s3623_s5, %s2136_s20 }
 0x202   : > { %v1836_v35 = vsel %vm412_vm1, %v1676_v15, 0.0  ;;  %v1907_v54 = vmul.f32 %v1676_v15, %v1676_v15  ;;  %2009 = vst.msk [vmem:[%s3398_s16] sm:$0xff] %vm412_vm1, %v1676_v15  ;;  %v766_v55 = vpop.permute.xlu1 %765  ;;  %1835 = vst.msk [vmem:[%s3552_s15] sm:$0xff] %vm412_vm1, %v2335_v0 }
 0x203   : > { %v764_v57 = vpop.permute.xlu0 %763  ;;  %v1940_v58 = vsel %vm412_vm1, %v1908_v56, 0.0  ;;  %v1838_v59 = vadd.f32 %v1837_v52, %v1836_v35  ;;  %840 = vst.msk [vmem:[#allocation2 + $0xb9] sm:$0x7f] %vm817_vm6, %v766_v55 }
 0x204   : > { %839 = vst.msk [vmem:[#allocation2 + $0xb1] sm:$0xff] %vm815_vm7, %v764_v57  ;;  %v1939_v60 = vsel %vm412_vm1, %v1907_v54, 0.0 }
 0x205   : > { %v1941_v61 = vadd.f32 %v1940_v58, %v1939_v60 }
 0x206   : > { %v1273_v62 = vpop.permute.xlu1 %1272 }
 0x207   : > { %v1271_v3 = vpop.permute.xlu0 %1270  ;;  %1342 = vst.msk [vmem:[#allocation2 + $0xa8] sm:$0xff] %vm1320_vm12, %v1273_v62 }
 0x208   : > { %1341 = vst.msk [vmem:[#allocation2 + $0xa0] sm:$0xff] %vm1320_vm12, %v1271_v3 }
 0x20a   : > { %v896_v4 = vpop.permute.xlu1 %895 }
 0x20b   : > { %v894_v5 = vpop.permute.xlu0 %893  ;;  %969 = vst.msk [vmem:[#allocation2 + $0xb8] sm:$0xff] %vm945_vm8, %v896_v4 }
 0x20c   : > { %968 = vst.msk [vmem:[#allocation2 + $0xb0] sm:$0xff] %vm945_vm8, %v894_v5 }
 0x20e   : > { %v1394_v9 = vpop.permute.xlu1 %1393 }
 0x20f   : > { %v1392_v1 = vpop.permute.xlu0 %1391  ;;  %1464 = vst.msk [vmem:[#allocation2 + $0xa7] sm:$0xff] %vm1443_vm15, %v1394_v9 }
 0x210   : > { %1463 = vst.msk [vmem:[#allocation2 + $0x9f] sm:$0xfe] %vm1441_vm14, %v1392_v1 }
 0x212   : > { %v1025_v32 = vpop.permute.xlu1 %1024 }
 0x213   : > { %v1023_v33 = vpop.permute.xlu0 %1022  ;;  %1099 = vst.msk [vmem:[#allocation2 + $0xb7] sm:$0xff] %vm1076_vm10, %v1025_v32 }
 0x214   : > { %1098 = vst.msk [vmem:[#allocation2 + $0xaf] sm:$0xfe] %vm1074_vm9, %v1023_v33  ;;  %v2239_v2 = vpop.f32.mrb[2].mxu0 }
 0x215   : > { %2012 = vst.msk [vmem:[%s3398_s16 + $0x18] sm:$0xff] %vm412_vm1, %v2239_v2  ;;  %v1686_v16 = vpop.f32.mrb[3].mxu0  ;;  %v1910_v28 = vmul.f32 %v2239_v2, %v2239_v2  ;;  %v1841_v19 = vsel %vm412_vm1, %v2239_v2, 0.0 }
 0x216   : > { %v1839_v17 = vsel %vm412_vm1, %v1686_v16, 0.0  ;;  %v1909_v30 = vmul.f32 %v1686_v16, %v1686_v16  ;;  %2011 = vst.msk [vmem:[%s3398_s16 + $0x10] sm:$0xff] %vm412_vm1, %v1686_v16  ;;  %v1155_v63 = vpop.permute.xlu1 %1154  ;;  %v1494_v6 = vld [vmem:[#allocation2 + $0xa8] sm:$0xff] }
 0x217   : > { %v1153_v18 = vpop.permute.xlu0 %1152  ;;  %v1493_v11 = vld [vmem:[#allocation2 + $0xa0] sm:$0xff]  ;;  %v1840_v12 = vadd.f32 %v1839_v17, %v1838_v59  ;;  %1223 = vst.msk [vmem:[#allocation2 + $0xb9] sm:$0x7f] %vm1200_vm13, %v1155_v63  ;;  %v1944_v34 = vsel %vm412_vm1, %v1910_v28, 0.0 }
 0x218   : > { %1222 = vst.msk [vmem:[#allocation2 + $0xb1] sm:$0xff] %vm1198_vm11, %v1153_v18  ;;  %2264 = vmatprep.mubr.msk.f32.mxu1 %vm378_vm0, %v1493_v11  ;;  %v1942_v20 = vsel %vm412_vm1, %v1909_v30, 0.0 }
 0x219   : > { %2265 = vmatmul.mubr.msk.f32.gmra.mrb[4].mxu1 %vm378_vm0, %v1494_v6  ;;  %v1943_v21 = vadd.f32 %v1942_v20, %v1941_v61  ;;  %v1842_v22 = vadd.f32 %v1841_v19, %v1840_v12 }
 0x21a   : > { %v770_v43 = vpop.permute.xlu1 %769 }
 0x21b   : > { %v768_v23 = vpop.permute.xlu0 %767  ;;  %842 = vst.msk [vmem:[#allocation2 + $0xc9] sm:$0x7f] %vm817_vm6, %v770_v43  ;;  %v1945_v24 = vadd.f32 %v1944_v34, %v1943_v21 }
 0x21c   : > { %841 = vst.msk [vmem:[#allocation2 + $0xc1] sm:$0xff] %vm815_vm7, %v768_v23 }
 0x21e   : > { %v1277_v25 = vpop.permute.xlu1 %1276 }
 0x21f   : > { %v1275_v26 = vpop.permute.xlu0 %1274  ;;  %1344 = vst.msk [vmem:[#allocation2 + $0xb8] sm:$0xff] %vm1320_vm12, %v1277_v25 }
 0x220   : > { %1343 = vst.msk [vmem:[#allocation2 + $0xb0] sm:$0xff] %vm1320_vm12, %v1275_v26 }
 0x222   : > { %v900_v36 = vpop.permute.xlu1 %899 }
 0x223   : > { %v898_v37 = vpop.permute.xlu0 %897  ;;  %971 = vst.msk [vmem:[#allocation2 + $0xc8] sm:$0xff] %vm945_vm8, %v900_v36 }
 0x224   : > { %970 = vst.msk [vmem:[#allocation2 + $0xc0] sm:$0xff] %vm945_vm8, %v898_v37 }
 0x226   : > { %v1398_v27 = vpop.permute.xlu1 %1397 }
 0x227   : > { %v1396_v7 = vpop.permute.xlu0 %1395  ;;  %1466 = vst.msk [vmem:[#allocation2 + $0xb7] sm:$0xff] %vm1443_vm15, %v1398_v27 }
 0x228   : > { %1465 = vst.msk [vmem:[#allocation2 + $0xaf] sm:$0xfe] %vm1441_vm14, %v1396_v7 }
 0x22a   : > { %v1029_v8 = vpop.permute.xlu1 %1028 }
 0x22b   : > { %v1027_v31 = vpop.permute.xlu0 %1026  ;;  %1101 = vst.msk [vmem:[#allocation2 + $0xc7] sm:$0xff] %vm1076_vm10, %v1029_v8 }
 0x22c   : > { %1100 = vst.msk [vmem:[#allocation2 + $0xbf] sm:$0xfe] %vm1074_vm9, %v1027_v31  ;;  %v2242_v38 = vpop.f32.mrb[4].mxu0 }
 0x22d   : > { %2014 = vst.msk [vmem:[%s3398_s16 + $0x28] sm:$0xff] %vm412_vm1, %v2242_v38  ;;  %v1696_v39 = vpop.f32.mrb[5].mxu0  ;;  %v1912_v44 = vmul.f32 %v2242_v38, %v2242_v38  ;;  %v1845_v48 = vsel %vm412_vm1, %v2242_v38, 0.0 }
 0x22e   : > { %v1843_v46 = vsel %vm412_vm1, %v1696_v39, 0.0  ;;  %v1911_v41 = vmul.f32 %v1696_v39, %v1696_v39  ;;  %2013 = vst.msk [vmem:[%s3398_s16 + $0x20] sm:$0xff] %vm412_vm1, %v1696_v39  ;;  %v1159_v42 = vpop.permute.xlu1 %1158  ;;  %v1496_v14 = vld [vmem:[#allocation2 + $0xb8] sm:$0xff] }
 0x22f   : > { %v1157_v47 = vpop.permute.xlu0 %1156  ;;  %v1495_v13 = vld [vmem:[#allocation2 + $0xb0] sm:$0xff]  ;;  %v1844_v29 = vadd.f32 %v1843_v46, %v1842_v22  ;;  %1225 = vst.msk [vmem:[#allocation2 + $0xc9] sm:$0x7f] %vm1200_vm13, %v1159_v42  ;;  %v1948_v50 = vsel %vm412_vm1, %v1912_v44, 0.0 }
 0x230   : > { %1224 = vst.msk [vmem:[#allocation2 + $0xc1] sm:$0xff] %vm1198_vm11, %v1157_v47  ;;  %2267 = vmatprep.mubr.msk.f32.mxu1 %vm378_vm0, %v1495_v13  ;;  %v1946_v49 = vsel %vm412_vm1, %v1911_v41, 0.0 }
 0x231   : > { %2268 = vmatmul.mubr.msk.f32.gmra.mrb[6].mxu1 %vm378_vm0, %v1496_v14  ;;  %v1947_v40 = vadd.f32 %v1946_v49, %v1945_v24  ;;  %v1846_v45 = vadd.f32 %v1845_v48, %v1844_v29 }
 0x232   : > { %v774_v51 = vpop.permute.xlu1 %773 }
 0x233   : > { %v772_v53 = vpop.permute.xlu0 %771  ;;  %844 = vst.msk [vmem:[#allocation2 + $0xd9] sm:$0x7f] %vm817_vm6, %v774_v51  ;;  %v1949_v10 = vadd.f32 %v1948_v50, %v1947_v40 }
 0x234   : > { %843 = vst.msk [vmem:[#allocation2 + $0xd1] sm:$0xff] %vm815_vm7, %v772_v53 }
 0x236   : > { %v1281_v52 = vpop.permute.xlu1 %1280 }
 0x237   : > { %v1279_v56 = vpop.permute.xlu0 %1278  ;;  %1346 = vst.msk [vmem:[#allocation2 + $0xc8] sm:$0xff] %vm1320_vm12, %v1281_v52 }
 0x238   : > { %1345 = vst.msk [vmem:[#allocation2 + $0xc0] sm:$0xff] %vm1320_vm12, %v1279_v56 }
 0x23a   : > { %v904_v15 = vpop.permute.xlu1 %903 }
 0x23b   : > { %v902_v35 = vpop.permute.xlu0 %901  ;;  %973 = vst.msk [vmem:[#allocation2 + $0xd8] sm:$0xff] %vm945_vm8, %v904_v15 }
 0x23c   : > { %972 = vst.msk [vmem:[#allocation2 + $0xd0] sm:$0xff] %vm945_vm8, %v902_v35 }
 0x23e   : > { %v1402_v54 = vpop.permute.xlu1 %1401 }
 0x23f   : > { %v1400_v55 = vpop.permute.xlu0 %1399  ;;  %1468 = vst.msk [vmem:[#allocation2 + $0xc7] sm:$0xff] %vm1443_vm15, %v1402_v54 }
 0x240   : > { %1467 = vst.msk [vmem:[#allocation2 + $0xbf] sm:$0xfe] %vm1441_vm14, %v1400_v55 }
 0x242   : > { %v1033_v57 = vpop.permute.xlu1 %1032 }
 0x243   : > { %v1031_v58 = vpop.permute.xlu0 %1030  ;;  %1103 = vst.msk [vmem:[#allocation2 + $0xd7] sm:$0xff] %vm1076_vm10, %v1033_v57 }
 0x244   : > { %1102 = vst.msk [vmem:[#allocation2 + $0xcf] sm:$0xfe] %vm1074_vm9, %v1031_v58  ;;  %v2245_v59 = vpop.f32.mrb[6].mxu0 }
 0x245   : > { %2016 = vst.msk [vmem:[%s3398_s16 + $0x38] sm:$0xff] %vm412_vm1, %v2245_v59  ;;  %v1706_v60 = vpop.f32.mrb[7].mxu0  ;;  %v1914_v61 = vmul.f32 %v2245_v59, %v2245_v59  ;;  %v1849_v33 = vsel %vm412_vm1, %v2245_v59, 0.0 }
 0x246   : > { %v1847_v62 = vsel %vm412_vm1, %v1706_v60, 0.0  ;;  %v1913_v3 = vmul.f32 %v1706_v60, %v1706_v60  ;;  %2015 = vst.msk [vmem:[%s3398_s16 + $0x30] sm:$0xff] %vm412_vm1, %v1706_v60  ;;  %v1163_v4 = vpop.permute.xlu1 %1162  ;;  %v1498_v1 = vld [vmem:[#allocation2 + $0xc8] sm:$0xff] }
 0x247   : > { %v1161_v5 = vpop.permute.xlu0 %1160  ;;  %v1497_v9 = vld [vmem:[#allocation2 + $0xc0] sm:$0xff]  ;;  %v1848_v32 = vadd.f32 %v1847_v62, %v1846_v45  ;;  %1227 = vst.msk [vmem:[#allocation2 + $0xd9] sm:$0x7f] %vm1200_vm13, %v1163_v4  ;;  %v1952_v17 = vsel %vm412_vm1, %v1914_v61, 0.0 }
 0x248   : > { %1226 = vst.msk [vmem:[#allocation2 + $0xd1] sm:$0xff] %vm1198_vm11, %v1161_v5  ;;  %2270 = vmatprep.mubr.msk.f32.mxu1 %vm378_vm0, %v1497_v9  ;;  %v1950_v2 = vsel %vm412_vm1, %v1913_v3, 0.0 }
 0x249   : > { %2271 = vmatmul.mubr.msk.f32.gmra.mrb[8].mxu1 %vm378_vm0, %v1498_v1  ;;  %v1951_v16 = vadd.f32 %v1950_v2, %v1949_v10  ;;  %v1850_v28 = vadd.f32 %v1849_v33, %v1848_v32 }
 0x24a   : > { %v778_v30 = vpop.permute.xlu1 %777 }
 0x24b   : > { %v776_v63 = vpop.permute.xlu0 %775  ;;  %846 = vst.msk [vmem:[#allocation2 + $0xe9] sm:$0x7f] %vm817_vm6, %v778_v30  ;;  %v1953_v18 = vadd.f32 %v1952_v17, %v1951_v16 }
 0x24c   : > { %845 = vst.msk [vmem:[#allocation2 + $0xe1] sm:$0xff] %vm815_vm7, %v776_v63 }
 0x24e   : > { %v1285_v11 = vpop.permute.xlu1 %1284 }
 0x24f   : > { %v1283_v6 = vpop.permute.xlu0 %1282  ;;  %1348 = vst.msk [vmem:[#allocation2 + $0xd8] sm:$0xff] %vm1320_vm12, %v1285_v11 }
 0x250   : > { %1347 = vst.msk [vmem:[#allocation2 + $0xd0] sm:$0xff] %vm1320_vm12, %v1283_v6 }
 0x252   : > { %v908_v12 = vpop.permute.xlu1 %907 }
 0x253   : > { %v906_v19 = vpop.permute.xlu0 %905  ;;  %975 = vst.msk [vmem:[#allocation2 + $0xe8] sm:$0xff] %vm945_vm8, %v908_v12 }
 0x254   : > { %974 = vst.msk [vmem:[#allocation2 + $0xe0] sm:$0xff] %vm945_vm8, %v906_v19 }
 0x256   : > { %v1406_v20 = vpop.permute.xlu1 %1405 }
 0x257   : > { %v1404_v21 = vpop.permute.xlu0 %1403  ;;  %1470 = vst.msk [vmem:[#allocation2 + $0xd7] sm:$0xff] %vm1443_vm15, %v1406_v20 }
 0x258   : > { %1469 = vst.msk [vmem:[#allocation2 + $0xcf] sm:$0xfe] %vm1441_vm14, %v1404_v21 }
 0x25a   : > { %v1037_v22 = vpop.permute.xlu1 %1036 }
 0x25b   : > { %v1035_v34 = vpop.permute.xlu0 %1034  ;;  %1105 = vst.msk [vmem:[#allocation2 + $0xe7] sm:$0xff] %vm1076_vm10, %v1037_v22 }
 0x25c   : > { %1104 = vst.msk [vmem:[#allocation2 + $0xdf] sm:$0xfe] %vm1074_vm9, %v1035_v34  ;;  %v2248_v43 = vpop.f32.mrb[8].mxu0 }
 0x25d   : > { %2018 = vst.msk [vmem:[%s3398_s16 + $0x48] sm:$0xff] %vm412_vm1, %v2248_v43  ;;  %v1716_v23 = vpop.f32.mrb[9].mxu0  ;;  %v1916_v24 = vmul.f32 %v2248_v43, %v2248_v43  ;;  %v1853_v31 = vsel %vm412_vm1, %v2248_v43, 0.0 }
 0x25e   : > { %v1851_v25 = vsel %vm412_vm1, %v1716_v23, 0.0  ;;  %v1915_v26 = vmul.f32 %v1716_v23, %v1716_v23  ;;  %2017 = vst.msk [vmem:[%s3398_s16 + $0x40] sm:$0xff] %vm412_vm1, %v1716_v23  ;;  %v1167_v36 = vpop.permute.xlu1 %1166  ;;  %v1500_v7 = vld [vmem:[#allocation2 + $0xd8] sm:$0xff] }
 0x25f   : > { %v1165_v37 = vpop.permute.xlu0 %1164  ;;  %v1499_v27 = vld [vmem:[#allocation2 + $0xd0] sm:$0xff]  ;;  %v1852_v8 = vadd.f32 %v1851_v25, %v1850_v28  ;;  %1229 = vst.msk [vmem:[#allocation2 + $0xe9] sm:$0x7f] %vm1200_vm13, %v1167_v36  ;;  %v1956_v46 = vsel %vm412_vm1, %v1916_v24, 0.0 }
 0x260   : > { %1228 = vst.msk [vmem:[#allocation2 + $0xe1] sm:$0xff] %vm1198_vm11, %v1165_v37  ;;  %2273 = vmatprep.mubr.msk.f32.mxu1 %vm378_vm0, %v1499_v27  ;;  %v1954_v38 = vsel %vm412_vm1, %v1915_v26, 0.0 }
 0x261   : > { %2274 = vmatmul.mubr.msk.f32.gmra.mrb[10].mxu1 %vm378_vm0, %v1500_v7  ;;  %v1955_v39 = vadd.f32 %v1954_v38, %v1953_v18  ;;  %v1854_v44 = vadd.f32 %v1853_v31, %v1852_v8 }
 0x262   : > { %v1289_v41 = vpop.permute.xlu1 %1288 }
 0x263   : > { %v1287_v42 = vpop.permute.xlu0 %1286  ;;  %1350 = vst.msk [vmem:[#allocation2 + $0xe8] sm:$0xff] %vm1320_vm12, %v1289_v41  ;;  %v1957_v47 = vadd.f32 %v1956_v46, %v1955_v39 }
 0x264   : > { %1349 = vst.msk [vmem:[#allocation2 + $0xe0] sm:$0xff] %vm1320_vm12, %v1287_v42 }
 0x266   : > { %v1410_v13 = vpop.permute.xlu1 %1409 }
 0x267   : > { %v1408_v14 = vpop.permute.xlu0 %1407  ;;  %1472 = vst.msk [vmem:[#allocation2 + $0xe7] sm:$0xff] %vm1443_vm15, %v1410_v13 }
 0x268   : > { %1471 = vst.msk [vmem:[#allocation2 + $0xdf] sm:$0xfe] %vm1441_vm14, %v1408_v14 }
 0x26a   : > { %v782_v29 = vpop.permute.xlu1 %781 }
 0x26b   : > { %v780_v48 = vpop.permute.xlu0 %779  ;;  %848 = vst.msk [vmem:[#allocation2 + $0xf9] sm:$0x7f] %vm817_vm6, %v782_v29 }
 0x26c   : > { %847 = vst.msk [vmem:[#allocation2 + $0xf1] sm:$0xff] %vm815_vm7, %v780_v48 }
 0x26e   : > { %v912_v49 = vpop.permute.xlu1 %911  ;;  %v1502_v50 = vld [vmem:[#allocation2 + $0xe8] sm:$0xff] }
 0x26f   : > { %v910_v40 = vpop.permute.xlu0 %909  ;;  %v1501_v45 = vld [vmem:[#allocation2 + $0xe0] sm:$0xff]  ;;  %977 = vst.msk [vmem:[#allocation2 + $0xf8] sm:$0xff] %vm945_vm8, %v912_v49 }
 0x270   : > { %976 = vst.msk [vmem:[#allocation2 + $0xf0] sm:$0xff] %vm945_vm8, %v910_v40  ;;  %2276 = vmatprep.mubr.msk.f32.mxu1 %vm378_vm0, %v1501_v45 }
 0x271   : > { %2277 = vmatmul.mubr.msk.f32.gmra.mrb[12].mxu1 %vm378_vm0, %v1502_v50 }
 0x272   : > { %v1041_v51 = vpop.permute.xlu1 %1040 }
 0x273   : > { %v1039_v53 = vpop.permute.xlu0 %1038  ;;  %1107 = vst.msk [vmem:[#allocation2 + $0xf7] sm:$0xff] %vm1076_vm10, %v1041_v51 }
 0x274   : > { %1106 = vst.msk [vmem:[#allocation2 + $0xef] sm:$0xfe] %vm1074_vm9, %v1039_v53  ;;  %v2251_v10 = vpop.f32.mrb[10].mxu0 }
 0x275   : > { %2020 = vst.msk [vmem:[%s3398_s16 + $0x58] sm:$0xff] %vm412_vm1, %v2251_v10  ;;  %v1726_v52 = vpop.f32.mrb[11].mxu0  ;;  %v1918_v56 = vmul.f32 %v2251_v10, %v2251_v10  ;;  %v1857_v55 = vsel %vm412_vm1, %v2251_v10, 0.0 }
 0x276   : > { %v1855_v15 = vsel %vm412_vm1, %v1726_v52, 0.0  ;;  %v1917_v35 = vmul.f32 %v1726_v52, %v1726_v52  ;;  %2019 = vst.msk [vmem:[%s3398_s16 + $0x50] sm:$0xff] %vm412_vm1, %v1726_v52 }
 0x277   : > { %v1856_v54 = vadd.f32 %v1855_v15, %v1854_v44  ;;  %v1960_v60 = vsel %vm412_vm1, %v1918_v56, 0.0 }
 0x278   : > { %v1958_v57 = vsel %vm412_vm1, %v1917_v35, 0.0 }
 0x279   : > { %v1959_v58 = vadd.f32 %v1958_v57, %v1957_v47  ;;  %v1858_v59 = vadd.f32 %v1857_v55, %v1856_v54 }
 0x27a   : > { %v1504_v62 = vld [vmem:[#allocation2 + $0xf8] sm:$0xff] }
 0x27b   : > { %v1503_v61 = vld [vmem:[#allocation2 + $0xf0] sm:$0xff]  ;;  %v1961_v3 = vadd.f32 %v1960_v60, %v1959_v58 }
 0x27c   : > { %2279 = vmatprep.mubr.msk.f32.mxu1 %vm378_vm0, %v1503_v61 }
 0x27d   : > { %2280 = vmatmul.mubr.msk.f32.gmra.mrb[14].mxu1 %vm378_vm0, %v1504_v62  ;;  %vm1905_vm0 = vcmask 57344  }
 0x28c   : > { %v2254_v4 = vpop.f32.mrb[12].mxu0 }
 0x28d   : > { %2022 = vst.msk [vmem:[%s3398_s16 + $0x68] sm:$0xff] %vm412_vm1, %v2254_v4  ;;  %v1736_v5 = vpop.f32.mrb[13].mxu0  ;;  %v1920_v9 = vmul.f32 %v2254_v4, %v2254_v4  ;;  %v1861_v2 = vsel %vm412_vm1, %v2254_v4, 0.0 }
 0x28e   : > { %v1859_v1 = vsel %vm412_vm1, %v1736_v5, 0.0  ;;  %v1919_v32 = vmul.f32 %v1736_v5, %v1736_v5  ;;  %2021 = vst.msk [vmem:[%s3398_s16 + $0x60] sm:$0xff] %vm412_vm1, %v1736_v5 }
 0x28f   : > { %v1860_v33 = vadd.f32 %v1859_v1, %v1858_v59  ;;  %v1964_v30 = vsel %vm412_vm1, %v1920_v9, 0.0 }
 0x290   : > { %v1962_v16 = vsel %vm412_vm1, %v1919_v32, 0.0 }
 0x291   : > { %v1963_v28 = vadd.f32 %v1962_v16, %v1961_v3  ;;  %v1862_v17 = vadd.f32 %v1861_v2, %v1860_v33 }
 0x293   : > { %v1965_v63 = vadd.f32 %v1964_v30, %v1963_v28 }
 0x2a4   : > { %v2257_v18 = vpop.f32.mrb[14].mxu0 }
 0x2a5   : > { %2024 = vst.msk [vmem:[%s3398_s16 + $0x78] sm:$0xff] %vm412_vm1, %v2257_v18  ;;  %v1746_v11 = vpop.f32.mrb[15].mxu0  ;;  %v1922_v6 = vmul.f32 %v2257_v18, %v2257_v18  ;;  %v1865_v21 = vsel %vm412_vm1, %v2257_v18, 0.0 }
 0x2a6   : > { %v1863_v12 = vsel %vm412_vm1, %v1746_v11, 0.0  ;;  %v1921_v19 = vmul.f32 %v1746_v11, %v1746_v11  ;;  %2023 = vst.msk [vmem:[%s3398_s16 + $0x70] sm:$0xff] %vm412_vm1, %v1746_v11 }
 0x2a7   : > { %v1864_v20 = vadd.f32 %v1863_v12, %v1862_v17  ;;  %v1968_v23 = vsel %vm412_vm1, %v1922_v6, 0.0 }
 0x2a8   : > { %v1966_v22 = vsel %vm412_vm1, %v1921_v19, 0.0 }
 0x2a9   : > { %v1866_v34 = vadd.f32 %v1865_v21, %v1864_v20  ;;  %v1967_v43 = vadd.f32 %v1966_v22, %v1965_v63 }
 0x2ab   : > { %v1969_v24 = vadd.f32 %v1968_v23, %v1967_v43 }
 0x2bc   : > { %v2260_v25 = vpop.f32.mrb[0].mxu1 }
 0x2bd   : > { %2026 = vst.msk [vmem:[%s3398_s16 + $0x88] sm:$0xff] %vm412_vm1, %v2260_v25  ;;  %v1756_v26 = vpop.f32.mrb[1].mxu1  ;;  %v1924_v36 = vmul.f32 %v2260_v25, %v2260_v25  ;;  %v1869_v8 = vsel %vm412_vm1, %v2260_v25, 0.0 }
 0x2be   : > { %v1867_v37 = vsel %vm412_vm1, %v1756_v26, 0.0  ;;  %v1923_v27 = vmul.f32 %v1756_v26, %v1756_v26  ;;  %2025 = vst.msk [vmem:[%s3398_s16 + $0x80] sm:$0xff] %vm412_vm1, %v1756_v26 }
 0x2bf   : > { %v1868_v7 = vadd.f32 %v1867_v37, %v1866_v34  ;;  %v1972_v44 = vsel %vm412_vm1, %v1924_v36, 0.0 }
 0x2c0   : > { %v1970_v31 = vsel %vm412_vm1, %v1923_v27, 0.0 }
 0x2c1   : > { %v1971_v38 = vadd.f32 %v1970_v31, %v1969_v24  ;;  %v1870_v39 = vadd.f32 %v1869_v8, %v1868_v7 }
 0x2c3   : > { %v1973_v46 = vadd.f32 %v1972_v44, %v1971_v38 }
 0x2d4   : > { %v2263_v41 = vpop.f32.mrb[2].mxu1 }
 0x2d5   : > { %2028 = vst.msk [vmem:[%s3398_s16 + $0x98] sm:$0xff] %vm412_vm1, %v2263_v41  ;;  %v1766_v42 = vpop.f32.mrb[3].mxu1  ;;  %v1926_v47 = vmul.f32 %v2263_v41, %v2263_v41  ;;  %v1873_v48 = vsel %vm412_vm1, %v2263_v41, 0.0 }
 0x2d6   : > { %v1871_v13 = vsel %vm412_vm1, %v1766_v42, 0.0  ;;  %v1925_v14 = vmul.f32 %v1766_v42, %v1766_v42  ;;  %2027 = vst.msk [vmem:[%s3398_s16 + $0x90] sm:$0xff] %vm412_vm1, %v1766_v42 }
 0x2d7   : > { %v1872_v29 = vadd.f32 %v1871_v13, %v1870_v39  ;;  %v1976_v50 = vsel %vm412_vm1, %v1926_v47, 0.0 }
 0x2d8   : > { %v1974_v49 = vsel %vm412_vm1, %v1925_v14, 0.0 }
 0x2d9   : > { %v1975_v40 = vadd.f32 %v1974_v49, %v1973_v46  ;;  %v1874_v45 = vadd.f32 %v1873_v48, %v1872_v29 }
 0x2db   : > { %v1977_v0 = vadd.f32 %v1976_v50, %v1975_v40 }
 0x2ec   : > { %v2266_v51 = vpop.f32.mrb[4].mxu1 }
 0x2ed   : > { %2030 = vst.msk [vmem:[%s3398_s16 + $0xa8] sm:$0xff] %vm412_vm1, %v2266_v51  ;;  %v1776_v53 = vpop.f32.mrb[5].mxu1  ;;  %v1928_v10 = vmul.f32 %v2266_v51, %v2266_v51  ;;  %v1877_v35 = vsel %vm412_vm1, %v2266_v51, 0.0 }
 0x2ee   : > { %v1875_v52 = vsel %vm412_vm1, %v1776_v53, 0.0  ;;  %v1927_v56 = vmul.f32 %v1776_v53, %v1776_v53  ;;  %2029 = vst.msk [vmem:[%s3398_s16 + $0xa0] sm:$0xff] %vm412_vm1, %v1776_v53 }
 0x2ef   : > { %v1876_v15 = vadd.f32 %v1875_v52, %v1874_v45  ;;  %v1980_v58 = vsel %vm412_vm1, %v1928_v10, 0.0 }
 0x2f0   : > { %v1978_v54 = vsel %vm412_vm1, %v1927_v56, 0.0 }
 0x2f1   : > { %v1979_v55 = vadd.f32 %v1978_v54, %v1977_v0  ;;  %v1878_v57 = vadd.f32 %v1877_v35, %v1876_v15 }
 0x2f3   : > { %v1981_v59 = vadd.f32 %v1980_v58, %v1979_v55 }
 0x304   : > { %v2269_v60 = vpop.f32.mrb[6].mxu1 }
 0x305   : > { %2032 = vst.msk [vmem:[%s3398_s16 + $0xb8] sm:$0xff] %vm412_vm1, %v2269_v60  ;;  %v1786_v61 = vpop.f32.mrb[7].mxu1  ;;  %v1930_v62 = vmul.f32 %v2269_v60, %v2269_v60  ;;  %v1881_v9 = vsel %vm412_vm1, %v2269_v60, 0.0 }
 0x306   : > { %v1879_v3 = vsel %vm412_vm1, %v1786_v61, 0.0  ;;  %v1929_v4 = vmul.f32 %v1786_v61, %v1786_v61  ;;  %2031 = vst.msk [vmem:[%s3398_s16 + $0xb0] sm:$0xff] %vm412_vm1, %v1786_v61 }
 0x307   : > { %v1880_v5 = vadd.f32 %v1879_v3, %v1878_v57  ;;  %v1984_v2 = vsel %vm412_vm1, %v1930_v62, 0.0 }
 0x308   : > { %v1982_v1 = vsel %vm412_vm1, %v1929_v4, 0.0 }
 0x309   : > { %v1983_v32 = vadd.f32 %v1982_v1, %v1981_v59  ;;  %v1882_v33 = vadd.f32 %v1881_v9, %v1880_v5 }
 0x30b   : > { %v1985_v16 = vadd.f32 %v1984_v2, %v1983_v32 }
 0x31c   : > { %v2272_v28 = vpop.f32.mrb[8].mxu1 }
 0x31d   : > { %2034 = vst.msk [vmem:[%s3398_s16 + $0xc8] sm:$0xff] %vm412_vm1, %v2272_v28  ;;  %v1796_v17 = vpop.f32.mrb[9].mxu1  ;;  %v1932_v30 = vmul.f32 %v2272_v28, %v2272_v28  ;;  %v1885_v6 = vsel %vm412_vm1, %v2272_v28, 0.0 }
 0x31e   : > { %v1883_v63 = vsel %vm412_vm1, %v1796_v17, 0.0  ;;  %v1931_v18 = vmul.f32 %v1796_v17, %v1796_v17  ;;  %2033 = vst.msk [vmem:[%s3398_s16 + $0xc0] sm:$0xff] %vm412_vm1, %v1796_v17 }
 0x31f   : > { %v1884_v11 = vadd.f32 %v1883_v63, %v1882_v33  ;;  %v1988_v21 = vsel %vm412_vm1, %v1932_v30, 0.0 }
 0x320   : > { %v1986_v12 = vsel %vm412_vm1, %v1931_v18, 0.0 }
 0x321   : > { %v1987_v19 = vadd.f32 %v1986_v12, %v1985_v16  ;;  %v1886_v20 = vadd.f32 %v1885_v6, %v1884_v11 }
 0x323   : > { %v1989_v22 = vadd.f32 %v1988_v21, %v1987_v19 }
 0x334   : > { %v2275_v34 = vpop.f32.mrb[10].mxu1 }
 0x335   : > { %2036 = vst.msk [vmem:[%s3398_s16 + $0xd8] sm:$0xff] %vm412_vm1, %v2275_v34  ;;  %v1806_v43 = vpop.f32.mrb[11].mxu1  ;;  %v1934_v23 = vmul.f32 %v2275_v34, %v2275_v34  ;;  %v1889_v36 = vsel %vm412_vm1, %v2275_v34, 0.0 }
 0x336   : > { %v1887_v24 = vsel %vm412_vm1, %v1806_v43, 0.0  ;;  %v1933_v25 = vmul.f32 %v1806_v43, %v1806_v43  ;;  %2035 = vst.msk [vmem:[%s3398_s16 + $0xd0] sm:$0xff] %vm412_vm1, %v1806_v43 }
 0x337   : > { %v1888_v26 = vadd.f32 %v1887_v24, %v1886_v20  ;;  %v1992_v8 = vsel %vm412_vm1, %v1934_v23, 0.0 }
 0x338   : > { %v1990_v37 = vsel %vm412_vm1, %v1933_v25, 0.0 }
 0x339   : > { %v1991_v27 = vadd.f32 %v1990_v37, %v1989_v22  ;;  %v1890_v7 = vadd.f32 %v1889_v36, %v1888_v26 }
 0x33b   : > { %v1993_v31 = vadd.f32 %v1992_v8, %v1991_v27 }
 0x344   : > { %v2278_v38 = vpop.f32.mrb[12].mxu1 }
 0x345   : > { %2038 = vst.msk [vmem:[%s3398_s16 + $0xe8] sm:$0xff] %vm412_vm1, %v2278_v38  ;;  %v1816_v39 = vpop.f32.mrb[13].mxu1  ;;  %v1936_v44 = vmul.f32 %v2278_v38, %v2278_v38  ;;  %v1893_v47 = vsel %vm412_vm1, %v2278_v38, 0.0 }
 0x346   : > { %v1891_v46 = vsel %vm412_vm1, %v1816_v39, 0.0  ;;  %v1935_v41 = vmul.f32 %v1816_v39, %v1816_v39  ;;  %2037 = vst.msk [vmem:[%s3398_s16 + $0xe0] sm:$0xff] %vm412_vm1, %v1816_v39 }
 0x347   : > { %v1892_v42 = vadd.f32 %v1891_v46, %v1890_v7  ;;  %v1996_v48 = vsel %vm412_vm1, %v1936_v44, 0.0 }
 0x348   : > { %v1994_v13 = vsel %vm412_vm1, %v1935_v41, 0.0 }
 0x349   : > { %v1995_v14 = vadd.f32 %v1994_v13, %v1993_v31  ;;  %v1894_v29 = vadd.f32 %v1893_v47, %v1892_v42 }
 0x34b   : > { %v1997_v49 = vadd.f32 %v1996_v48, %v1995_v14 }
 0x350   : > { %v2281_v40 = vpop.f32.mrb[14].mxu1 }
 0x351   : > { %2040 = vst.msk [vmem:[%s3398_s16 + $0xf8] sm:$0xff] %vm412_vm1, %v2281_v40  ;;  %v1826_v45 = vpop.f32.mrb[15].mxu1  ;;  %v1938_v50 = vmul.f32 %v2281_v40, %v2281_v40  ;;  %v1897_v10 = vsel %vm412_vm1, %v2281_v40, 0.0 }
 0x352   : > { %v1895_v0 = vsel %vm412_vm1, %v1826_v45, 0.0  ;;  %v1937_v51 = vmul.f32 %v1826_v45, %v1826_v45  ;;  %2039 = vst.msk [vmem:[%s3398_s16 + $0xf0] sm:$0xff] %vm412_vm1, %v1826_v45 }
 0x353   : > { %v1896_v53 = vadd.f32 %v1895_v0, %v1894_v29  ;;  %v2000_v35 = vsel %vm412_vm1, %v1938_v50, 0.0 }
 0x354   : > { %v1998_v52 = vsel %vm412_vm1, %v1937_v51, 0.0 }
 0x355   : > { %v1898_v56 = vadd.f32 %v1897_v10, %v1896_v53  ;;  %v1999_v15 = vadd.f32 %v1998_v52, %v1997_v49 }
 0x357   : > { %v1899_v54 = vrot.slane %v1898_v56, 4  ;;  %v2001_v55 = vadd.f32 %v2000_v35, %v1999_v15 }
 0x359   : > { %v1900_v57 = vadd.f32 %v1899_v54, %v1898_v56  ;;  %v2002_v58 = vrot.slane %v2001_v55, 4 }
 0x35b   : > { %v1901_v59 = vrot.slane %v1900_v57, 2  ;;  %v2003_v60 = vadd.f32 %v2002_v58, %v2001_v55 }
 0x35d   : > { %v1902_v61 = vadd.f32 %v1901_v59, %v1900_v57  ;;  %v2004_v62 = vrot.slane %v2003_v60, 2 }
 0x35f   : > { %v1903_v3 = vrot.slane %v1902_v61, 1  ;;  %v2005_v4 = vadd.f32 %v2004_v62, %v2003_v60 }
 0x361   : > { %v1904_v5 = vadd.f32 %v1903_v3, %v1902_v61  ;;  %v2006_v9 = vrot.slane %v2005_v4, 1 }
 0x363   : > { %1906 = vst.msk [vmem:[%s3552_s15] sm:$0x1] %vm1905_vm0, %v1904_v5  ;;  %v2007_v1 = vadd.f32 %v2006_v9, %v2005_v4 }
 0x365   : > { %2008 = vst.msk [vmem:[%s3552_s15 + $0x1] sm:$0x1] %vm1905_vm0, %v2007_v1 }
 0x366 PF: > { %s16_s18 = sadd.s32 1, %s2333_s18  }
 0x367   : > { %p13_p4 = scmp.ge.s32.totalorder %s16_s18, 4  }
 0x369   :  { %15 = sbr.rel (!%p13_p4) target bundleno = 1 (0x1), region = 79 }

</bundles_post_ra>
